<compile_context>
chip_gen: v6e
topology: v6e:2x2x1
jax: 0.10.0
libtpu: 0.0.40
codegen_flags: <defaults>
</compile_context>

<pallas_src>
import functools

import jax
import jax.numpy as jnp
from jax.experimental import pallas as pl
from jax.experimental.pallas import tpu as pltpu

_VMEM_LIMIT = 48 * 1024 * 1024   # ~75% of v7x 64 MiB; also raises v5e's 16 MiB scoped default
_LINEAR_TILE_M = 512             # ~85% of HBM roofline per measured tile-size curve
_BATCH_TILE = 256                # batch tile for the recurrence / attention kernels


# ------------------------------------------------------------------
# Tiled linear kernel: y = x @ W + b  (bf16 operands, f32 accumulation).
# Grid over M row-tiles, marked "parallel".  K/N are small in HAN so they stay
# untiled (full blocks); add K/N tiling + an f32 accumulator if they grow.
# ------------------------------------------------------------------
def _linear_kernel(x_ref, w_ref, b_ref, o_ref):
    o_ref[...] = jnp.dot(x_ref[...].astype(jnp.bfloat16), w_ref[...],
                         preferred_element_type=jnp.float32) + b_ref[...]


def linear(x, w_bf16, b):
    M, K = x.shape
    N = w_bf16.shape[-1]
    tm = M if M <= _LINEAR_TILE_M else _LINEAR_TILE_M
    return pl.pallas_call(
        _linear_kernel,
        out_shape=jax.ShapeDtypeStruct((M, N), jnp.float32),
        grid=(pl.cdiv(M, tm),),
        in_specs=[
            pl.BlockSpec((tm, K), lambda i: (i, 0)),
            pl.BlockSpec((K, N), lambda i: (0, 0)),
            pl.BlockSpec((1, N), lambda i: (0, 0)),
        ],
        out_specs=pl.BlockSpec((tm, N), lambda i: (i, 0)),
        compiler_params=pltpu.CompilerParams(
            dimension_semantics=("parallel",),
            vmem_limit_bytes=_VMEM_LIMIT),
    )(x, w_bf16, b)


# ------------------------------------------------------------------
# Fused bidirectional GRU recurrence (both directions advance jointly).
#
# Wrapper precomputes gates = x @ [Wih_f|Wih_b] + [bih_f|bih_b] and reshuffles them
# to (T, 3, Bm, 2H): leading gate axis (r, z, n), each gate's lanes = [fwd H | bwd H],
# with the backward half already time-reversed.  The recurrence keeps the joint state
# h = [h_f | h_b] (B, 2H) and does ONE bf16 MXU matmul per step against a
# block-diagonal Whh (2H, 6H) whose columns are gate-major / direction-minor.
# PyTorch gate math (r, z, n):
#   r = sigmoid(gi_r + h Whr + bhr); z = sigmoid(gi_z + h Whz + bhz)
#   n = tanh(gi_n + r * (h Whn + bhn)); h' = (1-z)*n + z*h
# ------------------------------------------------------------------
def _bigru_kernel(g_ref, whh_ref, bhh_ref, out_ref, hf_scr, hb_scr, *, unroll):
    T = g_ref.shape[0]
    Bt = g_ref.shape[2]
    twoH = g_ref.shape[3]
    H = twoH // 2

    whh = whh_ref[...]      # (2H, 6H) bf16, block-diagonal over directions
    bhh = bhh_ref[...]      # (1, 6H)  f32, [r_f r_b z_f z_b n_f n_b]

    def step(t, h):
        # h: (Bt, 2H) f32, lanes = [h_fwd | h_bwd]
        hg = jnp.dot(h.astype(jnp.bfloat16), whh,
                     preferred_element_type=jnp.float32) + bhh        # (Bt, 6H)
        gi = g_ref[t]                                                 # (3, Bt, 2H)
        r = jax.nn.sigmoid(gi[0] + hg[:, 0:twoH])
        z = jax.nn.sigmoid(gi[1] + hg[:, twoH:2 * twoH])
        n = jnp.tanh(gi[2] + r * hg[:, 2 * twoH:3 * twoH])
        h_new = (1.0 - z) * n + z * h
        hf_scr[t] = h_new[:, 0:H]            # fwd state for time t
        hb_scr[T - 1 - t] = h_new[:, H:twoH]  # bwd state belongs at time T-1-t
        return h_new

    h0 = jnp.zeros((Bt, twoH), jnp.float32)
    jax.lax.fori_loop(0, T, step, h0, unroll=unroll)

    # Two lane-slab writebacks (PyTorch bi-GRU output layout [fwd | bwd]).
    out_ref[:, :, 0:H] = hf_scr[...]
    out_ref[:, :, H:twoH] = hb_scr[...]


def _bigru_call(gates, whh_blk, bhh_blk):
    T, _, Bm, twoH = gates.shape
    H = twoH // 2
    tile_b = Bm if Bm <= _BATCH_TILE else _BATCH_TILE
    kernel = functools.partial(_bigru_kernel, unroll=min(T, 8))
    return pl.pallas_call(
        kernel,
        out_shape=jax.ShapeDtypeStruct((T, Bm, twoH), jnp.float32),
        grid=(pl.cdiv(Bm, tile_b),),
        in_specs=[
            pl.BlockSpec((T, 3, tile_b, twoH), lambda i: (0, 0, i, 0)),
            pl.BlockSpec((twoH, 3 * twoH), lambda i: (0, 0)),
            pl.BlockSpec((1, 3 * twoH), lambda i: (0, 0)),
        ],
        out_specs=pl.BlockSpec((T, tile_b, twoH), lambda i: (0, i, 0)),
        scratch_shapes=[
            pltpu.VMEM((T, tile_b, H), jnp.float32),
            pltpu.VMEM((T, tile_b, H), jnp.float32),
        ],
        compiler_params=pltpu.CompilerParams(
            dimension_semantics=("parallel",),
            vmem_limit_bytes=_VMEM_LIMIT),
    )(gates, whh_blk, bhh_blk)


def bigru_layer(x_seq, gru):
    """x_seq: (T, Bm, D) time-major.  Returns (T, Bm, 2H) in PyTorch bi-GRU layout."""
    T, Bm, D = x_seq.shape
    H = gru["whh_blk"].shape[0] // 2
    # One fused input-projection matmul for both directions & all gates.
    gates = linear(x_seq.reshape(T * Bm, D), gru["wih"], gru["bih"])   # (T*Bm, 6H)
    # Wrapper-side layout plumbing (single copy instead of per-timestep lane slices):
    # split direction/gate onto leading axes, time-reverse the backward gates, and lay
    # each gate out as a [fwd | bwd] 2H lane block for the joint-direction recurrence.
    g = gates.reshape(T, Bm, 2, 3, H)
    g_f = g[:, :, 0]                                   # (T, Bm, 3, H)
    g_b = jnp.flip(g[:, :, 1], axis=0)                 # backward dir, time reversed
    g_comb = jnp.stack([g_f, g_b], axis=3)             # (T, Bm, 3, 2, H)
    g_comb = jnp.transpose(g_comb, (0, 2, 1, 3, 4)).reshape(T, 3, Bm, 2 * H)
    return _bigru_call(g_comb, gru["whh_blk"], gru["bhh_blk"])


# ------------------------------------------------------------------
# Fused attention pooling: u = tanh(h W + b); s = <u, ctx>; a = softmax_T(s);
# out = sum_T a * h.  Single kernel, batch-tiled "parallel" grid; h is read once
# and u never leaves VMEM.
# ------------------------------------------------------------------
def _attn_pool_kernel(h_ref, w_ref, b_ref, ctx_ref, o_ref):
    T, Bt, F = h_ref.shape
    h = h_ref[...]                                                    # (T, Bt, F)
    u = jnp.tanh(jnp.dot(h.reshape(T * Bt, F).astype(jnp.bfloat16), w_ref[...],
                         preferred_element_type=jnp.float32) + b_ref[...])
    s = jnp.sum(u * ctx_ref[...], axis=-1, keepdims=True)             # (T*Bt, 1)
    s = s.reshape(T, Bt, 1)
    m = jnp.max(s, axis=0, keepdims=True)                             # (1, Bt, 1)
    p = jnp.exp(s - m)                                                # (T, Bt, 1)
    l = jnp.sum(p, axis=0)                                            # (Bt, 1)
    acc = jnp.sum(p * h, axis=0)                                      # (Bt, F)
    o_ref[...] = acc * pl.reciprocal(l, approx=True)


def attn_pool(h, att):
    T, B, F = h.shape
    tile_b = B if B <= _BATCH_TILE else _BATCH_TILE
    return pl.pallas_call(
        _attn_pool_kernel,
        out_shape=jax.ShapeDtypeStruct((B, F), jnp.float32),
        grid=(pl.cdiv(B, tile_b),),
        in_specs=[
            pl.BlockSpec((T, tile_b, F), lambda i: (0, i, 0)),
            pl.BlockSpec((F, F), lambda i: (0, 0)),
            pl.BlockSpec((1, F), lambda i: (0, 0)),
            pl.BlockSpec((1, F), lambda i: (0, 0)),
        ],
        out_specs=pl.BlockSpec((tile_b, F), lambda i: (i, 0)),
        compiler_params=pltpu.CompilerParams(
            dimension_semantics=("parallel",),
            vmem_limit_bytes=_VMEM_LIMIT),
    )(h, att["w"], att["b"], att["ctx"])


# ------------------------------------------------------------------
# Parameters (mode='rand': random embedding, as in the PyTorch module).
# Raw GRU weights per direction: wih (D, 3H), whh (H, 3H), biases (1, 3H),
# PyTorch gate order [r | z | n].
# ------------------------------------------------------------------
def init_params(key, words_num, words_dim, word_hidden, sent_hidden, target_class):
    def u(k, shape, a):
        return jax.random.uniform(k, shape, jnp.float32, -a, a)

    keys = iter(jax.random.split(key, 32))

    def gru_dir(in_dim, hid):
        a = hid ** -0.5
        return dict(
            wih=u(next(keys), (in_dim, 3 * hid), a),
            whh=u(next(keys), (hid, 3 * hid), a),
            bih=u(next(keys), (1, 3 * hid), a),
            bhh=u(next(keys), (1, 3 * hid), a),
        )

    return dict(
        embed=u(next(keys), (words_num, words_dim), 0.25),
        word_gru_f=gru_dir(words_dim, word_hidden),
        word_gru_b=gru_dir(words_dim, word_hidden),
        word_lin_w=u(next(keys), (2 * word_hidden, 2 * word_hidden), 0.1),
        word_lin_b=u(next(keys), (1, 2 * word_hidden), 0.1),
        word_ctx=u(next(keys), (1, 2 * word_hidden), 0.25),
        sent_gru_f=gru_dir(2 * word_hidden, sent_hidden),
        sent_gru_b=gru_dir(2 * word_hidden, sent_hidden),
        sent_lin_w=u(next(keys), (2 * sent_hidden, 2 * sent_hidden), 0.1),
        sent_lin_b=u(next(keys), (1, 2 * sent_hidden), 0.1),
        sent_ctx=u(next(keys), (1, 2 * sent_hidden), 0.1),
        fc_w=u(next(keys), (2 * sent_hidden, target_class), 0.1),
        fc_b=u(next(keys), (1, target_class), 0.1),
    )


def prepare_params(p):
    """One-time weight prep: fuse direction/gate weights, build block-diagonal Whh,
    and pre-cast all static matmul weights to bf16 (halves weight DMA bytes and
    removes in-kernel casts)."""
    def gru_prep(f, b):
        H = f["whh"].shape[0]
        wih = jnp.concatenate([f["wih"], b["wih"]], axis=-1).astype(jnp.bfloat16)
        bih = jnp.concatenate([f["bih"], b["bih"]], axis=-1)
        # Block-diagonal Whh (2H, 6H), columns gate-major / direction-minor.
        wf = f["whh"].reshape(H, 3, H)
        wb = b["whh"].reshape(H, 3, H)
        top = jnp.stack([wf, jnp.zeros_like(wf)], axis=2)     # rows fed by h_fwd
        bot = jnp.stack([jnp.zeros_like(wb), wb], axis=2)     # rows fed by h_bwd
        whh_blk = jnp.concatenate([top, bot], axis=0).reshape(2 * H, 6 * H)
        bhh_blk = jnp.stack([f["bhh"].reshape(3, H), b["bhh"].reshape(3, H)],
                            axis=1).reshape(1, 6 * H)
        return dict(wih=wih, bih=bih,
                    whh_blk=whh_blk.astype(jnp.bfloat16), bhh_blk=bhh_blk)

    return dict(
        embed=p["embed"],
        word_gru=gru_prep(p["word_gru_f"], p["word_gru_b"]),
        word_attn=dict(w=p["word_lin_w"].astype(jnp.bfloat16),
                       b=p["word_lin_b"], ctx=p["word_ctx"]),
        sent_gru=gru_prep(p["sent_gru_f"], p["sent_gru_b"]),
        sent_attn=dict(w=p["sent_lin_w"].astype(jnp.bfloat16),
                       b=p["sent_lin_b"], ctx=p["sent_ctx"]),
        fc_w=p["fc_w"].astype(jnp.bfloat16),
        fc_b=p["fc_b"],
    )


# ------------------------------------------------------------------
# HAN forward
# ------------------------------------------------------------------
@jax.jit
def han_forward(tokens, prep):
    B, S, W = tokens.shape
    # x.permute(1, 2, 0): (batch, num_sentences, num_words) -> (S, W, B)
    x = jnp.transpose(tokens, (1, 2, 0))
    emb = jnp.take(prep["embed"], x, axis=0)                     # (S, W, B, D)
    D = emb.shape[-1]
    # Merge (sentence, batch): the python loop over sentences becomes one batched pass.
    emb = jnp.transpose(emb, (1, 0, 2, 3)).reshape(W, S * B, D)  # (W, S*B, D)

    # ---- word level ----
    h_w = bigru_layer(emb, prep["word_gru"])                     # (W, S*B, 2*WH)
    word_attn = attn_pool(h_w, prep["word_attn"])                # (S*B, 2*WH)

    # ---- sentence level ----  (== torch.cat(word_attentions, 0) laid out (S, B, F))
    sent_in = word_attn.reshape(S, B, word_attn.shape[-1])
    h_s = bigru_layer(sent_in, prep["sent_gru"])                 # (S, B, 2*SH)
    pooled = attn_pool(h_s, prep["sent_attn"])                   # (B, 2*SH)
    return linear(pooled, prep["fc_w"], prep["fc_b"])            # (B, target_class)


if __name__ == "__main__":
    key = jax.random.PRNGKey(0)
    batch, num_sentences, num_words = 2, 4, 8
    words_num, words_dim = 50, 32
    word_hidden, sent_hidden, target_class = 16, 16, 5

    kp, kt = jax.random.split(key)
    raw_params = init_params(kp, words_num, words_dim, word_hidden, sent_hidden,
                             target_class)
    prep = prepare_params(raw_params)
    tokens = jax.random.randint(kt, (batch, num_sentences, num_words), 0, words_num,
                                dtype=jnp.int32)

    logits = han_forward(tokens, prep)
    jax.block_until_ready(logits)
    assert logits.shape == (batch, target_class)
    assert bool(jnp.all(jnp.isfinite(logits)))
    print("KERNEL_OK")
</pallas_src>

<mosaic_0001>
module attributes {stable_mosaic.version = 11 : i64} {
  func.func @_linear_kernel(%arg0: i32, %arg1: memref<64x32xf32, #tpu.memory_space<vmem>>, %arg2: memref<32x96xbf16, #tpu.memory_space<vmem>>, %arg3: memref<1x96xf32, #tpu.memory_space<vmem>>, %arg4: memref<64x96xf32, #tpu.memory_space<vmem>>) attributes {dimension_semantics = [#tpu.dimension_semantics<parallel>], iteration_bounds = array<i64: 1>, scalar_prefetch = 0 : i64, scratch_operands = 0 : i64, tpu.core_type = #tpu.core_type<tc>, window_params = [{transform_indices = @transform_0, window_bounds = array<i64: 64, 32>}, {pipeline_mode = #tpu.pipeline_mode<synchronous>, transform_indices = @transform_1, window_bounds = array<i64: 32, 96>}, {pipeline_mode = #tpu.pipeline_mode<synchronous>, transform_indices = @transform_2, window_bounds = array<i64: 1, 96>}, {transform_indices = @transform_3, window_bounds = array<i64: 64, 96>}]} {
    %c0 = arith.constant 0 : index
    %c0_0 = arith.constant 0 : index
    %0 = vector.load %arg1[%c0, %c0_0] : memref<64x32xf32, #tpu.memory_space<vmem>>, vector<64x32xf32>
    %1 = arith.truncf %0 : vector<64x32xf32> to vector<64x32xbf16>
    %c0_1 = arith.constant 0 : index
    %c0_2 = arith.constant 0 : index
    %2 = vector.load %arg2[%c0_1, %c0_2] : memref<32x96xbf16, #tpu.memory_space<vmem>>, vector<32x96xbf16>
    %cst = arith.constant dense<0.000000e+00> : vector<64x96xf32>
    %3 = tpu.matmul %1, %2, %cst {dimension_numbers = #tpu.dot_dimension_numbers<[1], [0], [0], [1], [0, 0, 1, 1], [], []>} : vector<64x32xbf16>, vector<32x96xbf16>, vector<64x96xf32> -> vector<64x96xf32>
    %c0_3 = arith.constant 0 : index
    %c0_4 = arith.constant 0 : index
    %4 = vector.load %arg3[%c0_3, %c0_4] : memref<1x96xf32, #tpu.memory_space<vmem>>, vector<1x96xf32>
    %5 = vector.broadcast %4 : vector<1x96xf32> to vector<64x96xf32>
    %6 = arith.addf %3, %5 : vector<64x96xf32>
    %c0_5 = arith.constant 0 : index
    %c0_6 = arith.constant 0 : index
    %7 = vector.load %arg4[%c0_5, %c0_6] : memref<64x96xf32, #tpu.memory_space<vmem>>, vector<64x96xf32>
    tpu.vector_store %arg4[%c0_5, %c0_6], %6 {strides = array<i32>} : memref<64x96xf32, #tpu.memory_space<vmem>>, vector<64x96xf32>,
    return
  }
  func.func @transform_0(%arg0: i32) -> (i32, i32) {
    %c0_i32 = arith.constant 0 : i32
    %c0_i32_0 = arith.constant 0 : i32
    return %arg0, %c0_i32 : i32, i32
  }
  func.func @transform_1(%arg0: i32) -> (i32, i32) {
    %c0_i32 = arith.constant 0 : i32
    %c0_i32_0 = arith.constant 0 : i32
    %c0_i32_1 = arith.constant 0 : i32
    return %c0_i32, %c0_i32_0 : i32, i32
  }
  func.func @transform_2(%arg0: i32) -> (i32, i32) {
    %c0_i32 = arith.constant 0 : i32
    %c0_i32_0 = arith.constant 0 : i32
    %c0_i32_1 = arith.constant 0 : i32
    return %c0_i32, %c0_i32_0 : i32, i32
  }
  func.func @transform_3(%arg0: i32) -> (i32, i32) {
    %c0_i32 = arith.constant 0 : i32
    %c0_i32_0 = arith.constant 0 : i32
    return %arg0, %c0_i32 : i32, i32
  }
}

module attributes {stable_mosaic.version = 11 : i64} {
  func.func @_bigru_kernel(%arg0: i32, %arg1: memref<8x3x8x32xf32, #tpu.memory_space<vmem>>, %arg2: memref<32x96xbf16, #tpu.memory_space<vmem>>, %arg3: memref<1x96xf32, #tpu.memory_space<vmem>>, %arg4: memref<8x8x32xf32, #tpu.memory_space<vmem>>, %arg5: memref<8x8x16xf32, #tpu.memory_space<vmem>>, %arg6: memref<8x8x16xf32, #tpu.memory_space<vmem>>) attributes {dimension_semantics = [#tpu.dimension_semantics<parallel>], iteration_bounds = array<i64: 1>, scalar_prefetch = 0 : i64, scratch_operands = 2 : i64, tpu.core_type = #tpu.core_type<tc>, window_params = [{transform_indices = @transform_0, window_bounds = array<i64: 8, 3, 8, 32>}, {pipeline_mode = #tpu.pipeline_mode<synchronous>, transform_indices = @transform_1, window_bounds = array<i64: 32, 96>}, {pipeline_mode = #tpu.pipeline_mode<synchronous>, transform_indices = @transform_2, window_bounds = array<i64: 1, 96>}, {transform_indices = @transform_3, window_bounds = array<i64: 8, 8, 32>}]} {
    %c0 = arith.constant 0 : index
    %c0_0 = arith.constant 0 : index
    %0 = vector.load %arg2[%c0, %c0_0] : memref<32x96xbf16, #tpu.memory_space<vmem>>, vector<32x96xbf16>
    %c0_1 = arith.constant 0 : index
    %c0_2 = arith.constant 0 : index
    %1 = vector.load %arg3[%c0_1, %c0_2] : memref<1x96xf32, #tpu.memory_space<vmem>>, vector<1x96xf32>
    %cst = arith.constant 0.000000e+00 : f32
    %2 = vector.broadcast %cst : f32 to vector<8x32xf32>
    %c0_i32 = arith.constant 0 : i32
    %3 = arith.truncf %2 : vector<8x32xf32> to vector<8x32xbf16>
    %cst_3 = arith.constant dense<0.000000e+00> : vector<8x96xf32>
    %4 = tpu.matmul %3, %0, %cst_3 {dimension_numbers = #tpu.dot_dimension_numbers<[1], [0], [0], [1], [0, 0, 1, 1], [], []>} : vector<8x32xbf16>, vector<32x96xbf16>, vector<8x96xf32> -> vector<8x96xf32>
    %5 = vector.broadcast %1 : vector<1x96xf32> to vector<8x96xf32>
    %6 = arith.addf %4, %5 : vector<8x96xf32>
    %7 = arith.index_cast %c0_i32 : i32 to index
    %c0_4 = arith.constant 0 : index
    %c0_5 = arith.constant 0 : index
    %c0_6 = arith.constant 0 : index
    %8 = vector.load %arg1[%7, %c0_4, %c0_5, %c0_6] : memref<8x3x8x32xf32, #tpu.memory_space<vmem>>, vector<1x3x8x32xf32>
    %9 = vector.shape_cast %8 : vector<1x3x8x32xf32> to vector<3x8x32xf32>
    %10 = vector.extract_strided_slice %9 {offsets = [0, 0, 0], sizes = [1, 8, 32], strides = [1, 1, 1]} : vector<3x8x32xf32> to vector<1x8x32xf32>
    %11 = vector.shape_cast %10 : vector<1x8x32xf32> to vector<8x32xf32>
    %12 = vector.extract_strided_slice %6 {offsets = [0, 0], sizes = [8, 32], strides = [1, 1]} : vector<8x96xf32> to vector<8x32xf32>
    %13 = arith.addf %11, %12 : vector<8x32xf32>
    %14 = arith.negf %13 : vector<8x32xf32>
    %15 = math.exp %14 : vector<8x32xf32>
    %cst_7 = arith.constant 1.000000e+00 : f32
    %16 = vector.broadcast %cst_7 : f32 to vector<8x32xf32>
    %17 = arith.addf %16, %15 : vector<8x32xf32>
    %18 = arith.divf %16, %17 : vector<8x32xf32>
    %19 = vector.extract_strided_slice %9 {offsets = [1, 0, 0], sizes = [1, 8, 32], strides = [1, 1, 1]} : vector<3x8x32xf32> to vector<1x8x32xf32>
    %20 = vector.shape_cast %19 : vector<1x8x32xf32> to vector<8x32xf32>
    %21 = vector.extract_strided_slice %6 {offsets = [0, 32], sizes = [8, 32], strides = [1, 1]} : vector<8x96xf32> to vector<8x32xf32>
    %22 = arith.addf %20, %21 : vector<8x32xf32>
    %23 = arith.negf %22 : vector<8x32xf32>
    %24 = math.exp %23 : vector<8x32xf32>
    %cst_8 = arith.constant 1.000000e+00 : f32
    %25 = vector.broadcast %cst_8 : f32 to vector<8x32xf32>
    %26 = arith.addf %25, %24 : vector<8x32xf32>
    %27 = arith.divf %25, %26 : vector<8x32xf32>
    %28 = vector.extract_strided_slice %9 {offsets = [2, 0, 0], sizes = [1, 8, 32], strides = [1, 1, 1]} : vector<3x8x32xf32> to vector<1x8x32xf32>
    %29 = vector.shape_cast %28 : vector<1x8x32xf32> to vector<8x32xf32>
    %30 = vector.extract_strided_slice %6 {offsets = [0, 64], sizes = [8, 32], strides = [1, 1]} : vector<8x96xf32> to vector<8x32xf32>
    %31 = arith.mulf %18, %30 : vector<8x32xf32>
    %32 = arith.addf %29, %31 : vector<8x32xf32>
    %33 = math.tanh %32 : vector<8x32xf32>
    %cst_9 = arith.constant 1.000000e+00 : f32
    %34 = vector.broadcast %cst_9 : f32 to vector<8x32xf32>
    %35 = arith.subf %34, %27 : vector<8x32xf32>
    %36 = arith.mulf %35, %33 : vector<8x32xf32>
    %37 = arith.mulf %27, %2 : vector<8x32xf32>
    %38 = arith.addf %36, %37 : vector<8x32xf32>
    %39 = vector.extract_strided_slice %38 {offsets = [0, 0], sizes = [8, 16], strides = [1, 1]} : vector<8x32xf32> to vector<8x16xf32>
    %40 = arith.index_cast %c0_i32 : i32 to index
    %c0_10 = arith.constant 0 : index
    %c0_11 = arith.constant 0 : index
    %41 = vector.load %arg5[%40, %c0_10, %c0_11] : memref<8x8x16xf32, #tpu.memory_space<vmem>>, vector<1x8x16xf32>
    %42 = vector.shape_cast %41 : vector<1x8x16xf32> to vector<8x16xf32>
    %43 = vector.shape_cast %39 : vector<8x16xf32> to vector<1x8x16xf32>
    tpu.vector_store %arg5[%40, %c0_10, %c0_11], %43 {strides = array<i32>} : memref<8x8x16xf32, #tpu.memory_space<vmem>>, vector<1x8x16xf32>,
    %44 = vector.extract_strided_slice %38 {offsets = [0, 16], sizes = [8, 16], strides = [1, 1]} : vector<8x32xf32> to vector<8x16xf32>
    %c7_i32 = arith.constant 7 : i32
    %45 = arith.subi %c7_i32, %c0_i32 : i32
    %46 = arith.index_cast %45 : i32 to index
    %c0_12 = arith.constant 0 : index
    %c0_13 = arith.constant 0 : index
    %47 = vector.load %arg6[%46, %c0_12, %c0_13] : memref<8x8x16xf32, #tpu.memory_space<vmem>>, vector<1x8x16xf32>
    %48 = vector.shape_cast %47 : vector<1x8x16xf32> to vector<8x16xf32>
    %49 = vector.shape_cast %44 : vector<8x16xf32> to vector<1x8x16xf32>
    tpu.vector_store %arg6[%46, %c0_12, %c0_13], %49 {strides = array<i32>} : memref<8x8x16xf32, #tpu.memory_space<vmem>>, vector<1x8x16xf32>,
    %c1_i32 = arith.constant 1 : i32
    %50 = arith.truncf %38 : vector<8x32xf32> to vector<8x32xbf16>
    %cst_14 = arith.constant dense<0.000000e+00> : vector<8x96xf32>
    %51 = tpu.matmul %50, %0, %cst_14 {dimension_numbers = #tpu.dot_dimension_numbers<[1], [0], [0], [1], [0, 0, 1, 1], [], []>} : vector<8x32xbf16>, vector<32x96xbf16>, vector<8x96xf32> -> vector<8x96xf32>
    %52 = vector.broadcast %1 : vector<1x96xf32> to vector<8x96xf32>
    %53 = arith.addf %51, %52 : vector<8x96xf32>
    %54 = arith.index_cast %c1_i32 : i32 to index
    %c0_15 = arith.constant 0 : index
    %c0_16 = arith.constant 0 : index
    %c0_17 = arith.constant 0 : index
    %55 = vector.load %arg1[%54, %c0_15, %c0_16, %c0_17] : memref<8x3x8x32xf32, #tpu.memory_space<vmem>>, vector<1x3x8x32xf32>
    %56 = vector.shape_cast %55 : vector<1x3x8x32xf32> to vector<3x8x32xf32>
    %57 = vector.extract_strided_slice %56 {offsets = [0, 0, 0], sizes = [1, 8, 32], strides = [1, 1, 1]} : vector<3x8x32xf32> to vector<1x8x32xf32>
    %58 = vector.shape_cast %57 : vector<1x8x32xf32> to vector<8x32xf32>
    %59 = vector.extract_strided_slice %53 {offsets = [0, 0], sizes = [8, 32], strides = [1, 1]} : vector<8x96xf32> to vector<8x32xf32>
    %60 = arith.addf %58, %59 : vector<8x32xf32>
    %61 = arith.negf %60 : vector<8x32xf32>
    %62 = math.exp %61 : vector<8x32xf32>
    %cst_18 = arith.constant 1.000000e+00 : f32
    %63 = vector.broadcast %cst_18 : f32 to vector<8x32xf32>
    %64 = arith.addf %63, %62 : vector<8x32xf32>
    %65 = arith.divf %63, %64 : vector<8x32xf32>
    %66 = vector.extract_strided_slice %56 {offsets = [1, 0, 0], sizes = [1, 8, 32], strides = [1, 1, 1]} : vector<3x8x32xf32> to vector<1x8x32xf32>
    %67 = vector.shape_cast %66 : vector<1x8x32xf32> to vector<8x32xf32>
    %68 = vector.extract_strided_slice %53 {offsets = [0, 32], sizes = [8, 32], strides = [1, 1]} : vector<8x96xf32> to vector<8x32xf32>
    %69 = arith.addf %67, %68 : vector<8x32xf32>
    %70 = arith.negf %69 : vector<8x32xf32>
    %71 = math.exp %70 : vector<8x32xf32>
    %cst_19 = arith.constant 1.000000e+00 : f32
    %72 = vector.broadcast %cst_19 : f32 to vector<8x32xf32>
    %73 = arith.addf %72, %71 : vector<8x32xf32>
    %74 = arith.divf %72, %73 : vector<8x32xf32>
    %75 = vector.extract_strided_slice %56 {offsets = [2, 0, 0], sizes = [1, 8, 32], strides = [1, 1, 1]} : vector<3x8x32xf32> to vector<1x8x32xf32>
    %76 = vector.shape_cast %75 : vector<1x8x32xf32> to vector<8x32xf32>
    %77 = vector.extract_strided_slice %53 {offsets = [0, 64], sizes = [8, 32], strides = [1, 1]} : vector<8x96xf32> to vector<8x32xf32>
    %78 = arith.mulf %65, %77 : vector<8x32xf32>
    %79 = arith.addf %76, %78 : vector<8x32xf32>
    %80 = math.tanh %79 : vector<8x32xf32>
    %cst_20 = arith.constant 1.000000e+00 : f32
    %81 = vector.broadcast %cst_20 : f32 to vector<8x32xf32>
    %82 = arith.subf %81, %74 : vector<8x32xf32>
    %83 = arith.mulf %82, %80 : vector<8x32xf32>
    %84 = arith.mulf %74, %38 : vector<8x32xf32>
    %85 = arith.addf %83, %84 : vector<8x32xf32>
    %86 = vector.extract_strided_slice %85 {offsets = [0, 0], sizes = [8, 16], strides = [1, 1]} : vector<8x32xf32> to vector<8x16xf32>
    %87 = arith.index_cast %c1_i32 : i32 to index
    %c0_21 = arith.constant 0 : index
    %c0_22 = arith.constant 0 : index
    %88 = vector.load %arg5[%87, %c0_21, %c0_22] : memref<8x8x16xf32, #tpu.memory_space<vmem>>, vector<1x8x16xf32>
    %89 = vector.shape_cast %88 : vector<1x8x16xf32> to vector<8x16xf32>
    %90 = vector.shape_cast %86 : vector<8x16xf32> to vector<1x8x16xf32>
    tpu.vector_store %arg5[%87, %c0_21, %c0_22], %90 {strides = array<i32>} : memref<8x8x16xf32, #tpu.memory_space<vmem>>, vector<1x8x16xf32>,
    %91 = vector.extract_strided_slice %85 {offsets = [0, 16], sizes = [8, 16], strides = [1, 1]} : vector<8x32xf32> to vector<8x16xf32>
    %c7_i32_23 = arith.constant 7 : i32
    %92 = arith.subi %c7_i32_23, %c1_i32 : i32
    %93 = arith.index_cast %92 : i32 to index
    %c0_24 = arith.constant 0 : index
    %c0_25 = arith.constant 0 : index
    %94 = vector.load %arg6[%93, %c0_24, %c0_25] : memref<8x8x16xf32, #tpu.memory_space<vmem>>, vector<1x8x16xf32>
    %95 = vector.shape_cast %94 : vector<1x8x16xf32> to vector<8x16xf32>
    %96 = vector.shape_cast %91 : vector<8x16xf32> to vector<1x8x16xf32>
    tpu.vector_store %arg6[%93, %c0_24, %c0_25], %96 {strides = array<i32>} : memref<8x8x16xf32, #tpu.memory_space<vmem>>, vector<1x8x16xf32>,
    %c2_i32 = arith.constant 2 : i32
    %97 = arith.truncf %85 : vector<8x32xf32> to vector<8x32xbf16>
    %cst_26 = arith.constant dense<0.000000e+00> : vector<8x96xf32>
    %98 = tpu.matmul %97, %0, %cst_26 {dimension_numbers = #tpu.dot_dimension_numbers<[1], [0], [0], [1], [0, 0, 1, 1], [], []>} : vector<8x32xbf16>, vector<32x96xbf16>, vector<8x96xf32> -> vector<8x96xf32>
    %99 = vector.broadcast %1 : vector<1x96xf32> to vector<8x96xf32>
    %100 = arith.addf %98, %99 : vector<8x96xf32>
    %101 = arith.index_cast %c2_i32 : i32 to index
    %c0_27 = arith.constant 0 : index
    %c0_28 = arith.constant 0 : index
    %c0_29 = arith.constant 0 : index
    %102 = vector.load %arg1[%101, %c0_27, %c0_28, %c0_29] : memref<8x3x8x32xf32, #tpu.memory_space<vmem>>, vector<1x3x8x32xf32>
    %103 = vector.shape_cast %102 : vector<1x3x8x32xf32> to vector<3x8x32xf32>
    %104 = vector.extract_strided_slice %103 {offsets = [0, 0, 0], sizes = [1, 8, 32], strides = [1, 1, 1]} : vector<3x8x32xf32> to vector<1x8x32xf32>
    %105 = vector.shape_cast %104 : vector<1x8x32xf32> to vector<8x32xf32>
    %106 = vector.extract_strided_slice %100 {offsets = [0, 0], sizes = [8, 32], strides = [1, 1]} : vector<8x96xf32> to vector<8x32xf32>
    %107 = arith.addf %105, %106 : vector<8x32xf32>
    %108 = arith.negf %107 : vector<8x32xf32>
    %109 = math.exp %108 : vector<8x32xf32>
    %cst_30 = arith.constant 1.000000e+00 : f32
    %110 = vector.broadcast %cst_30 : f32 to vector<8x32xf32>
    %111 = arith.addf %110, %109 : vector<8x32xf32>
    %112 = arith.divf %110, %111 : vector<8x32xf32>
    %113 = vector.extract_strided_slice %103 {offsets = [1, 0, 0], sizes = [1, 8, 32], strides = [1, 1, 1]} : vector<3x8x32xf32> to vector<1x8x32xf32>
    %114 = vector.shape_cast %113 : vector<1x8x32xf32> to vector<8x32xf32>
    %115 = vector.extract_strided_slice %100 {offsets = [0, 32], sizes = [8, 32], strides = [1, 1]} : vector<8x96xf32> to vector<8x32xf32>
    %116 = arith.addf %114, %115 : vector<8x32xf32>
    %117 = arith.negf %116 : vector<8x32xf32>
    %118 = math.exp %117 : vector<8x32xf32>
    %cst_31 = arith.constant 1.000000e+00 : f32
    %119 = vector.broadcast %cst_31 : f32 to vector<8x32xf32>
    %120 = arith.addf %119, %118 : vector<8x32xf32>
    %121 = arith.divf %119, %120 : vector<8x32xf32>
    %122 = vector.extract_strided_slice %103 {offsets = [2, 0, 0], sizes = [1, 8, 32], strides = [1, 1, 1]} : vector<3x8x32xf32> to vector<1x8x32xf32>
    %123 = vector.shape_cast %122 : vector<1x8x32xf32> to vector<8x32xf32>
    %124 = vector.extract_strided_slice %100 {offsets = [0, 64], sizes = [8, 32], strides = [1, 1]} : vector<8x96xf32> to vector<8x32xf32>
    %125 = arith.mulf %112, %124 : vector<8x32xf32>
    %126 = arith.addf %123, %125 : vector<8x32xf32>
    %127 = math.tanh %126 : vector<8x32xf32>
    %cst_32 = arith.constant 1.000000e+00 : f32
    %128 = vector.broadcast %cst_32 : f32 to vector<8x32xf32>
    %129 = arith.subf %128, %121 : vector<8x32xf32>
    %130 = arith.mulf %129, %127 : vector<8x32xf32>
    %131 = arith.mulf %121, %85 : vector<8x32xf32>
    %132 = arith.addf %130, %131 : vector<8x32xf32>
    %133 = vector.extract_strided_slice %132 {offsets = [0, 0], sizes = [8, 16], strides = [1, 1]} : vector<8x32xf32> to vector<8x16xf32>
    %134 = arith.index_cast %c2_i32 : i32 to index
    %c0_33 = arith.constant 0 : index
    %c0_34 = arith.constant 0 : index
    %135 = vector.load %arg5[%134, %c0_33, %c0_34] : memref<8x8x16xf32, #tpu.memory_space<vmem>>, vector<1x8x16xf32>
    %136 = vector.shape_cast %135 : vector<1x8x16xf32> to vector<8x16xf32>
    %137 = vector.shape_cast %133 : vector<8x16xf32> to vector<1x8x16xf32>
    tpu.vector_store %arg5[%134, %c0_33, %c0_34], %137 {strides = array<i32>} : memref<8x8x16xf32, #tpu.memory_space<vmem>>, vector<1x8x16xf32>,
    %138 = vector.extract_strided_slice %132 {offsets = [0, 16], sizes = [8, 16], strides = [1, 1]} : vector<8x32xf32> to vector<8x16xf32>
    %c7_i32_35 = arith.constant 7 : i32
    %139 = arith.subi %c7_i32_35, %c2_i32 : i32
    %140 = arith.index_cast %139 : i32 to index
    %c0_36 = arith.constant 0 : index
    %c0_37 = arith.constant 0 : index
    %141 = vector.load %arg6[%140, %c0_36, %c0_37] : memref<8x8x16xf32, #tpu.memory_space<vmem>>, vector<1x8x16xf32>
    %142 = vector.shape_cast %141 : vector<1x8x16xf32> to vector<8x16xf32>
    %143 = vector.shape_cast %138 : vector<8x16xf32> to vector<1x8x16xf32>
    tpu.vector_store %arg6[%140, %c0_36, %c0_37], %143 {strides = array<i32>} : memref<8x8x16xf32, #tpu.memory_space<vmem>>, vector<1x8x16xf32>,
    %c3_i32 = arith.constant 3 : i32
    %144 = arith.truncf %132 : vector<8x32xf32> to vector<8x32xbf16>
    %cst_38 = arith.constant dense<0.000000e+00> : vector<8x96xf32>
    %145 = tpu.matmul %144, %0, %cst_38 {dimension_numbers = #tpu.dot_dimension_numbers<[1], [0], [0], [1], [0, 0, 1, 1], [], []>} : vector<8x32xbf16>, vector<32x96xbf16>, vector<8x96xf32> -> vector<8x96xf32>
    %146 = vector.broadcast %1 : vector<1x96xf32> to vector<8x96xf32>
    %147 = arith.addf %145, %146 : vector<8x96xf32>
    %148 = arith.index_cast %c3_i32 : i32 to index
    %c0_39 = arith.constant 0 : index
    %c0_40 = arith.constant 0 : index
    %c0_41 = arith.constant 0 : index
    %149 = vector.load %arg1[%148, %c0_39, %c0_40, %c0_41] : memref<8x3x8x32xf32, #tpu.memory_space<vmem>>, vector<1x3x8x32xf32>
    %150 = vector.shape_cast %149 : vector<1x3x8x32xf32> to vector<3x8x32xf32>
    %151 = vector.extract_strided_slice %150 {offsets = [0, 0, 0], sizes = [1, 8, 32], strides = [1, 1, 1]} : vector<3x8x32xf32> to vector<1x8x32xf32>
    %152 = vector.shape_cast %151 : vector<1x8x32xf32> to vector<8x32xf32>
    %153 = vector.extract_strided_slice %147 {offsets = [0, 0], sizes = [8, 32], strides = [1, 1]} : vector<8x96xf32> to vector<8x32xf32>
    %154 = arith.addf %152, %153 : vector<8x32xf32>
    %155 = arith.negf %154 : vector<8x32xf32>
    %156 = math.exp %155 : vector<8x32xf32>
    %cst_42 = arith.constant 1.000000e+00 : f32
    %157 = vector.broadcast %cst_42 : f32 to vector<8x32xf32>
    %158 = arith.addf %157, %156 : vector<8x32xf32>
    %159 = arith.divf %157, %158 : vector<8x32xf32>
    %160 = vector.extract_strided_slice %150 {offsets = [1, 0, 0], sizes = [1, 8, 32], strides = [1, 1, 1]} : vector<3x8x32xf32> to vector<1x8x32xf32>
    %161 = vector.shape_cast %160 : vector<1x8x32xf32> to vector<8x32xf32>
    %162 = vector.extract_strided_slice %147 {offsets = [0, 32], sizes = [8, 32], strides = [1, 1]} : vector<8x96xf32> to vector<8x32xf32>
    %163 = arith.addf %161, %162 : vector<8x32xf32>
    %164 = arith.negf %163 : vector<8x32xf32>
    %165 = math.exp %164 : vector<8x32xf32>
    %cst_43 = arith.constant 1.000000e+00 : f32
    %166 = vector.broadcast %cst_43 : f32 to vector<8x32xf32>
    %167 = arith.addf %166, %165 : vector<8x32xf32>
    %168 = arith.divf %166, %167 : vector<8x32xf32>
    %169 = vector.extract_strided_slice %150 {offsets = [2, 0, 0], sizes = [1, 8, 32], strides = [1, 1, 1]} : vector<3x8x32xf32> to vector<1x8x32xf32>
    %170 = vector.shape_cast %169 : vector<1x8x32xf32> to vector<8x32xf32>
    %171 = vector.extract_strided_slice %147 {offsets = [0, 64], sizes = [8, 32], strides = [1, 1]} : vector<8x96xf32> to vector<8x32xf32>
    %172 = arith.mulf %159, %171 : vector<8x32xf32>
    %173 = arith.addf %170, %172 : vector<8x32xf32>
    %174 = math.tanh %173 : vector<8x32xf32>
    %cst_44 = arith.constant 1.000000e+00 : f32
    %175 = vector.broadcast %cst_44 : f32 to vector<8x32xf32>
    %176 = arith.subf %175, %168 : vector<8x32xf32>
    %177 = arith.mulf %176, %174 : vector<8x32xf32>
    %178 = arith.mulf %168, %132 : vector<8x32xf32>
    %179 = arith.addf %177, %178 : vector<8x32xf32>
    %180 = vector.extract_strided_slice %179 {offsets = [0, 0], sizes = [8, 16], strides = [1, 1]} : vector<8x32xf32> to vector<8x16xf32>
    %181 = arith.index_cast %c3_i32 : i32 to index
    %c0_45 = arith.constant 0 : index
    %c0_46 = arith.constant 0 : index
    %182 = vector.load %arg5[%181, %c0_45, %c0_46] : memref<8x8x16xf32, #tpu.memory_space<vmem>>, vector<1x8x16xf32>
    %183 = vector.shape_cast %182 : vector<1x8x16xf32> to vector<8x16xf32>
    %184 = vector.shape_cast %180 : vector<8x16xf32> to vector<1x8x16xf32>
    tpu.vector_store %arg5[%181, %c0_45, %c0_46], %184 {strides = array<i32>} : memref<8x8x16xf32, #tpu.memory_space<vmem>>, vector<1x8x16xf32>,
    %185 = vector.extract_strided_slice %179 {offsets = [0, 16], sizes = [8, 16], strides = [1, 1]} : vector<8x32xf32> to vector<8x16xf32>
    %c7_i32_47 = arith.constant 7 : i32
    %186 = arith.subi %c7_i32_47, %c3_i32 : i32
    %187 = arith.index_cast %186 : i32 to index
    %c0_48 = arith.constant 0 : index
    %c0_49 = arith.constant 0 : index
    %188 = vector.load %arg6[%187, %c0_48, %c0_49] : memref<8x8x16xf32, #tpu.memory_space<vmem>>, vector<1x8x16xf32>
    %189 = vector.shape_cast %188 : vector<1x8x16xf32> to vector<8x16xf32>
    %190 = vector.shape_cast %185 : vector<8x16xf32> to vector<1x8x16xf32>
    tpu.vector_store %arg6[%187, %c0_48, %c0_49], %190 {strides = array<i32>} : memref<8x8x16xf32, #tpu.memory_space<vmem>>, vector<1x8x16xf32>,
    %c4_i32 = arith.constant 4 : i32
    %191 = arith.truncf %179 : vector<8x32xf32> to vector<8x32xbf16>
    %cst_50 = arith.constant dense<0.000000e+00> : vector<8x96xf32>
    %192 = tpu.matmul %191, %0, %cst_50 {dimension_numbers = #tpu.dot_dimension_numbers<[1], [0], [0], [1], [0, 0, 1, 1], [], []>} : vector<8x32xbf16>, vector<32x96xbf16>, vector<8x96xf32> -> vector<8x96xf32>
    %193 = vector.broadcast %1 : vector<1x96xf32> to vector<8x96xf32>
    %194 = arith.addf %192, %193 : vector<8x96xf32>
    %195 = arith.index_cast %c4_i32 : i32 to index
    %c0_51 = arith.constant 0 : index
    %c0_52 = arith.constant 0 : index
    %c0_53 = arith.constant 0 : index
    %196 = vector.load %arg1[%195, %c0_51, %c0_52, %c0_53] : memref<8x3x8x32xf32, #tpu.memory_space<vmem>>, vector<1x3x8x32xf32>
    %197 = vector.shape_cast %196 : vector<1x3x8x32xf32> to vector<3x8x32xf32>
    %198 = vector.extract_strided_slice %197 {offsets = [0, 0, 0], sizes = [1, 8, 32], strides = [1, 1, 1]} : vector<3x8x32xf32> to vector<1x8x32xf32>
    %199 = vector.shape_cast %198 : vector<1x8x32xf32> to vector<8x32xf32>
    %200 = vector.extract_strided_slice %194 {offsets = [0, 0], sizes = [8, 32], strides = [1, 1]} : vector<8x96xf32> to vector<8x32xf32>
    %201 = arith.addf %199, %200 : vector<8x32xf32>
    %202 = arith.negf %201 : vector<8x32xf32>
    %203 = math.exp %202 : vector<8x32xf32>
    %cst_54 = arith.constant 1.000000e+00 : f32
    %204 = vector.broadcast %cst_54 : f32 to vector<8x32xf32>
    %205 = arith.addf %204, %203 : vector<8x32xf32>
    %206 = arith.divf %204, %205 : vector<8x32xf32>
    %207 = vector.extract_strided_slice %197 {offsets = [1, 0, 0], sizes = [1, 8, 32], strides = [1, 1, 1]} : vector<3x8x32xf32> to vector<1x8x32xf32>
    %208 = vector.shape_cast %207 : vector<1x8x32xf32> to vector<8x32xf32>
    %209 = vector.extract_strided_slice %194 {offsets = [0, 32], sizes = [8, 32], strides = [1, 1]} : vector<8x96xf32> to vector<8x32xf32>
    %210 = arith.addf %208, %209 : vector<8x32xf32>
    %211 = arith.negf %210 : vector<8x32xf32>
    %212 = math.exp %211 : vector<8x32xf32>
    %cst_55 = arith.constant 1.000000e+00 : f32
    %213 = vector.broadcast %cst_55 : f32 to vector<8x32xf32>
    %214 = arith.addf %213, %212 : vector<8x32xf32>
    %215 = arith.divf %213, %214 : vector<8x32xf32>
    %216 = vector.extract_strided_slice %197 {offsets = [2, 0, 0], sizes = [1, 8, 32], strides = [1, 1, 1]} : vector<3x8x32xf32> to vector<1x8x32xf32>
    %217 = vector.shape_cast %216 : vector<1x8x32xf32> to vector<8x32xf32>
    %218 = vector.extract_strided_slice %194 {offsets = [0, 64], sizes = [8, 32], strides = [1, 1]} : vector<8x96xf32> to vector<8x32xf32>
    %219 = arith.mulf %206, %218 : vector<8x32xf32>
    %220 = arith.addf %217, %219 : vector<8x32xf32>
    %221 = math.tanh %220 : vector<8x32xf32>
    %cst_56 = arith.constant 1.000000e+00 : f32
    %222 = vector.broadcast %cst_56 : f32 to vector<8x32xf32>
    %223 = arith.subf %222, %215 : vector<8x32xf32>
    %224 = arith.mulf %223, %221 : vector<8x32xf32>
    %225 = arith.mulf %215, %179 : vector<8x32xf32>
    %226 = arith.addf %224, %225 : vector<8x32xf32>
    %227 = vector.extract_strided_slice %226 {offsets = [0, 0], sizes = [8, 16], strides = [1, 1]} : vector<8x32xf32> to vector<8x16xf32>
    %228 = arith.index_cast %c4_i32 : i32 to index
    %c0_57 = arith.constant 0 : index
    %c0_58 = arith.constant 0 : index
    %229 = vector.load %arg5[%228, %c0_57, %c0_58] : memref<8x8x16xf32, #tpu.memory_space<vmem>>, vector<1x8x16xf32>
    %230 = vector.shape_cast %229 : vector<1x8x16xf32> to vector<8x16xf32>
    %231 = vector.shape_cast %227 : vector<8x16xf32> to vector<1x8x16xf32>
    tpu.vector_store %arg5[%228, %c0_57, %c0_58], %231 {strides = array<i32>} : memref<8x8x16xf32, #tpu.memory_space<vmem>>, vector<1x8x16xf32>,
    %232 = vector.extract_strided_slice %226 {offsets = [0, 16], sizes = [8, 16], strides = [1, 1]} : vector<8x32xf32> to vector<8x16xf32>
    %c7_i32_59 = arith.constant 7 : i32
    %233 = arith.subi %c7_i32_59, %c4_i32 : i32
    %234 = arith.index_cast %233 : i32 to index
    %c0_60 = arith.constant 0 : index
    %c0_61 = arith.constant 0 : index
    %235 = vector.load %arg6[%234, %c0_60, %c0_61] : memref<8x8x16xf32, #tpu.memory_space<vmem>>, vector<1x8x16xf32>
    %236 = vector.shape_cast %235 : vector<1x8x16xf32> to vector<8x16xf32>
    %237 = vector.shape_cast %232 : vector<8x16xf32> to vector<1x8x16xf32>
    tpu.vector_store %arg6[%234, %c0_60, %c0_61], %237 {strides = array<i32>} : memref<8x8x16xf32, #tpu.memory_space<vmem>>, vector<1x8x16xf32>,
    %c5_i32 = arith.constant 5 : i32
    %238 = arith.truncf %226 : vector<8x32xf32> to vector<8x32xbf16>
    %cst_62 = arith.constant dense<0.000000e+00> : vector<8x96xf32>
    %239 = tpu.matmul %238, %0, %cst_62 {dimension_numbers = #tpu.dot_dimension_numbers<[1], [0], [0], [1], [0, 0, 1, 1], [], []>} : vector<8x32xbf16>, vector<32x96xbf16>, vector<8x96xf32> -> vector<8x96xf32>
    %240 = vector.broadcast %1 : vector<1x96xf32> to vector<8x96xf32>
    %241 = arith.addf %239, %240 : vector<8x96xf32>
    %242 = arith.index_cast %c5_i32 : i32 to index
    %c0_63 = arith.constant 0 : index
    %c0_64 = arith.constant 0 : index
    %c0_65 = arith.constant 0 : index
    %243 = vector.load %arg1[%242, %c0_63, %c0_64, %c0_65] : memref<8x3x8x32xf32, #tpu.memory_space<vmem>>, vector<1x3x8x32xf32>
    %244 = vector.shape_cast %243 : vector<1x3x8x32xf32> to vector<3x8x32xf32>
    %245 = vector.extract_strided_slice %244 {offsets = [0, 0, 0], sizes = [1, 8, 32], strides = [1, 1, 1]} : vector<3x8x32xf32> to vector<1x8x32xf32>
    %246 = vector.shape_cast %245 : vector<1x8x32xf32> to vector<8x32xf32>
    %247 = vector.extract_strided_slice %241 {offsets = [0, 0], sizes = [8, 32], strides = [1, 1]} : vector<8x96xf32> to vector<8x32xf32>
    %248 = arith.addf %246, %247 : vector<8x32xf32>
    %249 = arith.negf %248 : vector<8x32xf32>
    %250 = math.exp %249 : vector<8x32xf32>
    %cst_66 = arith.constant 1.000000e+00 : f32
    %251 = vector.broadcast %cst_66 : f32 to vector<8x32xf32>
    %252 = arith.addf %251, %250 : vector<8x32xf32>
    %253 = arith.divf %251, %252 : vector<8x32xf32>
    %254 = vector.extract_strided_slice %244 {offsets = [1, 0, 0], sizes = [1, 8, 32], strides = [1, 1, 1]} : vector<3x8x32xf32> to vector<1x8x32xf32>
    %255 = vector.shape_cast %254 : vector<1x8x32xf32> to vector<8x32xf32>
    %256 = vector.extract_strided_slice %241 {offsets = [0, 32], sizes = [8, 32], strides = [1, 1]} : vector<8x96xf32> to vector<8x32xf32>
    %257 = arith.addf %255, %256 : vector<8x32xf32>
    %258 = arith.negf %257 : vector<8x32xf32>
    %259 = math.exp %258 : vector<8x32xf32>
    %cst_67 = arith.constant 1.000000e+00 : f32
    %260 = vector.broadcast %cst_67 : f32 to vector<8x32xf32>
    %261 = arith.addf %260, %259 : vector<8x32xf32>
    %262 = arith.divf %260, %261 : vector<8x32xf32>
    %263 = vector.extract_strided_slice %244 {offsets = [2, 0, 0], sizes = [1, 8, 32], strides = [1, 1, 1]} : vector<3x8x32xf32> to vector<1x8x32xf32>
    %264 = vector.shape_cast %263 : vector<1x8x32xf32> to vector<8x32xf32>
    %265 = vector.extract_strided_slice %241 {offsets = [0, 64], sizes = [8, 32], strides = [1, 1]} : vector<8x96xf32> to vector<8x32xf32>
    %266 = arith.mulf %253, %265 : vector<8x32xf32>
    %267 = arith.addf %264, %266 : vector<8x32xf32>
    %268 = math.tanh %267 : vector<8x32xf32>
    %cst_68 = arith.constant 1.000000e+00 : f32
    %269 = vector.broadcast %cst_68 : f32 to vector<8x32xf32>
    %270 = arith.subf %269, %262 : vector<8x32xf32>
    %271 = arith.mulf %270, %268 : vector<8x32xf32>
    %272 = arith.mulf %262, %226 : vector<8x32xf32>
    %273 = arith.addf %271, %272 : vector<8x32xf32>
    %274 = vector.extract_strided_slice %273 {offsets = [0, 0], sizes = [8, 16], strides = [1, 1]} : vector<8x32xf32> to vector<8x16xf32>
    %275 = arith.index_cast %c5_i32 : i32 to index
    %c0_69 = arith.constant 0 : index
    %c0_70 = arith.constant 0 : index
    %276 = vector.load %arg5[%275, %c0_69, %c0_70] : memref<8x8x16xf32, #tpu.memory_space<vmem>>, vector<1x8x16xf32>
    %277 = vector.shape_cast %276 : vector<1x8x16xf32> to vector<8x16xf32>
    %278 = vector.shape_cast %274 : vector<8x16xf32> to vector<1x8x16xf32>
    tpu.vector_store %arg5[%275, %c0_69, %c0_70], %278 {strides = array<i32>} : memref<8x8x16xf32, #tpu.memory_space<vmem>>, vector<1x8x16xf32>,
    %279 = vector.extract_strided_slice %273 {offsets = [0, 16], sizes = [8, 16], strides = [1, 1]} : vector<8x32xf32> to vector<8x16xf32>
    %c7_i32_71 = arith.constant 7 : i32
    %280 = arith.subi %c7_i32_71, %c5_i32 : i32
    %281 = arith.index_cast %280 : i32 to index
    %c0_72 = arith.constant 0 : index
    %c0_73 = arith.constant 0 : index
    %282 = vector.load %arg6[%281, %c0_72, %c0_73] : memref<8x8x16xf32, #tpu.memory_space<vmem>>, vector<1x8x16xf32>
    %283 = vector.shape_cast %282 : vector<1x8x16xf32> to vector<8x16xf32>
    %284 = vector.shape_cast %279 : vector<8x16xf32> to vector<1x8x16xf32>
    tpu.vector_store %arg6[%281, %c0_72, %c0_73], %284 {strides = array<i32>} : memref<8x8x16xf32, #tpu.memory_space<vmem>>, vector<1x8x16xf32>,
    %c6_i32 = arith.constant 6 : i32
    %285 = arith.truncf %273 : vector<8x32xf32> to vector<8x32xbf16>
    %cst_74 = arith.constant dense<0.000000e+00> : vector<8x96xf32>
    %286 = tpu.matmul %285, %0, %cst_74 {dimension_numbers = #tpu.dot_dimension_numbers<[1], [0], [0], [1], [0, 0, 1, 1], [], []>} : vector<8x32xbf16>, vector<32x96xbf16>, vector<8x96xf32> -> vector<8x96xf32>
    %287 = vector.broadcast %1 : vector<1x96xf32> to vector<8x96xf32>
    %288 = arith.addf %286, %287 : vector<8x96xf32>
    %289 = arith.index_cast %c6_i32 : i32 to index
    %c0_75 = arith.constant 0 : index
    %c0_76 = arith.constant 0 : index
    %c0_77 = arith.constant 0 : index
    %290 = vector.load %arg1[%289, %c0_75, %c0_76, %c0_77] : memref<8x3x8x32xf32, #tpu.memory_space<vmem>>, vector<1x3x8x32xf32>
    %291 = vector.shape_cast %290 : vector<1x3x8x32xf32> to vector<3x8x32xf32>
    %292 = vector.extract_strided_slice %291 {offsets = [0, 0, 0], sizes = [1, 8, 32], strides = [1, 1, 1]} : vector<3x8x32xf32> to vector<1x8x32xf32>
    %293 = vector.shape_cast %292 : vector<1x8x32xf32> to vector<8x32xf32>
    %294 = vector.extract_strided_slice %288 {offsets = [0, 0], sizes = [8, 32], strides = [1, 1]} : vector<8x96xf32> to vector<8x32xf32>
    %295 = arith.addf %293, %294 : vector<8x32xf32>
    %296 = arith.negf %295 : vector<8x32xf32>
    %297 = math.exp %296 : vector<8x32xf32>
    %cst_78 = arith.constant 1.000000e+00 : f32
    %298 = vector.broadcast %cst_78 : f32 to vector<8x32xf32>
    %299 = arith.addf %298, %297 : vector<8x32xf32>
    %300 = arith.divf %298, %299 : vector<8x32xf32>
    %301 = vector.extract_strided_slice %291 {offsets = [1, 0, 0], sizes = [1, 8, 32], strides = [1, 1, 1]} : vector<3x8x32xf32> to vector<1x8x32xf32>
    %302 = vector.shape_cast %301 : vector<1x8x32xf32> to vector<8x32xf32>
    %303 = vector.extract_strided_slice %288 {offsets = [0, 32], sizes = [8, 32], strides = [1, 1]} : vector<8x96xf32> to vector<8x32xf32>
    %304 = arith.addf %302, %303 : vector<8x32xf32>
    %305 = arith.negf %304 : vector<8x32xf32>
    %306 = math.exp %305 : vector<8x32xf32>
    %cst_79 = arith.constant 1.000000e+00 : f32
    %307 = vector.broadcast %cst_79 : f32 to vector<8x32xf32>
    %308 = arith.addf %307, %306 : vector<8x32xf32>
    %309 = arith.divf %307, %308 : vector<8x32xf32>
    %310 = vector.extract_strided_slice %291 {offsets = [2, 0, 0], sizes = [1, 8, 32], strides = [1, 1, 1]} : vector<3x8x32xf32> to vector<1x8x32xf32>
    %311 = vector.shape_cast %310 : vector<1x8x32xf32> to vector<8x32xf32>
    %312 = vector.extract_strided_slice %288 {offsets = [0, 64], sizes = [8, 32], strides = [1, 1]} : vector<8x96xf32> to vector<8x32xf32>
    %313 = arith.mulf %300, %312 : vector<8x32xf32>
    %314 = arith.addf %311, %313 : vector<8x32xf32>
    %315 = math.tanh %314 : vector<8x32xf32>
    %cst_80 = arith.constant 1.000000e+00 : f32
    %316 = vector.broadcast %cst_80 : f32 to vector<8x32xf32>
    %317 = arith.subf %316, %309 : vector<8x32xf32>
    %318 = arith.mulf %317, %315 : vector<8x32xf32>
    %319 = arith.mulf %309, %273 : vector<8x32xf32>
    %320 = arith.addf %318, %319 : vector<8x32xf32>
    %321 = vector.extract_strided_slice %320 {offsets = [0, 0], sizes = [8, 16], strides = [1, 1]} : vector<8x32xf32> to vector<8x16xf32>
    %322 = arith.index_cast %c6_i32 : i32 to index
    %c0_81 = arith.constant 0 : index
    %c0_82 = arith.constant 0 : index
    %323 = vector.load %arg5[%322, %c0_81, %c0_82] : memref<8x8x16xf32, #tpu.memory_space<vmem>>, vector<1x8x16xf32>
    %324 = vector.shape_cast %323 : vector<1x8x16xf32> to vector<8x16xf32>
    %325 = vector.shape_cast %321 : vector<8x16xf32> to vector<1x8x16xf32>
    tpu.vector_store %arg5[%322, %c0_81, %c0_82], %325 {strides = array<i32>} : memref<8x8x16xf32, #tpu.memory_space<vmem>>, vector<1x8x16xf32>,
    %326 = vector.extract_strided_slice %320 {offsets = [0, 16], sizes = [8, 16], strides = [1, 1]} : vector<8x32xf32> to vector<8x16xf32>
    %c7_i32_83 = arith.constant 7 : i32
    %327 = arith.subi %c7_i32_83, %c6_i32 : i32
    %328 = arith.index_cast %327 : i32 to index
    %c0_84 = arith.constant 0 : index
    %c0_85 = arith.constant 0 : index
    %329 = vector.load %arg6[%328, %c0_84, %c0_85] : memref<8x8x16xf32, #tpu.memory_space<vmem>>, vector<1x8x16xf32>
    %330 = vector.shape_cast %329 : vector<1x8x16xf32> to vector<8x16xf32>
    %331 = vector.shape_cast %326 : vector<8x16xf32> to vector<1x8x16xf32>
    tpu.vector_store %arg6[%328, %c0_84, %c0_85], %331 {strides = array<i32>} : memref<8x8x16xf32, #tpu.memory_space<vmem>>, vector<1x8x16xf32>,
    %c7_i32_86 = arith.constant 7 : i32
    %332 = arith.truncf %320 : vector<8x32xf32> to vector<8x32xbf16>
    %cst_87 = arith.constant dense<0.000000e+00> : vector<8x96xf32>
    %333 = tpu.matmul %332, %0, %cst_87 {dimension_numbers = #tpu.dot_dimension_numbers<[1], [0], [0], [1], [0, 0, 1, 1], [], []>} : vector<8x32xbf16>, vector<32x96xbf16>, vector<8x96xf32> -> vector<8x96xf32>
    %334 = vector.broadcast %1 : vector<1x96xf32> to vector<8x96xf32>
    %335 = arith.addf %333, %334 : vector<8x96xf32>
    %336 = arith.index_cast %c7_i32_86 : i32 to index
    %c0_88 = arith.constant 0 : index
    %c0_89 = arith.constant 0 : index
    %c0_90 = arith.constant 0 : index
    %337 = vector.load %arg1[%336, %c0_88, %c0_89, %c0_90] : memref<8x3x8x32xf32, #tpu.memory_space<vmem>>, vector<1x3x8x32xf32>
    %338 = vector.shape_cast %337 : vector<1x3x8x32xf32> to vector<3x8x32xf32>
    %339 = vector.extract_strided_slice %338 {offsets = [0, 0, 0], sizes = [1, 8, 32], strides = [1, 1, 1]} : vector<3x8x32xf32> to vector<1x8x32xf32>
    %340 = vector.shape_cast %339 : vector<1x8x32xf32> to vector<8x32xf32>
    %341 = vector.extract_strided_slice %335 {offsets = [0, 0], sizes = [8, 32], strides = [1, 1]} : vector<8x96xf32> to vector<8x32xf32>
    %342 = arith.addf %340, %341 : vector<8x32xf32>
    %343 = arith.negf %342 : vector<8x32xf32>
    %344 = math.exp %343 : vector<8x32xf32>
    %cst_91 = arith.constant 1.000000e+00 : f32
    %345 = vector.broadcast %cst_91 : f32 to vector<8x32xf32>
    %346 = arith.addf %345, %344 : vector<8x32xf32>
    %347 = arith.divf %345, %346 : vector<8x32xf32>
    %348 = vector.extract_strided_slice %338 {offsets = [1, 0, 0], sizes = [1, 8, 32], strides = [1, 1, 1]} : vector<3x8x32xf32> to vector<1x8x32xf32>
    %349 = vector.shape_cast %348 : vector<1x8x32xf32> to vector<8x32xf32>
    %350 = vector.extract_strided_slice %335 {offsets = [0, 32], sizes = [8, 32], strides = [1, 1]} : vector<8x96xf32> to vector<8x32xf32>
    %351 = arith.addf %349, %350 : vector<8x32xf32>
    %352 = arith.negf %351 : vector<8x32xf32>
    %353 = math.exp %352 : vector<8x32xf32>
    %cst_92 = arith.constant 1.000000e+00 : f32
    %354 = vector.broadcast %cst_92 : f32 to vector<8x32xf32>
    %355 = arith.addf %354, %353 : vector<8x32xf32>
    %356 = arith.divf %354, %355 : vector<8x32xf32>
    %357 = vector.extract_strided_slice %338 {offsets = [2, 0, 0], sizes = [1, 8, 32], strides = [1, 1, 1]} : vector<3x8x32xf32> to vector<1x8x32xf32>
    %358 = vector.shape_cast %357 : vector<1x8x32xf32> to vector<8x32xf32>
    %359 = vector.extract_strided_slice %335 {offsets = [0, 64], sizes = [8, 32], strides = [1, 1]} : vector<8x96xf32> to vector<8x32xf32>
    %360 = arith.mulf %347, %359 : vector<8x32xf32>
    %361 = arith.addf %358, %360 : vector<8x32xf32>
    %362 = math.tanh %361 : vector<8x32xf32>
    %cst_93 = arith.constant 1.000000e+00 : f32
    %363 = vector.broadcast %cst_93 : f32 to vector<8x32xf32>
    %364 = arith.subf %363, %356 : vector<8x32xf32>
    %365 = arith.mulf %364, %362 : vector<8x32xf32>
    %366 = arith.mulf %356, %320 : vector<8x32xf32>
    %367 = arith.addf %365, %366 : vector<8x32xf32>
    %368 = vector.extract_strided_slice %367 {offsets = [0, 0], sizes = [8, 16], strides = [1, 1]} : vector<8x32xf32> to vector<8x16xf32>
    %369 = arith.index_cast %c7_i32_86 : i32 to index
    %c0_94 = arith.constant 0 : index
    %c0_95 = arith.constant 0 : index
    %370 = vector.load %arg5[%369, %c0_94, %c0_95] : memref<8x8x16xf32, #tpu.memory_space<vmem>>, vector<1x8x16xf32>
    %371 = vector.shape_cast %370 : vector<1x8x16xf32> to vector<8x16xf32>
    %372 = vector.shape_cast %368 : vector<8x16xf32> to vector<1x8x16xf32>
    tpu.vector_store %arg5[%369, %c0_94, %c0_95], %372 {strides = array<i32>} : memref<8x8x16xf32, #tpu.memory_space<vmem>>, vector<1x8x16xf32>,
    %373 = vector.extract_strided_slice %367 {offsets = [0, 16], sizes = [8, 16], strides = [1, 1]} : vector<8x32xf32> to vector<8x16xf32>
    %c7_i32_96 = arith.constant 7 : i32
    %374 = arith.subi %c7_i32_96, %c7_i32_86 : i32
    %375 = arith.index_cast %374 : i32 to index
    %c0_97 = arith.constant 0 : index
    %c0_98 = arith.constant 0 : index
    %376 = vector.load %arg6[%375, %c0_97, %c0_98] : memref<8x8x16xf32, #tpu.memory_space<vmem>>, vector<1x8x16xf32>
    %377 = vector.shape_cast %376 : vector<1x8x16xf32> to vector<8x16xf32>
    %378 = vector.shape_cast %373 : vector<8x16xf32> to vector<1x8x16xf32>
    tpu.vector_store %arg6[%375, %c0_97, %c0_98], %378 {strides = array<i32>} : memref<8x8x16xf32, #tpu.memory_space<vmem>>, vector<1x8x16xf32>,
    %c8_i32 = arith.constant 8 : i32
    %c0_99 = arith.constant 0 : index
    %c0_100 = arith.constant 0 : index
    %c0_101 = arith.constant 0 : index
    %379 = vector.load %arg5[%c0_99, %c0_100, %c0_101] : memref<8x8x16xf32, #tpu.memory_space<vmem>>, vector<8x8x16xf32>
    %c0_102 = arith.constant 0 : index
    %c0_103 = arith.constant 0 : index
    %c0_104 = arith.constant 0 : index
    %380 = vector.load %arg4[%c0_102, %c0_103, %c0_104] : memref<8x8x32xf32, #tpu.memory_space<vmem>>, vector<8x8x16xf32>
    tpu.vector_store %arg4[%c0_102, %c0_103, %c0_104], %379 {strides = array<i32>} : memref<8x8x32xf32, #tpu.memory_space<vmem>>, vector<8x8x16xf32>,
    %c0_105 = arith.constant 0 : index
    %c0_106 = arith.constant 0 : index
    %c0_107 = arith.constant 0 : index
    %381 = vector.load %arg6[%c0_105, %c0_106, %c0_107] : memref<8x8x16xf32, #tpu.memory_space<vmem>>, vector<8x8x16xf32>
    %c0_108 = arith.constant 0 : index
    %c0_109 = arith.constant 0 : index
    %c16 = arith.constant 16 : index
    %382 = vector.load %arg4[%c0_108, %c0_109, %c16] : memref<8x8x32xf32, #tpu.memory_space<vmem>>, vector<8x8x16xf32>
    tpu.vector_store %arg4[%c0_108, %c0_109, %c16], %381 {strides = array<i32>} : memref<8x8x32xf32, #tpu.memory_space<vmem>>, vector<8x8x16xf32>,
    return
  }
  func.func @transform_0(%arg0: i32) -> (i32, i32, i32, i32) {
    %c0_i32 = arith.constant 0 : i32
    %c0_i32_0 = arith.constant 0 : i32
    %c0_i32_1 = arith.constant 0 : i32
    %c0_i32_2 = arith.constant 0 : i32
    return %c0_i32, %c0_i32_0, %arg0, %c0_i32_1 : i32, i32, i32, i32
  }
  func.func @transform_1(%arg0: i32) -> (i32, i32) {
    %c0_i32 = arith.constant 0 : i32
    %c0_i32_0 = arith.constant 0 : i32
    %c0_i32_1 = arith.constant 0 : i32
    return %c0_i32, %c0_i32_0 : i32, i32
  }
  func.func @transform_2(%arg0: i32) -> (i32, i32) {
    %c0_i32 = arith.constant 0 : i32
    %c0_i32_0 = arith.constant 0 : i32
    %c0_i32_1 = arith.constant 0 : i32
    return %c0_i32, %c0_i32_0 : i32, i32
  }
  func.func @transform_3(%arg0: i32) -> (i32, i32, i32) {
    %c0_i32 = arith.constant 0 : i32
    %c0_i32_0 = arith.constant 0 : i32
    %c0_i32_1 = arith.constant 0 : i32
    return %c0_i32, %arg0, %c0_i32_0 : i32, i32, i32
  }
}

module attributes {stable_mosaic.version = 11 : i64} {
  func.func @_attn_pool_kernel(%arg0: i32, %arg1: memref<8x8x32xf32, #tpu.memory_space<vmem>>, %arg2: memref<32x32xbf16, #tpu.memory_space<vmem>>, %arg3: memref<1x32xf32, #tpu.memory_space<vmem>>, %arg4: memref<1x32xf32, #tpu.memory_space<vmem>>, %arg5: memref<8x32xf32, #tpu.memory_space<vmem>>) attributes {dimension_semantics = [#tpu.dimension_semantics<parallel>], iteration_bounds = array<i64: 1>, scalar_prefetch = 0 : i64, scratch_operands = 0 : i64, tpu.core_type = #tpu.core_type<tc>, window_params = [{transform_indices = @transform_0, window_bounds = array<i64: 8, 8, 32>}, {pipeline_mode = #tpu.pipeline_mode<synchronous>, transform_indices = @transform_1, window_bounds = array<i64: 32, 32>}, {pipeline_mode = #tpu.pipeline_mode<synchronous>, transform_indices = @transform_2, window_bounds = array<i64: 1, 32>}, {pipeline_mode = #tpu.pipeline_mode<synchronous>, transform_indices = @transform_3, window_bounds = array<i64: 1, 32>}, {transform_indices = @transform_4, window_bounds = array<i64: 8, 32>}]} {
    %c0 = arith.constant 0 : index
    %c0_0 = arith.constant 0 : index
    %c0_1 = arith.constant 0 : index
    %0 = vector.load %arg1[%c0, %c0_0, %c0_1] : memref<8x8x32xf32, #tpu.memory_space<vmem>>, vector<8x8x32xf32>
    %1 = vector.shape_cast %0 : vector<8x8x32xf32> to vector<64x32xf32>
    %2 = arith.truncf %1 : vector<64x32xf32> to vector<64x32xbf16>
    %c0_2 = arith.constant 0 : index
    %c0_3 = arith.constant 0 : index
    %3 = vector.load %arg2[%c0_2, %c0_3] : memref<32x32xbf16, #tpu.memory_space<vmem>>, vector<32x32xbf16>
    %cst = arith.constant dense<0.000000e+00> : vector<64x32xf32>
    %4 = tpu.matmul %2, %3, %cst {dimension_numbers = #tpu.dot_dimension_numbers<[1], [0], [0], [1], [0, 0, 1, 1], [], []>} : vector<64x32xbf16>, vector<32x32xbf16>, vector<64x32xf32> -> vector<64x32xf32>
    %c0_4 = arith.constant 0 : index
    %c0_5 = arith.constant 0 : index
    %5 = vector.load %arg3[%c0_4, %c0_5] : memref<1x32xf32, #tpu.memory_space<vmem>>, vector<1x32xf32>
    %6 = vector.broadcast %5 : vector<1x32xf32> to vector<64x32xf32>
    %7 = arith.addf %4, %6 : vector<64x32xf32>
    %8 = math.tanh %7 : vector<64x32xf32>
    %c0_6 = arith.constant 0 : index
    %c0_7 = arith.constant 0 : index
    %9 = vector.load %arg4[%c0_6, %c0_7] : memref<1x32xf32, #tpu.memory_space<vmem>>, vector<1x32xf32>
    %10 = vector.broadcast %9 : vector<1x32xf32> to vector<64x32xf32>
    %11 = arith.mulf %8, %10 : vector<64x32xf32>
    %cst_8 = arith.constant dense<0.000000e+00> : vector<64xf32>
    %12 = vector.multi_reduction <add>, %11, %cst_8 [1] : vector<64x32xf32> to vector<64xf32>
    %13 = vector.shape_cast %12 : vector<64xf32> to vector<64x1xf32>
    %14 = vector.shape_cast %13 : vector<64x1xf32> to vector<8x8x1xf32>
    %cst_9 = arith.constant dense<0xFF800000> : vector<8x1xf32>
    %15 = vector.multi_reduction <maximumf>, %14, %cst_9 [0] : vector<8x8x1xf32> to vector<8x1xf32>
    %16 = vector.shape_cast %15 : vector<8x1xf32> to vector<1x8x1xf32>
    %17 = vector.broadcast %16 : vector<1x8x1xf32> to vector<8x8x1xf32>
    %18 = arith.subf %14, %17 : vector<8x8x1xf32>
    %19 = math.exp %18 : vector<8x8x1xf32>
    %cst_10 = arith.constant dense<0.000000e+00> : vector<8x1xf32>
    %20 = vector.multi_reduction <add>, %19, %cst_10 [0] : vector<8x8x1xf32> to vector<8x1xf32>
    %21 = vector.broadcast %19 : vector<8x8x1xf32> to vector<8x8x32xf32>
    %22 = arith.mulf %21, %0 : vector<8x8x32xf32>
    %cst_11 = arith.constant dense<0.000000e+00> : vector<8x32xf32>
    %23 = vector.multi_reduction <add>, %22, %cst_11 [0] : vector<8x8x32xf32> to vector<8x32xf32>
    %24 = tpu.reciprocal %20 {approx = true} : vector<8x1xf32> -> vector<8x1xf32>
    %25 = vector.broadcast %24 : vector<8x1xf32> to vector<8x32xf32>
    %26 = arith.mulf %23, %25 : vector<8x32xf32>
    %c0_12 = arith.constant 0 : index
    %c0_13 = arith.constant 0 : index
    %27 = vector.load %arg5[%c0_12, %c0_13] : memref<8x32xf32, #tpu.memory_space<vmem>>, vector<8x32xf32>
    tpu.vector_store %arg5[%c0_12, %c0_13], %26 {strides = array<i32>} : memref<8x32xf32, #tpu.memory_space<vmem>>, vector<8x32xf32>,
    return
  }
  func.func @transform_0(%arg0: i32) -> (i32, i32, i32) {
    %c0_i32 = arith.constant 0 : i32
    %c0_i32_0 = arith.constant 0 : i32
    %c0_i32_1 = arith.constant 0 : i32
    return %c0_i32, %arg0, %c0_i32_0 : i32, i32, i32
  }
  func.func @transform_1(%arg0: i32) -> (i32, i32) {
    %c0_i32 = arith.constant 0 : i32
    %c0_i32_0 = arith.constant 0 : i32
    %c0_i32_1 = arith.constant 0 : i32
    return %c0_i32, %c0_i32_0 : i32, i32
  }
  func.func @transform_2(%arg0: i32) -> (i32, i32) {
    %c0_i32 = arith.constant 0 : i32
    %c0_i32_0 = arith.constant 0 : i32
    %c0_i32_1 = arith.constant 0 : i32
    return %c0_i32, %c0_i32_0 : i32, i32
  }
  func.func @transform_3(%arg0: i32) -> (i32, i32) {
    %c0_i32 = arith.constant 0 : i32
    %c0_i32_0 = arith.constant 0 : i32
    %c0_i32_1 = arith.constant 0 : i32
    return %c0_i32, %c0_i32_0 : i32, i32
  }
  func.func @transform_4(%arg0: i32) -> (i32, i32) {
    %c0_i32 = arith.constant 0 : i32
    %c0_i32_0 = arith.constant 0 : i32
    return %arg0, %c0_i32 : i32, i32
  }
}

module attributes {stable_mosaic.version = 11 : i64} {
  func.func @_linear_kernel(%arg0: i32, %arg1: memref<8x32xf32, #tpu.memory_space<vmem>>, %arg2: memref<32x96xbf16, #tpu.memory_space<vmem>>, %arg3: memref<1x96xf32, #tpu.memory_space<vmem>>, %arg4: memref<8x96xf32, #tpu.memory_space<vmem>>) attributes {dimension_semantics = [#tpu.dimension_semantics<parallel>], iteration_bounds = array<i64: 1>, scalar_prefetch = 0 : i64, scratch_operands = 0 : i64, tpu.core_type = #tpu.core_type<tc>, window_params = [{transform_indices = @transform_0, window_bounds = array<i64: 8, 32>}, {pipeline_mode = #tpu.pipeline_mode<synchronous>, transform_indices = @transform_1, window_bounds = array<i64: 32, 96>}, {pipeline_mode = #tpu.pipeline_mode<synchronous>, transform_indices = @transform_2, window_bounds = array<i64: 1, 96>}, {transform_indices = @transform_3, window_bounds = array<i64: 8, 96>}]} {
    %c0 = arith.constant 0 : index
    %c0_0 = arith.constant 0 : index
    %0 = vector.load %arg1[%c0, %c0_0] : memref<8x32xf32, #tpu.memory_space<vmem>>, vector<8x32xf32>
    %1 = arith.truncf %0 : vector<8x32xf32> to vector<8x32xbf16>
    %c0_1 = arith.constant 0 : index
    %c0_2 = arith.constant 0 : index
    %2 = vector.load %arg2[%c0_1, %c0_2] : memref<32x96xbf16, #tpu.memory_space<vmem>>, vector<32x96xbf16>
    %cst = arith.constant dense<0.000000e+00> : vector<8x96xf32>
    %3 = tpu.matmul %1, %2, %cst {dimension_numbers = #tpu.dot_dimension_numbers<[1], [0], [0], [1], [0, 0, 1, 1], [], []>} : vector<8x32xbf16>, vector<32x96xbf16>, vector<8x96xf32> -> vector<8x96xf32>
    %c0_3 = arith.constant 0 : index
    %c0_4 = arith.constant 0 : index
    %4 = vector.load %arg3[%c0_3, %c0_4] : memref<1x96xf32, #tpu.memory_space<vmem>>, vector<1x96xf32>
    %5 = vector.broadcast %4 : vector<1x96xf32> to vector<8x96xf32>
    %6 = arith.addf %3, %5 : vector<8x96xf32>
    %c0_5 = arith.constant 0 : index
    %c0_6 = arith.constant 0 : index
    %7 = vector.load %arg4[%c0_5, %c0_6] : memref<8x96xf32, #tpu.memory_space<vmem>>, vector<8x96xf32>
    tpu.vector_store %arg4[%c0_5, %c0_6], %6 {strides = array<i32>} : memref<8x96xf32, #tpu.memory_space<vmem>>, vector<8x96xf32>,
    return
  }
  func.func @transform_0(%arg0: i32) -> (i32, i32) {
    %c0_i32 = arith.constant 0 : i32
    %c0_i32_0 = arith.constant 0 : i32
    return %arg0, %c0_i32 : i32, i32
  }
  func.func @transform_1(%arg0: i32) -> (i32, i32) {
    %c0_i32 = arith.constant 0 : i32
    %c0_i32_0 = arith.constant 0 : i32
    %c0_i32_1 = arith.constant 0 : i32
    return %c0_i32, %c0_i32_0 : i32, i32
  }
  func.func @transform_2(%arg0: i32) -> (i32, i32) {
    %c0_i32 = arith.constant 0 : i32
    %c0_i32_0 = arith.constant 0 : i32
    %c0_i32_1 = arith.constant 0 : i32
    return %c0_i32, %c0_i32_0 : i32, i32
  }
  func.func @transform_3(%arg0: i32) -> (i32, i32) {
    %c0_i32 = arith.constant 0 : i32
    %c0_i32_0 = arith.constant 0 : i32
    return %arg0, %c0_i32 : i32, i32
  }
}

module attributes {stable_mosaic.version = 11 : i64} {
  func.func @_bigru_kernel(%arg0: i32, %arg1: memref<4x3x2x32xf32, #tpu.memory_space<vmem>>, %arg2: memref<32x96xbf16, #tpu.memory_space<vmem>>, %arg3: memref<1x96xf32, #tpu.memory_space<vmem>>, %arg4: memref<4x2x32xf32, #tpu.memory_space<vmem>>, %arg5: memref<4x2x16xf32, #tpu.memory_space<vmem>>, %arg6: memref<4x2x16xf32, #tpu.memory_space<vmem>>) attributes {dimension_semantics = [#tpu.dimension_semantics<parallel>], iteration_bounds = array<i64: 1>, scalar_prefetch = 0 : i64, scratch_operands = 2 : i64, tpu.core_type = #tpu.core_type<tc>, window_params = [{transform_indices = @transform_0, window_bounds = array<i64: 4, 3, 2, 32>}, {pipeline_mode = #tpu.pipeline_mode<synchronous>, transform_indices = @transform_1, window_bounds = array<i64: 32, 96>}, {pipeline_mode = #tpu.pipeline_mode<synchronous>, transform_indices = @transform_2, window_bounds = array<i64: 1, 96>}, {transform_indices = @transform_3, window_bounds = array<i64: 4, 2, 32>}]} {
    %c0 = arith.constant 0 : index
    %c0_0 = arith.constant 0 : index
    %0 = vector.load %arg2[%c0, %c0_0] : memref<32x96xbf16, #tpu.memory_space<vmem>>, vector<32x96xbf16>
    %c0_1 = arith.constant 0 : index
    %c0_2 = arith.constant 0 : index
    %1 = vector.load %arg3[%c0_1, %c0_2] : memref<1x96xf32, #tpu.memory_space<vmem>>, vector<1x96xf32>
    %cst = arith.constant 0.000000e+00 : f32
    %2 = vector.broadcast %cst : f32 to vector<2x32xf32>
    %c0_i32 = arith.constant 0 : i32
    %3 = arith.truncf %2 : vector<2x32xf32> to vector<2x32xbf16>
    %cst_3 = arith.constant dense<0.000000e+00> : vector<2x96xf32>
    %4 = tpu.matmul %3, %0, %cst_3 {dimension_numbers = #tpu.dot_dimension_numbers<[1], [0], [0], [1], [0, 0, 1, 1], [], []>} : vector<2x32xbf16>, vector<32x96xbf16>, vector<2x96xf32> -> vector<2x96xf32>
    %5 = vector.broadcast %1 : vector<1x96xf32> to vector<2x96xf32>
    %6 = arith.addf %4, %5 : vector<2x96xf32>
    %7 = arith.index_cast %c0_i32 : i32 to index
    %c0_4 = arith.constant 0 : index
    %c0_5 = arith.constant 0 : index
    %c0_6 = arith.constant 0 : index
    %8 = vector.load %arg1[%7, %c0_4, %c0_5, %c0_6] : memref<4x3x2x32xf32, #tpu.memory_space<vmem>>, vector<1x3x2x32xf32>
    %9 = vector.shape_cast %8 : vector<1x3x2x32xf32> to vector<3x2x32xf32>
    %10 = vector.extract_strided_slice %9 {offsets = [0, 0, 0], sizes = [1, 2, 32], strides = [1, 1, 1]} : vector<3x2x32xf32> to vector<1x2x32xf32>
    %11 = vector.shape_cast %10 : vector<1x2x32xf32> to vector<2x32xf32>
    %12 = vector.extract_strided_slice %6 {offsets = [0, 0], sizes = [2, 32], strides = [1, 1]} : vector<2x96xf32> to vector<2x32xf32>
    %13 = arith.addf %11, %12 : vector<2x32xf32>
    %14 = arith.negf %13 : vector<2x32xf32>
    %15 = math.exp %14 : vector<2x32xf32>
    %cst_7 = arith.constant 1.000000e+00 : f32
    %16 = vector.broadcast %cst_7 : f32 to vector<2x32xf32>
    %17 = arith.addf %16, %15 : vector<2x32xf32>
    %18 = arith.divf %16, %17 : vector<2x32xf32>
    %19 = vector.extract_strided_slice %9 {offsets = [1, 0, 0], sizes = [1, 2, 32], strides = [1, 1, 1]} : vector<3x2x32xf32> to vector<1x2x32xf32>
    %20 = vector.shape_cast %19 : vector<1x2x32xf32> to vector<2x32xf32>
    %21 = vector.extract_strided_slice %6 {offsets = [0, 32], sizes = [2, 32], strides = [1, 1]} : vector<2x96xf32> to vector<2x32xf32>
    %22 = arith.addf %20, %21 : vector<2x32xf32>
    %23 = arith.negf %22 : vector<2x32xf32>
    %24 = math.exp %23 : vector<2x32xf32>
    %cst_8 = arith.constant 1.000000e+00 : f32
    %25 = vector.broadcast %cst_8 : f32 to vector<2x32xf32>
    %26 = arith.addf %25, %24 : vector<2x32xf32>
    %27 = arith.divf %25, %26 : vector<2x32xf32>
    %28 = vector.extract_strided_slice %9 {offsets = [2, 0, 0], sizes = [1, 2, 32], strides = [1, 1, 1]} : vector<3x2x32xf32> to vector<1x2x32xf32>
    %29 = vector.shape_cast %28 : vector<1x2x32xf32> to vector<2x32xf32>
    %30 = vector.extract_strided_slice %6 {offsets = [0, 64], sizes = [2, 32], strides = [1, 1]} : vector<2x96xf32> to vector<2x32xf32>
    %31 = arith.mulf %18, %30 : vector<2x32xf32>
    %32 = arith.addf %29, %31 : vector<2x32xf32>
    %33 = math.tanh %32 : vector<2x32xf32>
    %cst_9 = arith.constant 1.000000e+00 : f32
    %34 = vector.broadcast %cst_9 : f32 to vector<2x32xf32>
    %35 = arith.subf %34, %27 : vector<2x32xf32>
    %36 = arith.mulf %35, %33 : vector<2x32xf32>
    %37 = arith.mulf %27, %2 : vector<2x32xf32>
    %38 = arith.addf %36, %37 : vector<2x32xf32>
    %39 = vector.extract_strided_slice %38 {offsets = [0, 0], sizes = [2, 16], strides = [1, 1]} : vector<2x32xf32> to vector<2x16xf32>
    %40 = arith.index_cast %c0_i32 : i32 to index
    %c0_10 = arith.constant 0 : index
    %c0_11 = arith.constant 0 : index
    %41 = vector.load %arg5[%40, %c0_10, %c0_11] : memref<4x2x16xf32, #tpu.memory_space<vmem>>, vector<1x2x16xf32>
    %42 = vector.shape_cast %41 : vector<1x2x16xf32> to vector<2x16xf32>
    %43 = vector.shape_cast %39 : vector<2x16xf32> to vector<1x2x16xf32>
    tpu.vector_store %arg5[%40, %c0_10, %c0_11], %43 {strides = array<i32>} : memref<4x2x16xf32, #tpu.memory_space<vmem>>, vector<1x2x16xf32>,
    %44 = vector.extract_strided_slice %38 {offsets = [0, 16], sizes = [2, 16], strides = [1, 1]} : vector<2x32xf32> to vector<2x16xf32>
    %c3_i32 = arith.constant 3 : i32
    %45 = arith.subi %c3_i32, %c0_i32 : i32
    %46 = arith.index_cast %45 : i32 to index
    %c0_12 = arith.constant 0 : index
    %c0_13 = arith.constant 0 : index
    %47 = vector.load %arg6[%46, %c0_12, %c0_13] : memref<4x2x16xf32, #tpu.memory_space<vmem>>, vector<1x2x16xf32>
    %48 = vector.shape_cast %47 : vector<1x2x16xf32> to vector<2x16xf32>
    %49 = vector.shape_cast %44 : vector<2x16xf32> to vector<1x2x16xf32>
    tpu.vector_store %arg6[%46, %c0_12, %c0_13], %49 {strides = array<i32>} : memref<4x2x16xf32, #tpu.memory_space<vmem>>, vector<1x2x16xf32>,
    %c1_i32 = arith.constant 1 : i32
    %50 = arith.truncf %38 : vector<2x32xf32> to vector<2x32xbf16>
    %cst_14 = arith.constant dense<0.000000e+00> : vector<2x96xf32>
    %51 = tpu.matmul %50, %0, %cst_14 {dimension_numbers = #tpu.dot_dimension_numbers<[1], [0], [0], [1], [0, 0, 1, 1], [], []>} : vector<2x32xbf16>, vector<32x96xbf16>, vector<2x96xf32> -> vector<2x96xf32>
    %52 = vector.broadcast %1 : vector<1x96xf32> to vector<2x96xf32>
    %53 = arith.addf %51, %52 : vector<2x96xf32>
    %54 = arith.index_cast %c1_i32 : i32 to index
    %c0_15 = arith.constant 0 : index
    %c0_16 = arith.constant 0 : index
    %c0_17 = arith.constant 0 : index
    %55 = vector.load %arg1[%54, %c0_15, %c0_16, %c0_17] : memref<4x3x2x32xf32, #tpu.memory_space<vmem>>, vector<1x3x2x32xf32>
    %56 = vector.shape_cast %55 : vector<1x3x2x32xf32> to vector<3x2x32xf32>
    %57 = vector.extract_strided_slice %56 {offsets = [0, 0, 0], sizes = [1, 2, 32], strides = [1, 1, 1]} : vector<3x2x32xf32> to vector<1x2x32xf32>
    %58 = vector.shape_cast %57 : vector<1x2x32xf32> to vector<2x32xf32>
    %59 = vector.extract_strided_slice %53 {offsets = [0, 0], sizes = [2, 32], strides = [1, 1]} : vector<2x96xf32> to vector<2x32xf32>
    %60 = arith.addf %58, %59 : vector<2x32xf32>
    %61 = arith.negf %60 : vector<2x32xf32>
    %62 = math.exp %61 : vector<2x32xf32>
    %cst_18 = arith.constant 1.000000e+00 : f32
    %63 = vector.broadcast %cst_18 : f32 to vector<2x32xf32>
    %64 = arith.addf %63, %62 : vector<2x32xf32>
    %65 = arith.divf %63, %64 : vector<2x32xf32>
    %66 = vector.extract_strided_slice %56 {offsets = [1, 0, 0], sizes = [1, 2, 32], strides = [1, 1, 1]} : vector<3x2x32xf32> to vector<1x2x32xf32>
    %67 = vector.shape_cast %66 : vector<1x2x32xf32> to vector<2x32xf32>
    %68 = vector.extract_strided_slice %53 {offsets = [0, 32], sizes = [2, 32], strides = [1, 1]} : vector<2x96xf32> to vector<2x32xf32>
    %69 = arith.addf %67, %68 : vector<2x32xf32>
    %70 = arith.negf %69 : vector<2x32xf32>
    %71 = math.exp %70 : vector<2x32xf32>
    %cst_19 = arith.constant 1.000000e+00 : f32
    %72 = vector.broadcast %cst_19 : f32 to vector<2x32xf32>
    %73 = arith.addf %72, %71 : vector<2x32xf32>
    %74 = arith.divf %72, %73 : vector<2x32xf32>
    %75 = vector.extract_strided_slice %56 {offsets = [2, 0, 0], sizes = [1, 2, 32], strides = [1, 1, 1]} : vector<3x2x32xf32> to vector<1x2x32xf32>
    %76 = vector.shape_cast %75 : vector<1x2x32xf32> to vector<2x32xf32>
    %77 = vector.extract_strided_slice %53 {offsets = [0, 64], sizes = [2, 32], strides = [1, 1]} : vector<2x96xf32> to vector<2x32xf32>
    %78 = arith.mulf %65, %77 : vector<2x32xf32>
    %79 = arith.addf %76, %78 : vector<2x32xf32>
    %80 = math.tanh %79 : vector<2x32xf32>
    %cst_20 = arith.constant 1.000000e+00 : f32
    %81 = vector.broadcast %cst_20 : f32 to vector<2x32xf32>
    %82 = arith.subf %81, %74 : vector<2x32xf32>
    %83 = arith.mulf %82, %80 : vector<2x32xf32>
    %84 = arith.mulf %74, %38 : vector<2x32xf32>
    %85 = arith.addf %83, %84 : vector<2x32xf32>
    %86 = vector.extract_strided_slice %85 {offsets = [0, 0], sizes = [2, 16], strides = [1, 1]} : vector<2x32xf32> to vector<2x16xf32>
    %87 = arith.index_cast %c1_i32 : i32 to index
    %c0_21 = arith.constant 0 : index
    %c0_22 = arith.constant 0 : index
    %88 = vector.load %arg5[%87, %c0_21, %c0_22] : memref<4x2x16xf32, #tpu.memory_space<vmem>>, vector<1x2x16xf32>
    %89 = vector.shape_cast %88 : vector<1x2x16xf32> to vector<2x16xf32>
    %90 = vector.shape_cast %86 : vector<2x16xf32> to vector<1x2x16xf32>
    tpu.vector_store %arg5[%87, %c0_21, %c0_22], %90 {strides = array<i32>} : memref<4x2x16xf32, #tpu.memory_space<vmem>>, vector<1x2x16xf32>,
    %91 = vector.extract_strided_slice %85 {offsets = [0, 16], sizes = [2, 16], strides = [1, 1]} : vector<2x32xf32> to vector<2x16xf32>
    %c3_i32_23 = arith.constant 3 : i32
    %92 = arith.subi %c3_i32_23, %c1_i32 : i32
    %93 = arith.index_cast %92 : i32 to index
    %c0_24 = arith.constant 0 : index
    %c0_25 = arith.constant 0 : index
    %94 = vector.load %arg6[%93, %c0_24, %c0_25] : memref<4x2x16xf32, #tpu.memory_space<vmem>>, vector<1x2x16xf32>
    %95 = vector.shape_cast %94 : vector<1x2x16xf32> to vector<2x16xf32>
    %96 = vector.shape_cast %91 : vector<2x16xf32> to vector<1x2x16xf32>
    tpu.vector_store %arg6[%93, %c0_24, %c0_25], %96 {strides = array<i32>} : memref<4x2x16xf32, #tpu.memory_space<vmem>>, vector<1x2x16xf32>,
    %c2_i32 = arith.constant 2 : i32
    %97 = arith.truncf %85 : vector<2x32xf32> to vector<2x32xbf16>
    %cst_26 = arith.constant dense<0.000000e+00> : vector<2x96xf32>
    %98 = tpu.matmul %97, %0, %cst_26 {dimension_numbers = #tpu.dot_dimension_numbers<[1], [0], [0], [1], [0, 0, 1, 1], [], []>} : vector<2x32xbf16>, vector<32x96xbf16>, vector<2x96xf32> -> vector<2x96xf32>
    %99 = vector.broadcast %1 : vector<1x96xf32> to vector<2x96xf32>
    %100 = arith.addf %98, %99 : vector<2x96xf32>
    %101 = arith.index_cast %c2_i32 : i32 to index
    %c0_27 = arith.constant 0 : index
    %c0_28 = arith.constant 0 : index
    %c0_29 = arith.constant 0 : index
    %102 = vector.load %arg1[%101, %c0_27, %c0_28, %c0_29] : memref<4x3x2x32xf32, #tpu.memory_space<vmem>>, vector<1x3x2x32xf32>
    %103 = vector.shape_cast %102 : vector<1x3x2x32xf32> to vector<3x2x32xf32>
    %104 = vector.extract_strided_slice %103 {offsets = [0, 0, 0], sizes = [1, 2, 32], strides = [1, 1, 1]} : vector<3x2x32xf32> to vector<1x2x32xf32>
    %105 = vector.shape_cast %104 : vector<1x2x32xf32> to vector<2x32xf32>
    %106 = vector.extract_strided_slice %100 {offsets = [0, 0], sizes = [2, 32], strides = [1, 1]} : vector<2x96xf32> to vector<2x32xf32>
    %107 = arith.addf %105, %106 : vector<2x32xf32>
    %108 = arith.negf %107 : vector<2x32xf32>
    %109 = math.exp %108 : vector<2x32xf32>
    %cst_30 = arith.constant 1.000000e+00 : f32
    %110 = vector.broadcast %cst_30 : f32 to vector<2x32xf32>
    %111 = arith.addf %110, %109 : vector<2x32xf32>
    %112 = arith.divf %110, %111 : vector<2x32xf32>
    %113 = vector.extract_strided_slice %103 {offsets = [1, 0, 0], sizes = [1, 2, 32], strides = [1, 1, 1]} : vector<3x2x32xf32> to vector<1x2x32xf32>
    %114 = vector.shape_cast %113 : vector<1x2x32xf32> to vector<2x32xf32>
    %115 = vector.extract_strided_slice %100 {offsets = [0, 32], sizes = [2, 32], strides = [1, 1]} : vector<2x96xf32> to vector<2x32xf32>
    %116 = arith.addf %114, %115 : vector<2x32xf32>
    %117 = arith.negf %116 : vector<2x32xf32>
    %118 = math.exp %117 : vector<2x32xf32>
    %cst_31 = arith.constant 1.000000e+00 : f32
    %119 = vector.broadcast %cst_31 : f32 to vector<2x32xf32>
    %120 = arith.addf %119, %118 : vector<2x32xf32>
    %121 = arith.divf %119, %120 : vector<2x32xf32>
    %122 = vector.extract_strided_slice %103 {offsets = [2, 0, 0], sizes = [1, 2, 32], strides = [1, 1, 1]} : vector<3x2x32xf32> to vector<1x2x32xf32>
    %123 = vector.shape_cast %122 : vector<1x2x32xf32> to vector<2x32xf32>
    %124 = vector.extract_strided_slice %100 {offsets = [0, 64], sizes = [2, 32], strides = [1, 1]} : vector<2x96xf32> to vector<2x32xf32>
    %125 = arith.mulf %112, %124 : vector<2x32xf32>
    %126 = arith.addf %123, %125 : vector<2x32xf32>
    %127 = math.tanh %126 : vector<2x32xf32>
    %cst_32 = arith.constant 1.000000e+00 : f32
    %128 = vector.broadcast %cst_32 : f32 to vector<2x32xf32>
    %129 = arith.subf %128, %121 : vector<2x32xf32>
    %130 = arith.mulf %129, %127 : vector<2x32xf32>
    %131 = arith.mulf %121, %85 : vector<2x32xf32>
    %132 = arith.addf %130, %131 : vector<2x32xf32>
    %133 = vector.extract_strided_slice %132 {offsets = [0, 0], sizes = [2, 16], strides = [1, 1]} : vector<2x32xf32> to vector<2x16xf32>
    %134 = arith.index_cast %c2_i32 : i32 to index
    %c0_33 = arith.constant 0 : index
    %c0_34 = arith.constant 0 : index
    %135 = vector.load %arg5[%134, %c0_33, %c0_34] : memref<4x2x16xf32, #tpu.memory_space<vmem>>, vector<1x2x16xf32>
    %136 = vector.shape_cast %135 : vector<1x2x16xf32> to vector<2x16xf32>
    %137 = vector.shape_cast %133 : vector<2x16xf32> to vector<1x2x16xf32>
    tpu.vector_store %arg5[%134, %c0_33, %c0_34], %137 {strides = array<i32>} : memref<4x2x16xf32, #tpu.memory_space<vmem>>, vector<1x2x16xf32>,
    %138 = vector.extract_strided_slice %132 {offsets = [0, 16], sizes = [2, 16], strides = [1, 1]} : vector<2x32xf32> to vector<2x16xf32>
    %c3_i32_35 = arith.constant 3 : i32
    %139 = arith.subi %c3_i32_35, %c2_i32 : i32
    %140 = arith.index_cast %139 : i32 to index
    %c0_36 = arith.constant 0 : index
    %c0_37 = arith.constant 0 : index
    %141 = vector.load %arg6[%140, %c0_36, %c0_37] : memref<4x2x16xf32, #tpu.memory_space<vmem>>, vector<1x2x16xf32>
    %142 = vector.shape_cast %141 : vector<1x2x16xf32> to vector<2x16xf32>
    %143 = vector.shape_cast %138 : vector<2x16xf32> to vector<1x2x16xf32>
    tpu.vector_store %arg6[%140, %c0_36, %c0_37], %143 {strides = array<i32>} : memref<4x2x16xf32, #tpu.memory_space<vmem>>, vector<1x2x16xf32>,
    %c3_i32_38 = arith.constant 3 : i32
    %144 = arith.truncf %132 : vector<2x32xf32> to vector<2x32xbf16>
    %cst_39 = arith.constant dense<0.000000e+00> : vector<2x96xf32>
    %145 = tpu.matmul %144, %0, %cst_39 {dimension_numbers = #tpu.dot_dimension_numbers<[1], [0], [0], [1], [0, 0, 1, 1], [], []>} : vector<2x32xbf16>, vector<32x96xbf16>, vector<2x96xf32> -> vector<2x96xf32>
    %146 = vector.broadcast %1 : vector<1x96xf32> to vector<2x96xf32>
    %147 = arith.addf %145, %146 : vector<2x96xf32>
    %148 = arith.index_cast %c3_i32_38 : i32 to index
    %c0_40 = arith.constant 0 : index
    %c0_41 = arith.constant 0 : index
    %c0_42 = arith.constant 0 : index
    %149 = vector.load %arg1[%148, %c0_40, %c0_41, %c0_42] : memref<4x3x2x32xf32, #tpu.memory_space<vmem>>, vector<1x3x2x32xf32>
    %150 = vector.shape_cast %149 : vector<1x3x2x32xf32> to vector<3x2x32xf32>
    %151 = vector.extract_strided_slice %150 {offsets = [0, 0, 0], sizes = [1, 2, 32], strides = [1, 1, 1]} : vector<3x2x32xf32> to vector<1x2x32xf32>
    %152 = vector.shape_cast %151 : vector<1x2x32xf32> to vector<2x32xf32>
    %153 = vector.extract_strided_slice %147 {offsets = [0, 0], sizes = [2, 32], strides = [1, 1]} : vector<2x96xf32> to vector<2x32xf32>
    %154 = arith.addf %152, %153 : vector<2x32xf32>
    %155 = arith.negf %154 : vector<2x32xf32>
    %156 = math.exp %155 : vector<2x32xf32>
    %cst_43 = arith.constant 1.000000e+00 : f32
    %157 = vector.broadcast %cst_43 : f32 to vector<2x32xf32>
    %158 = arith.addf %157, %156 : vector<2x32xf32>
    %159 = arith.divf %157, %158 : vector<2x32xf32>
    %160 = vector.extract_strided_slice %150 {offsets = [1, 0, 0], sizes = [1, 2, 32], strides = [1, 1, 1]} : vector<3x2x32xf32> to vector<1x2x32xf32>
    %161 = vector.shape_cast %160 : vector<1x2x32xf32> to vector<2x32xf32>
    %162 = vector.extract_strided_slice %147 {offsets = [0, 32], sizes = [2, 32], strides = [1, 1]} : vector<2x96xf32> to vector<2x32xf32>
    %163 = arith.addf %161, %162 : vector<2x32xf32>
    %164 = arith.negf %163 : vector<2x32xf32>
    %165 = math.exp %164 : vector<2x32xf32>
    %cst_44 = arith.constant 1.000000e+00 : f32
    %166 = vector.broadcast %cst_44 : f32 to vector<2x32xf32>
    %167 = arith.addf %166, %165 : vector<2x32xf32>
    %168 = arith.divf %166, %167 : vector<2x32xf32>
    %169 = vector.extract_strided_slice %150 {offsets = [2, 0, 0], sizes = [1, 2, 32], strides = [1, 1, 1]} : vector<3x2x32xf32> to vector<1x2x32xf32>
    %170 = vector.shape_cast %169 : vector<1x2x32xf32> to vector<2x32xf32>
    %171 = vector.extract_strided_slice %147 {offsets = [0, 64], sizes = [2, 32], strides = [1, 1]} : vector<2x96xf32> to vector<2x32xf32>
    %172 = arith.mulf %159, %171 : vector<2x32xf32>
    %173 = arith.addf %170, %172 : vector<2x32xf32>
    %174 = math.tanh %173 : vector<2x32xf32>
    %cst_45 = arith.constant 1.000000e+00 : f32
    %175 = vector.broadcast %cst_45 : f32 to vector<2x32xf32>
    %176 = arith.subf %175, %168 : vector<2x32xf32>
    %177 = arith.mulf %176, %174 : vector<2x32xf32>
    %178 = arith.mulf %168, %132 : vector<2x32xf32>
    %179 = arith.addf %177, %178 : vector<2x32xf32>
    %180 = vector.extract_strided_slice %179 {offsets = [0, 0], sizes = [2, 16], strides = [1, 1]} : vector<2x32xf32> to vector<2x16xf32>
    %181 = arith.index_cast %c3_i32_38 : i32 to index
    %c0_46 = arith.constant 0 : index
    %c0_47 = arith.constant 0 : index
    %182 = vector.load %arg5[%181, %c0_46, %c0_47] : memref<4x2x16xf32, #tpu.memory_space<vmem>>, vector<1x2x16xf32>
    %183 = vector.shape_cast %182 : vector<1x2x16xf32> to vector<2x16xf32>
    %184 = vector.shape_cast %180 : vector<2x16xf32> to vector<1x2x16xf32>
    tpu.vector_store %arg5[%181, %c0_46, %c0_47], %184 {strides = array<i32>} : memref<4x2x16xf32, #tpu.memory_space<vmem>>, vector<1x2x16xf32>,
    %185 = vector.extract_strided_slice %179 {offsets = [0, 16], sizes = [2, 16], strides = [1, 1]} : vector<2x32xf32> to vector<2x16xf32>
    %c3_i32_48 = arith.constant 3 : i32
    %186 = arith.subi %c3_i32_48, %c3_i32_38 : i32
    %187 = arith.index_cast %186 : i32 to index
    %c0_49 = arith.constant 0 : index
    %c0_50 = arith.constant 0 : index
    %188 = vector.load %arg6[%187, %c0_49, %c0_50] : memref<4x2x16xf32, #tpu.memory_space<vmem>>, vector<1x2x16xf32>
    %189 = vector.shape_cast %188 : vector<1x2x16xf32> to vector<2x16xf32>
    %190 = vector.shape_cast %185 : vector<2x16xf32> to vector<1x2x16xf32>
    tpu.vector_store %arg6[%187, %c0_49, %c0_50], %190 {strides = array<i32>} : memref<4x2x16xf32, #tpu.memory_space<vmem>>, vector<1x2x16xf32>,
    %c4_i32 = arith.constant 4 : i32
    %c0_51 = arith.constant 0 : index
    %c0_52 = arith.constant 0 : index
    %c0_53 = arith.constant 0 : index
    %191 = vector.load %arg5[%c0_51, %c0_52, %c0_53] : memref<4x2x16xf32, #tpu.memory_space<vmem>>, vector<4x2x16xf32>
    %c0_54 = arith.constant 0 : index
    %c0_55 = arith.constant 0 : index
    %c0_56 = arith.constant 0 : index
    %192 = vector.load %arg4[%c0_54, %c0_55, %c0_56] : memref<4x2x32xf32, #tpu.memory_space<vmem>>, vector<4x2x16xf32>
    tpu.vector_store %arg4[%c0_54, %c0_55, %c0_56], %191 {strides = array<i32>} : memref<4x2x32xf32, #tpu.memory_space<vmem>>, vector<4x2x16xf32>,
    %c0_57 = arith.constant 0 : index
    %c0_58 = arith.constant 0 : index
    %c0_59 = arith.constant 0 : index
    %193 = vector.load %arg6[%c0_57, %c0_58, %c0_59] : memref<4x2x16xf32, #tpu.memory_space<vmem>>, vector<4x2x16xf32>
    %c0_60 = arith.constant 0 : index
    %c0_61 = arith.constant 0 : index
    %c16 = arith.constant 16 : index
    %194 = vector.load %arg4[%c0_60, %c0_61, %c16] : memref<4x2x32xf32, #tpu.memory_space<vmem>>, vector<4x2x16xf32>
    tpu.vector_store %arg4[%c0_60, %c0_61, %c16], %193 {strides = array<i32>} : memref<4x2x32xf32, #tpu.memory_space<vmem>>, vector<4x2x16xf32>,
    return
  }
  func.func @transform_0(%arg0: i32) -> (i32, i32, i32, i32) {
    %c0_i32 = arith.constant 0 : i32
    %c0_i32_0 = arith.constant 0 : i32
    %c0_i32_1 = arith.constant 0 : i32
    %c0_i32_2 = arith.constant 0 : i32
    return %c0_i32, %c0_i32_0, %arg0, %c0_i32_1 : i32, i32, i32, i32
  }
  func.func @transform_1(%arg0: i32) -> (i32, i32) {
    %c0_i32 = arith.constant 0 : i32
    %c0_i32_0 = arith.constant 0 : i32
    %c0_i32_1 = arith.constant 0 : i32
    return %c0_i32, %c0_i32_0 : i32, i32
  }
  func.func @transform_2(%arg0: i32) -> (i32, i32) {
    %c0_i32 = arith.constant 0 : i32
    %c0_i32_0 = arith.constant 0 : i32
    %c0_i32_1 = arith.constant 0 : i32
    return %c0_i32, %c0_i32_0 : i32, i32
  }
  func.func @transform_3(%arg0: i32) -> (i32, i32, i32) {
    %c0_i32 = arith.constant 0 : i32
    %c0_i32_0 = arith.constant 0 : i32
    %c0_i32_1 = arith.constant 0 : i32
    return %c0_i32, %arg0, %c0_i32_0 : i32, i32, i32
  }
}

module attributes {stable_mosaic.version = 11 : i64} {
  func.func @_linear_kernel(%arg0: i32, %arg1: memref<2x32xf32, #tpu.memory_space<vmem>>, %arg2: memref<32x5xbf16, #tpu.memory_space<vmem>>, %arg3: memref<1x5xf32, #tpu.memory_space<vmem>>, %arg4: memref<2x5xf32, #tpu.memory_space<vmem>>) attributes {dimension_semantics = [#tpu.dimension_semantics<parallel>], iteration_bounds = array<i64: 1>, scalar_prefetch = 0 : i64, scratch_operands = 0 : i64, tpu.core_type = #tpu.core_type<tc>, window_params = [{transform_indices = @transform_0, window_bounds = array<i64: 2, 32>}, {pipeline_mode = #tpu.pipeline_mode<synchronous>, transform_indices = @transform_1, window_bounds = array<i64: 32, 5>}, {pipeline_mode = #tpu.pipeline_mode<synchronous>, transform_indices = @transform_2, window_bounds = array<i64: 1, 5>}, {transform_indices = @transform_3, window_bounds = array<i64: 2, 5>}]} {
    %c0 = arith.constant 0 : index
    %c0_0 = arith.constant 0 : index
    %0 = vector.load %arg1[%c0, %c0_0] : memref<2x32xf32, #tpu.memory_space<vmem>>, vector<2x32xf32>
    %1 = arith.truncf %0 : vector<2x32xf32> to vector<2x32xbf16>
    %c0_1 = arith.constant 0 : index
    %c0_2 = arith.constant 0 : index
    %2 = vector.load %arg2[%c0_1, %c0_2] : memref<32x5xbf16, #tpu.memory_space<vmem>>, vector<32x5xbf16>
    %cst = arith.constant dense<0.000000e+00> : vector<2x5xf32>
    %3 = tpu.matmul %1, %2, %cst {dimension_numbers = #tpu.dot_dimension_numbers<[1], [0], [0], [1], [0, 0, 1, 1], [], []>} : vector<2x32xbf16>, vector<32x5xbf16>, vector<2x5xf32> -> vector<2x5xf32>
    %c0_3 = arith.constant 0 : index
    %c0_4 = arith.constant 0 : index
    %4 = vector.load %arg3[%c0_3, %c0_4] : memref<1x5xf32, #tpu.memory_space<vmem>>, vector<1x5xf32>
    %5 = vector.broadcast %4 : vector<1x5xf32> to vector<2x5xf32>
    %6 = arith.addf %3, %5 : vector<2x5xf32>
    %c0_5 = arith.constant 0 : index
    %c0_6 = arith.constant 0 : index
    %7 = vector.load %arg4[%c0_5, %c0_6] : memref<2x5xf32, #tpu.memory_space<vmem>>, vector<2x5xf32>
    tpu.vector_store %arg4[%c0_5, %c0_6], %6 {strides = array<i32>} : memref<2x5xf32, #tpu.memory_space<vmem>>, vector<2x5xf32>,
    return
  }
  func.func @transform_0(%arg0: i32) -> (i32, i32) {
    %c0_i32 = arith.constant 0 : i32
    %c0_i32_0 = arith.constant 0 : i32
    return %arg0, %c0_i32 : i32, i32
  }
  func.func @transform_1(%arg0: i32) -> (i32, i32) {
    %c0_i32 = arith.constant 0 : i32
    %c0_i32_0 = arith.constant 0 : i32
    %c0_i32_1 = arith.constant 0 : i32
    return %c0_i32, %c0_i32_0 : i32, i32
  }
  func.func @transform_2(%arg0: i32) -> (i32, i32) {
    %c0_i32 = arith.constant 0 : i32
    %c0_i32_0 = arith.constant 0 : i32
    %c0_i32_1 = arith.constant 0 : i32
    return %c0_i32, %c0_i32_0 : i32, i32
  }
  func.func @transform_3(%arg0: i32) -> (i32, i32) {
    %c0_i32 = arith.constant 0 : i32
    %c0_i32_0 = arith.constant 0 : i32
    return %arg0, %c0_i32 : i32, i32
  }
}

module attributes {stable_mosaic.version = 11 : i64} {
  func.func @_attn_pool_kernel(%arg0: i32, %arg1: memref<4x2x32xf32, #tpu.memory_space<vmem>>, %arg2: memref<32x32xbf16, #tpu.memory_space<vmem>>, %arg3: memref<1x32xf32, #tpu.memory_space<vmem>>, %arg4: memref<1x32xf32, #tpu.memory_space<vmem>>, %arg5: memref<2x32xf32, #tpu.memory_space<vmem>>) attributes {dimension_semantics = [#tpu.dimension_semantics<parallel>], iteration_bounds = array<i64: 1>, scalar_prefetch = 0 : i64, scratch_operands = 0 : i64, tpu.core_type = #tpu.core_type<tc>, window_params = [{transform_indices = @transform_0, window_bounds = array<i64: 4, 2, 32>}, {pipeline_mode = #tpu.pipeline_mode<synchronous>, transform_indices = @transform_1, window_bounds = array<i64: 32, 32>}, {pipeline_mode = #tpu.pipeline_mode<synchronous>, transform_indices = @transform_2, window_bounds = array<i64: 1, 32>}, {pipeline_mode = #tpu.pipeline_mode<synchronous>, transform_indices = @transform_3, window_bounds = array<i64: 1, 32>}, {transform_indices = @transform_4, window_bounds = array<i64: 2, 32>}]} {
    %c0 = arith.constant 0 : index
    %c0_0 = arith.constant 0 : index
    %c0_1 = arith.constant 0 : index
    %0 = vector.load %arg1[%c0, %c0_0, %c0_1] : memref<4x2x32xf32, #tpu.memory_space<vmem>>, vector<4x2x32xf32>
    %1 = vector.shape_cast %0 : vector<4x2x32xf32> to vector<8x32xf32>
    %2 = arith.truncf %1 : vector<8x32xf32> to vector<8x32xbf16>
    %c0_2 = arith.constant 0 : index
    %c0_3 = arith.constant 0 : index
    %3 = vector.load %arg2[%c0_2, %c0_3] : memref<32x32xbf16, #tpu.memory_space<vmem>>, vector<32x32xbf16>
    %cst = arith.constant dense<0.000000e+00> : vector<8x32xf32>
    %4 = tpu.matmul %2, %3, %cst {dimension_numbers = #tpu.dot_dimension_numbers<[1], [0], [0], [1], [0, 0, 1, 1], [], []>} : vector<8x32xbf16>, vector<32x32xbf16>, vector<8x32xf32> -> vector<8x32xf32>
    %c0_4 = arith.constant 0 : index
    %c0_5 = arith.constant 0 : index
    %5 = vector.load %arg3[%c0_4, %c0_5] : memref<1x32xf32, #tpu.memory_space<vmem>>, vector<1x32xf32>
    %6 = vector.broadcast %5 : vector<1x32xf32> to vector<8x32xf32>
    %7 = arith.addf %4, %6 : vector<8x32xf32>
    %8 = math.tanh %7 : vector<8x32xf32>
    %c0_6 = arith.constant 0 : index
    %c0_7 = arith.constant 0 : index
    %9 = vector.load %arg4[%c0_6, %c0_7] : memref<1x32xf32, #tpu.memory_space<vmem>>, vector<1x32xf32>
    %10 = vector.broadcast %9 : vector<1x32xf32> to vector<8x32xf32>
    %11 = arith.mulf %8, %10 : vector<8x32xf32>
    %cst_8 = arith.constant dense<0.000000e+00> : vector<8xf32>
    %12 = vector.multi_reduction <add>, %11, %cst_8 [1] : vector<8x32xf32> to vector<8xf32>
    %13 = vector.shape_cast %12 : vector<8xf32> to vector<8x1xf32>
    %14 = vector.shape_cast %13 : vector<8x1xf32> to vector<4x2x1xf32>
    %cst_9 = arith.constant dense<0xFF800000> : vector<2x1xf32>
    %15 = vector.multi_reduction <maximumf>, %14, %cst_9 [0] : vector<4x2x1xf32> to vector<2x1xf32>
    %16 = vector.shape_cast %15 : vector<2x1xf32> to vector<1x2x1xf32>
    %17 = vector.broadcast %16 : vector<1x2x1xf32> to vector<4x2x1xf32>
    %18 = arith.subf %14, %17 : vector<4x2x1xf32>
    %19 = math.exp %18 : vector<4x2x1xf32>
    %cst_10 = arith.constant dense<0.000000e+00> : vector<2x1xf32>
    %20 = vector.multi_reduction <add>, %19, %cst_10 [0] : vector<4x2x1xf32> to vector<2x1xf32>
    %21 = vector.broadcast %19 : vector<4x2x1xf32> to vector<4x2x32xf32>
    %22 = arith.mulf %21, %0 : vector<4x2x32xf32>
    %cst_11 = arith.constant dense<0.000000e+00> : vector<2x32xf32>
    %23 = vector.multi_reduction <add>, %22, %cst_11 [0] : vector<4x2x32xf32> to vector<2x32xf32>
    %24 = tpu.reciprocal %20 {approx = true} : vector<2x1xf32> -> vector<2x1xf32>
    %25 = vector.broadcast %24 : vector<2x1xf32> to vector<2x32xf32>
    %26 = arith.mulf %23, %25 : vector<2x32xf32>
    %c0_12 = arith.constant 0 : index
    %c0_13 = arith.constant 0 : index
    %27 = vector.load %arg5[%c0_12, %c0_13] : memref<2x32xf32, #tpu.memory_space<vmem>>, vector<2x32xf32>
    tpu.vector_store %arg5[%c0_12, %c0_13], %26 {strides = array<i32>} : memref<2x32xf32, #tpu.memory_space<vmem>>, vector<2x32xf32>,
    return
  }
  func.func @transform_0(%arg0: i32) -> (i32, i32, i32) {
    %c0_i32 = arith.constant 0 : i32
    %c0_i32_0 = arith.constant 0 : i32
    %c0_i32_1 = arith.constant 0 : i32
    return %c0_i32, %arg0, %c0_i32_0 : i32, i32, i32
  }
  func.func @transform_1(%arg0: i32) -> (i32, i32) {
    %c0_i32 = arith.constant 0 : i32
    %c0_i32_0 = arith.constant 0 : i32
    %c0_i32_1 = arith.constant 0 : i32
    return %c0_i32, %c0_i32_0 : i32, i32
  }
  func.func @transform_2(%arg0: i32) -> (i32, i32) {
    %c0_i32 = arith.constant 0 : i32
    %c0_i32_0 = arith.constant 0 : i32
    %c0_i32_1 = arith.constant 0 : i32
    return %c0_i32, %c0_i32_0 : i32, i32
  }
  func.func @transform_3(%arg0: i32) -> (i32, i32) {
    %c0_i32 = arith.constant 0 : i32
    %c0_i32_0 = arith.constant 0 : i32
    %c0_i32_1 = arith.constant 0 : i32
    return %c0_i32, %c0_i32_0 : i32, i32
  }
  func.func @transform_4(%arg0: i32) -> (i32, i32) {
    %c0_i32 = arith.constant 0 : i32
    %c0_i32_0 = arith.constant 0 : i32
    return %arg0, %c0_i32 : i32, i32
  }
}

</mosaic_0001>

<bundles_post_ra>
// kernel: han_forward.7
= control target key start
LH: loop header
LB: loop body
LE: loop exit
PB: predicated region body
PF: predicated region fallthrough
CT: control target
= control target key end

     0   :  { %vm50_vm0 = vcmask 261120   ;;  %vm128_vm1 = vcmask 785408   ;;  %s261_s1 = inlined_call_operand.vmem [shape: bf16[32,96], index: 1, kind: input, shape index: {}]   ;;  %s262_s0 = inlined_call_operand.vmem [shape: f32[64,32], index: 0, kind: input, shape index: {}]   ;;  %s263_s2 = inlined_call_operand.vmem [shape: f32[1,96], index: 2, kind: input, shape index: {}]   ;;  %s264_s3 = inlined_call_operand.vmem [shape: f32[64,96], index: 3, kind: output, shape index: {}]  }
   0x1   :  { %v170_v0 = vld [vmem:[%s261_s1 + $0x8] sm:$0xff]   ;;  %v171_v1 = vld [vmem:[%s261_s1] sm:$0xff]   ;;  %v17_v7 = vld [vmem:[%s262_s0 + $0x10] sm:$0xff] }
   0x2   :  { %154 = vmatprep.subr.bf16.mxu0 %v170_v0  ;;  %166 = vmatprep.subr.bf16.mxu1 %v170_v0  ;;  %v15_v2 = vld [vmem:[%s262_s0] sm:$0xff]  ;;  %v16_v3 = vld [vmem:[%s262_s0 + $0x8] sm:$0xff]  ;;  %v18_v8 = vld [vmem:[%s262_s0 + $0x18] sm:$0xff] }
   0x3   :  { %v19_v4 = vld [vmem:[%s262_s0 + $0x20] sm:$0xff]  ;;  %155 = vmatpush3.bf16.msra.mxu0 %v170_v0  ;;  %168 = vmatpush3.bf16.msra.mxu1 %v170_v0  ;;  %v23_v5 = vpack.c.bf16 %v16_v3, %v15_v2  ;;  %v20_v6 = vld [vmem:[%s262_s0 + $0x28] sm:$0xff]  ;;  %v21_v10 = vld [vmem:[%s262_s0 + $0x30] sm:$0xff]  ;;  %v24_v12 = vpack.c.bf16 %v18_v8, %v17_v7 }
   0x4   :  { %156 = vmatprep.subr.bf16.mxu0 %v171_v1  ;;  %167 = vmatprep.subr.bf16.mxu1 %v171_v1  ;;  %v25_v9 = vpack.c.bf16 %v20_v6, %v19_v4  ;;  %v22_v11 = vld [vmem:[%s262_s0 + $0x38] sm:$0xff]  ;;  %v141_v14 = vld [vmem:[%s263_s2] ss:$0 sm:$0xff] }
   0x5   :  { %158 = vmatprep.mubr.msk.bf16.mxu0 %vm50_vm0, %v23_v5  ;;  %v26_v13 = vpack.c.bf16 %v22_v11, %v21_v10 }
   0x6   :  { %162 = vmatprep.mubr.msk.bf16.mxu1 %vm50_vm0, %v25_v9 }
   0x7   :  { %157 = vmatpush3.bf16.msra.mxu0 %v171_v1  ;;  %169 = vmatpush3.bf16.msra.mxu1 %v171_v1 }
   0xa   :  { %159 = vmatmul.mubr.msk.bf16.vlgmr.msra.gmra.mxu0 %vm50_vm0, %v24_v12  ;;  %163 = vmatmul.mubr.msk.bf16.vlgmr.msra.gmra.mxu1 %vm50_vm0, %v26_v13 }
  0xca   :  { %v160_v15 = vpop.f32.mrf.mxu0  ;;  %v164_v16 = vpop.f32.mrf.mxu1 }
  0xcb   :  { %v106_v17 = vadd.f32 %v160_v15, %v141_v14  ;;  %v122_v18 = vadd.f32 %v164_v16, %v141_v14 }
  0xcc   :  { %v97_v19 = vpop.f32.mrf.mxu0  ;;  %v113_v20 = vpop.f32.mrf.mxu1 }
  0xcd   :  { %131 = vst.msk [vmem:[%s264_s3 + $0x10] sm:$0xff] %vm128_vm1, %v106_v17  ;;  %135 = vst.msk [vmem:[%s264_s3 + $0x30] sm:$0xff] %vm128_vm1, %v122_v18  ;;  %v98_v21 = vadd.f32 %v141_v14, %v97_v19  ;;  %v114_v22 = vadd.f32 %v141_v14, %v113_v20 }
  0xce   :  { %v161_v23 = vpop.f32.mrf.mxu0  ;;  %v165_v24 = vpop.f32.mrf.mxu1 }
  0xcf   :  { %129 = vst.msk [vmem:[%s264_s3] sm:$0xff] %vm128_vm1, %v98_v21  ;;  %133 = vst.msk [vmem:[%s264_s3 + $0x20] sm:$0xff] %vm128_vm1, %v114_v22  ;;  %v109_v25 = vadd.f32 %v161_v23, %v141_v14  ;;  %v125_v26 = vadd.f32 %v165_v24, %v141_v14 }
  0xd0   :  { %v100_v27 = vpop.f32.mrf.mxu0  ;;  %v116_v28 = vpop.f32.mrf.mxu1 }
  0xd1   :  { %132 = vst.msk [vmem:[%s264_s3 + $0x18] sm:$0xff] %vm128_vm1, %v109_v25  ;;  %136 = vst.msk [vmem:[%s264_s3 + $0x38] sm:$0xff] %vm128_vm1, %v125_v26  ;;  %v101_v29 = vadd.f32 %v141_v14, %v100_v27  ;;  %v117_v30 = vadd.f32 %v141_v14, %v116_v28 }
  0xd3   :  { %130 = vst.msk [vmem:[%s264_s3 + $0x8] sm:$0xff] %vm128_vm1, %v101_v29  ;;  %134 = vst.msk [vmem:[%s264_s3 + $0x28] sm:$0xff] %vm128_vm1, %v117_v30 }

// kernel: han_forward.10
= control target key start
LH: loop header
LB: loop body
LE: loop exit
PB: predicated region body
PF: predicated region fallthrough
CT: control target
= control target key end

     0   :  { %v109_v0 = vmov 0.0   ;;  %vm110_vm0 = vmmov 0   ;;  %vm40_vm1 = vcmask 261120   ;;  %vm84_vm2 = vcmask 785408   ;;  %s146_s1 = inlined_call_operand.vmem [shape: bf16[32,96], index: 1, kind: input, shape index: {}]   ;;  %s147_s0 = inlined_call_operand.vmem [shape: f32[8,32], index: 0, kind: input, shape index: {}]   ;;  %s148_s2 = inlined_call_operand.vmem [shape: f32[1,96], index: 2, kind: input, shape index: {}]   ;;  %s149_s3 = inlined_call_operand.vmem [shape: f32[8,96], index: 3, kind: output, shape index: {}]  }
   0x1   :  { %97 = vmatprep.subr.bf16.mxu0 %v109_v0  ;;  %v107_v1 = vld [vmem:[%s146_s1 + $0x8] sm:$0xff]   ;;  %101 = vmatprep.mubr.msk.bf16.mxu0 %vm110_vm0, %v109_v0  ;;  %v108_v2 = vld [vmem:[%s146_s1] sm:$0xff]  }
   0x2   :  { %98 = vmatpush3.bf16.msra.mxu0 %v107_v1  ;;  %v15_v3 = vld [vmem:[%s147_s0] sm:$0xff] }
   0x3   :  { %99 = vmatprep.subr.bf16.mxu0 %v109_v0  ;;  %v16_v4 = vpack.c.bf16 %v15_v3, %v15_v3  ;;  %v90_v5 = vld [vmem:[%s148_s2] ss:$0 sm:$0xff] }
   0x6   :  { %100 = vmatpush3.bf16.msra.mxu0 %v108_v2 }
   0x9   :  { %102 = vmatmul.mubr.msk.bf16.vlgmr.msra.gmra.mxu0 %vm40_vm1, %v16_v4 }
  0xc9   :  { %v78_v6 = vpop.f32.mrf.mxu0 }
  0xca   :  { %v79_v7 = vadd.f32 %v90_v5, %v78_v6 }
  0xcb   :  { %v103_v8 = vpop.f32.mrf.mxu0 }
  0xcc   :  { %85 = vst.msk [vmem:[%s149_s3] sm:$0xff] %vm84_vm2, %v79_v7 }
  0xcd   :  { %v81_v9 = vpop.f32.mrf.mxu0 }
  0xcf   :  { %v104_v10 = vpop.f32.mrf.mxu0 }

// kernel: han_forward.9
= control target key start
LH: loop header
LB: loop body
LE: loop exit
PB: predicated region body
PF: predicated region fallthrough
CT: control target
= control target key end

     0   :  { %vm53_vm0 = vcmask 261120   ;;  %s429_s1 = inlined_call_operand.vmem [shape: bf16[32,32], index: 1, kind: input, shape index: {}]   ;;  %s430_s0 = inlined_call_operand.vmem [shape: f32[8,8,32], index: 0, kind: input, shape index: {}]   ;;  %s431_s2 = inlined_call_operand.vmem [shape: f32[1,32], index: 2, kind: input, shape index: {}]   ;;  %s432_s3 = inlined_call_operand.vmem [shape: f32[1,32], index: 3, kind: input, shape index: {}]   ;;  %s433_s4 = inlined_call_operand.vmem [shape: f32[8,32], index: 4, kind: output, shape index: {}]  }
   0x1   :  { %v276_v0 = vld [vmem:[%s429_s1 + $0x8] sm:$0xff]   ;;  %v277_v1 = vld [vmem:[%s429_s1] sm:$0xff]   ;;  %v368_v7 = vld [vmem:[%s430_s0 + $0x10] sm:$0xff] }
   0x2   :  { %260 = vmatprep.subr.bf16.mxu0 %v276_v0  ;;  %272 = vmatprep.subr.bf16.mxu1 %v276_v0  ;;  %v346_v2 = vld [vmem:[%s430_s0] sm:$0xff]  ;;  %v351_v3 = vld [vmem:[%s430_s0 + $0x8] sm:$0xff]  ;;  %v373_v8 = vld [vmem:[%s430_s0 + $0x18] sm:$0xff] }
   0x3   :  { %v356_v4 = vld [vmem:[%s430_s0 + $0x20] sm:$0xff]  ;;  %261 = vmatpush3.bf16.msra.mxu0 %v276_v0  ;;  %274 = vmatpush3.bf16.msra.mxu1 %v276_v0  ;;  %v26_v5 = vpack.c.bf16 %v351_v3, %v346_v2  ;;  %v363_v6 = vld [vmem:[%s430_s0 + $0x28] sm:$0xff]  ;;  %v380_v10 = vld [vmem:[%s430_s0 + $0x30] sm:$0xff]  ;;  %v27_v12 = vpack.c.bf16 %v373_v8, %v368_v7 }
   0x4   :  { %262 = vmatprep.subr.bf16.mxu0 %v277_v1  ;;  %273 = vmatprep.subr.bf16.mxu1 %v277_v1  ;;  %v28_v9 = vpack.c.bf16 %v363_v6, %v356_v4  ;;  %v385_v11 = vld [vmem:[%s430_s0 + $0x38] sm:$0xff]  ;;  %v246_v14 = vld [vmem:[%s431_s2] ss:$0 sm:$0xff] }
   0x5   :  { %264 = vmatprep.mubr.msk.bf16.mxu0 %vm53_vm0, %v26_v5  ;;  %v29_v13 = vpack.c.bf16 %v385_v11, %v380_v10  ;;  %v253_v31 = vld [vmem:[%s432_s3] ss:$0 sm:$0xff] }
   0x6   :  { %268 = vmatprep.mubr.msk.bf16.mxu1 %vm53_vm0, %v28_v9 }
   0x7   :  { %263 = vmatpush3.bf16.msra.mxu0 %v277_v1  ;;  %275 = vmatpush3.bf16.msra.mxu1 %v277_v1 }
   0xa   :  { %265 = vmatmul.mubr.msk.bf16.vlgmr.msra.gmra.mxu0 %vm53_vm0, %v27_v12  ;;  %269 = vmatmul.mubr.msk.bf16.vlgmr.msra.gmra.mxu1 %vm53_vm0, %v29_v13 }
  0xca   :  { %v266_v15 = vpop.f32.mrf.mxu0  ;;  %v270_v16 = vpop.f32.mrf.mxu1 }
  0xcb   :  { %v109_v17 = vadd.f32 %v266_v15, %v246_v14  ;;  %v125_v30 = vadd.f32 %v270_v16, %v246_v14 }
  0xcc   :  { %v100_v18 = vpop.f32.mrf.mxu0  ;;  %v116_v19 = vpop.f32.mrf.mxu1 }
  0xcd   :  { %278 = vtanh.f32 %v109_v17  ;;  %v101_v20 = vadd.f32 %v246_v14, %v100_v18  ;;  %v117_v21 = vadd.f32 %v246_v14, %v116_v19 }
  0xce   :  { %v267_v22 = vpop.f32.mrf.mxu0  ;;  %v271_v23 = vpop.f32.mrf.mxu1 }
  0xcf   :  { %280 = vtanh.f32 %v101_v20  ;;  %v112_v24 = vadd.f32 %v267_v22, %v246_v14  ;;  %v128_v27 = vadd.f32 %v271_v23, %v246_v14 }
  0xd0   :  { %282 = vtanh.f32 %v117_v21  ;;  %v103_v25 = vpop.f32.mrf.mxu0  ;;  %v119_v26 = vpop.f32.mrf.mxu1 }
  0xd1   :  { %284 = vtanh.f32 %v112_v24  ;;  %v104_v28 = vadd.f32 %v246_v14, %v103_v25  ;;  %v120_v29 = vadd.f32 %v246_v14, %v119_v26 }
  0xd3   :  { %286 = vtanh.f32 %v104_v28 }
  0xd4   :  { %288 = vtanh.f32 %v120_v29 }
  0xd5   :  { %290 = vtanh.f32 %v128_v27 }
  0xd6   :  { %292 = vtanh.f32 %v125_v30 }
  0xda   :  { %v279_v32 = vpop.eup %278 }
  0xdb   :  { %v148_v33 = vmul.f32 %v279_v32, %v253_v31 }
  0xdc   :  { %v281_v34 = vpop.eup %280 }
  0xdd   :  { %v283_v35 = vpop.eup %282  ;;  %v160_v36 = vsel %vm53_vm0, %v148_v33, 0.0  ;;  %v146_v37 = vmul.f32 %v281_v34, %v253_v31 }
  0xde   :  { %v285_v38 = vpop.eup %284  ;;  %161 = vadd.xlane.f32.xlu1 %v160_v36  ;;  %v150_v41 = vmul.f32 %v283_v35, %v253_v31 }
  0xdf   :  { %v154_v39 = vsel %vm53_vm0, %v146_v37, 0.0  ;;  %v149_v40 = vmul.f32 %v285_v38, %v253_v31 }
  0xe0   :  { %v287_v42 = vpop.eup %286  ;;  %155 = vadd.xlane.f32.xlu0 %v154_v39  ;;  %v166_v47 = vsel %vm53_vm0, %v150_v41, 0.0 }
  0xe1   :  { %v289_v43 = vpop.eup %288  ;;  %v163_v44 = vsel %vm53_vm0, %v149_v40, 0.0  ;;  %v147_v48 = vmul.f32 %v287_v42, %v253_v31 }
  0xe2   :  { %v291_v45 = vpop.eup %290  ;;  %164 = vadd.xlane.f32.xlu1 %v163_v44  ;;  %v151_v46 = vmul.f32 %v289_v43, %v253_v31 }
  0xe3   :  { %v293_v49 = vpop.eup %292  ;;  %v153_v51 = vmul.f32 %v291_v45, %v253_v31  ;;  %v157_v52 = vsel %vm53_vm0, %v147_v48, 0.0 }
  0xe4   :  { %167 = vadd.xlane.f32.xlu0 %v166_v47  ;;  %v169_v50 = vsel %vm53_vm0, %v151_v46, 0.0  ;;  %v152_v53 = vmul.f32 %v293_v49, %v253_v31 }
  0xe5   :  { %v175_v54 = vsel %vm53_vm0, %v153_v51, 0.0 }
  0xe6   :  { %170 = vadd.xlane.f32.xlu1 %v169_v50  ;;  %v172_v55 = vsel %vm53_vm0, %v152_v53, 0.0 }
  0xe8   :  { %158 = vadd.xlane.f32.xlu0 %v157_v52 }
  0xea   :  { %176 = vadd.xlane.f32.xlu1 %v175_v54 }
  0xec   :  { %173 = vadd.xlane.f32.xlu0 %v172_v55 }
 0x167   :  { %v162_v56 = vpop.xlane.xlu1 %161 }
 0x169   :  { %v156_v57 = vpop.xlane.xlu0 %155 }
 0x16b   :  { %v165_v58 = vpop.xlane.xlu1 %164 }
 0x16d   :  { %v168_v59 = vpop.xlane.xlu0 %167 }
 0x16e   :  { %v178_v1 = vmax.f32 %v156_v57, %v168_v59 }
 0x16f   :  { %v171_v60 = vpop.xlane.xlu1 %170 }
 0x171   :  { %v159_v61 = vpop.xlane.xlu0 %158 }
 0x172   :  { %v179_v63 = vmax.f32 %v159_v61, %v171_v60 }
 0x173   :  { %v177_v62 = vpop.xlane.xlu1 %176 }
 0x174   :  { %v181_v5 = vmax.f32 %v165_v58, %v177_v62  ;;  %v182_v12 = vmax.f32 %v178_v1, %v179_v63 }
 0x175   :  { %v174_v0 = vpop.xlane.xlu0 %173 }
 0x176   :  { %v180_v9 = vmax.f32 %v162_v56, %v174_v0 }
 0x178   :  { %v183_v13 = vmax.f32 %v180_v9, %v181_v5 }
 0x17a   :  { %v184_v14 = vmax.f32 %v182_v12, %v183_v13 }
 0x17c   :  { %v185_v15 = vsub.f32 %v156_v57, %v184_v14  ;;  %v186_v16 = vsub.f32 %v159_v61, %v184_v14  ;;  %v187_v17 = vsub.f32 %v162_v56, %v184_v14  ;;  %v188_v18 = vsub.f32 %v165_v58, %v184_v14 }
 0x17d   :  { %v189_v22 = vsub.f32 %v168_v59, %v184_v14  ;;  %v190_v24 = vsub.f32 %v171_v60, %v184_v14  ;;  %v191_v25 = vsub.f32 %v174_v0, %v184_v14  ;;  %v192_v27 = vsub.f32 %v177_v62, %v184_v14 }
 0x17e   :  { %v193_v19 = vmul.f32 1.442695, %v185_v15  ;;  %v195_v20 = vmul.f32 1.442695, %v186_v16  ;;  %v197_v21 = vmul.f32 1.442695, %v187_v17 }
 0x17f   :  { %v199_v23 = vmul.f32 1.442695, %v188_v18  ;;  %v201_v26 = vmul.f32 1.442695, %v189_v22  ;;  %v203_v28 = vmul.f32 1.442695, %v190_v24 }
 0x180   :  { %294 = vpow2.f32 %v193_v19  ;;  %v205_v29 = vmul.f32 1.442695, %v191_v25  ;;  %v207_v30 = vmul.f32 1.442695, %v192_v27 }
 0x181   :  { %296 = vpow2.f32 %v195_v20 }
 0x182   :  { %298 = vpow2.f32 %v197_v21 }
 0x183   :  { %300 = vpow2.f32 %v199_v23 }
 0x184   :  { %302 = vpow2.f32 %v201_v26 }
 0x185   :  { %304 = vpow2.f32 %v203_v28 }
 0x186   :  { %306 = vpow2.f32 %v205_v29 }
 0x187   :  { %308 = vpow2.f32 %v207_v30 }
 0x18d   :  { %v295_v31 = vpop.eup %294 }
 0x18e   :  { %v297_v32 = vpop.eup %296  ;;  %v216_v33 = vmul.f32 %v295_v31, %v346_v2 }
 0x18f   :  { %v299_v34 = vpop.eup %298  ;;  %v209_v35 = vadd.f32 %v297_v32, %v295_v31  ;;  %v217_v36 = vmul.f32 %v297_v32, %v351_v3 }
 0x190   :  { %v218_v37 = vmul.f32 %v299_v34, %v368_v7  ;;  %v224_v38 = vsel %vm53_vm0, %v216_v33, 0.0  ;;  %v301_v39 = vpop.eup %300 }
 0x191   :  { %v210_v40 = vadd.f32 %v299_v34, %v209_v35  ;;  %v225_v41 = vsel %vm53_vm0, %v217_v36, 0.0  ;;  %v303_v44 = vpop.eup %302  ;;  %v219_v45 = vmul.f32 %v301_v39, %v373_v8 }
 0x192   :  { %v226_v42 = vadd.f32 %v225_v41, %v224_v38  ;;  %v227_v46 = vsel %vm53_vm0, %v218_v37, 0.0  ;;  %v305_v48 = vpop.eup %304  ;;  %v220_v7 = vmul.f32 %v303_v44, %v356_v4 }
 0x193   :  { %v211_v43 = vadd.f32 %v301_v39, %v210_v40  ;;  %v307_v3 = vpop.eup %306  ;;  %v229_v50 = vsel %vm53_vm0, %v219_v45, 0.0  ;;  %v221_v55 = vmul.f32 %v305_v48, %v363_v6 }
 0x194   :  { %v228_v47 = vadd.f32 %v227_v46, %v226_v42  ;;  %v309_v53 = vpop.eup %308  ;;  %v231_v56 = vsel %vm53_vm0, %v220_v7, 0.0  ;;  %v222_v57 = vmul.f32 %v307_v3, %v380_v10 }
 0x195   :  { %v212_v2 = vadd.f32 %v303_v44, %v211_v43  ;;  %v233_v58 = vsel %vm53_vm0, %v221_v55, 0.0  ;;  %v223_v60 = vmul.f32 %v309_v53, %v385_v11 }
 0x196   :  { %v230_v52 = vadd.f32 %v229_v50, %v228_v47  ;;  %v235_v4 = vsel %vm53_vm0, %v222_v57, 0.0 }
 0x197   :  { %v213_v49 = vadd.f32 %v305_v48, %v212_v2  ;;  %v237_v62 = vsel %vm53_vm0, %v223_v60, 0.0 }
 0x198   :  { %v232_v8 = vadd.f32 %v231_v56, %v230_v52 }
 0x199   :  { %v214_v51 = vadd.f32 %v307_v3, %v213_v49 }
 0x19a   :  { %v234_v59 = vadd.f32 %v233_v58, %v232_v8 }
 0x19b   :  { %v215_v54 = vadd.f32 %v309_v53, %v214_v51 }
 0x19c   :  { %v236_v61 = vadd.f32 %v235_v4, %v234_v59 }
 0x19d   :  { %310 = vrcp.f32 %v215_v54 }
 0x19e   :  { %v238_v63 = vadd.f32 %v237_v62, %v236_v61 }
 0x1aa   :  { %v311_v0 = vpop.eup %310 }
 0x1ab   :  { %v240_v1 = vmul.f32 %v311_v0, %v238_v63 }
 0x1ad   :  { %241 = vst.msk [vmem:[%s433_s4] sm:$0xff] %vm53_vm0, %v240_v1 }

// kernel: han_forward.8
= control target key start
LH: loop header
LB: loop body
LE: loop exit
PB: predicated region body
PF: predicated region fallthrough
CT: control target
= control target key end

     0   :  { %v1001_v0 = vmov 0.0   ;;  %vm1002_vm0 = vmmov 0   ;;  %v1003_v3 = vmov 0   ;;  %s1004_s17 = smov 96   ;;  %s1005_s18 = smov 64   ;;  %vm113_vm1 = vcmask 130048   ;;  %s1332_s1 = inlined_call_operand.vmem [shape: bf16[32,96], index: 1, kind: input, shape index: {}]   ;;  %s1333_s2 = inlined_call_operand.vmem [shape: f32[1,96], index: 2, kind: input, shape index: {}]   ;;  %s1334_s0 = inlined_call_operand.vmem [shape: f32[8,3,8,32], index: 0, kind: input, shape index: {}]   ;;  %s1335_s3 = inlined_call_operand.vmem [shape: f32[8,8,32], index: 3, kind: output, shape index: {}]  }
   0x1   :  { %848 = vmatprep.subr.bf16.mxu0 %v1001_v0  ;;  %v1032_v1 = vld [vmem:[%s1332_s1 + $0x8] sm:$0xff]   ;;  %852 = vmatprep.mubr.msk.bf16.mxu0 %vm1002_vm0, %v1001_v0  ;;  %v1043_v2 = vld [vmem:[%s1332_s1] sm:$0xff]   ;;  %v84_v22 = vld [vmem:[%s1334_s0 + $0x10] sm:$0xff]  ;;  %vm38_vm2 = vcmask 261120   ;;  %s1007_s25 = smov 16   ;;  %vm764_vm3 = vcmask 261248  }
   0x2   :  { %856 = vmatprep.subr.bf16.mxu1 %v1001_v0  ;;  %860 = vmatprep.mubr.msk.bf16.mxu1 %vm1002_vm0, %v1001_v0  ;;  %v1061_v4 = vld [vmem:[%s1333_s2] ss:$0 sm:$0xff]  ;;  %v83_v15 = vld [vmem:[%s1334_s0 + $0x8] sm:$0xff]  ;;  %v783_v39 = vld [vmem:[%s1334_s0 + $0x18] sm:$0xff]  ;;  %s1006_s2 = smov 112  }
   0x3   :  { %849 = vmatpush3.bf16.msra.mxu0 %v1032_v1  ;;  %857 = vmatpush3.bf16.msra.mxu1 %v1032_v1  ;;  %v82_v10 = vld [vmem:[%s1334_s0] sm:$0xff]  ;;  %v785_v51 = vld [vmem:[%s1334_s0 + $0x28] sm:$0xff] }
   0x4   :  { %850 = vmatprep.subr.bf16.mxu0 %v1001_v0  ;;  %858 = vmatprep.subr.bf16.mxu1 %v1001_v0  ;;  %v784_v44 = vld [vmem:[%s1334_s0 + $0x20] sm:$0xff] }
   0x7   :  { %851 = vmatpush3.bf16.msra.mxu0 %v1043_v2  ;;  %859 = vmatpush3.bf16.msra.mxu1 %v1043_v2 }
   0x8   :  { %864 = vmatprep.subr.bf16.mxu0 %v1001_v0  ;;  %872 = vmatprep.subr.bf16.mxu1 %v1001_v0 }
   0xa   :  { %853 = vmatmul.mubr.bf16.vlgmr.msra.gmra.mxu0 %v1003_v3 }
   0xb   :  { %865 = vmatpush3.bf16.msra.mxu0 %v1032_v1  ;;  %868 = vmatprep.mubr.msk.bf16.mxu0 %vm1002_vm0, %v1001_v0 }
   0xc   :  { %866 = vmatprep.subr.bf16.mxu0 %v1001_v0 }
   0xf   :  { %867 = vmatpush3.bf16.msra.mxu0 %v1043_v2 }
  0x10   :  { %880 = vmatprep.subr.bf16.mxu0 %v1001_v0 }
  0xca   :  { %v76_v5 = vpop.f32.mrf.mxu0 }
  0xcb   :  { %v77_v6 = vadd.f32 %v1061_v4, %v76_v5 }
  0xcc   :  { %v854_v7 = vpop.f32.mrf.mxu0 }
  0xcd   :  { %93 = vrot.lane.b32.xlu0 %v77_v6, %s1004_s17  ;;  %v85_v11 = vadd.f32 %v82_v10, %v77_v6 }
  0xce   :  { %v79_v8 = vpop.f32.mrf.mxu0 }
  0xcf   :  { %v780_v12 = vmul.f32 -1.442695, %v85_v11  ;;  %v789_v8 = vld [vmem:[%s1334_s0 + $0x30] sm:$0xff] }
  0xd0   :  { %v855_v9 = vpop.f32.mrf.mxu0 }
  0xd1   :  { %103 = vrot.lane.b32.xlu0 %v77_v6, %s1005_s18  ;;  %921 = vpow2.f32 %v780_v12 }
  0xde   :  { %v922_v13 = vpop.eup %921 }
  0xdf   :  { %v89_v14 = vadd.f32 1.0, %v922_v13  ;;  %v790_v13 = vld [vmem:[%s1334_s0 + $0x38] sm:$0xff] }
  0xe1   :  { %923 = vrcp.f32 %v89_v14 }
  0xee   :  { %v924_v20 = vpop.eup %923 }
 0x13f   :  { %v94_v16 = vpop.permute.xlu0 %93 }
 0x140   :  { %v96_v17 = vadd.f32 %v94_v16, %v83_v15 }
 0x142   :  { %v781_v18 = vmul.f32 -1.442695, %v96_v17 }
 0x143   :  { %v104_v19 = vpop.permute.xlu0 %103 }
 0x144   :  { %925 = vpow2.f32 %v781_v18  ;;  %v106_v21 = vmul.f32 %v924_v20, %v104_v19  ;;  %v791_v20 = vld [vmem:[%s1334_s0 + $0x40] sm:$0xff] }
 0x146   :  { %v107_v25 = vadd.f32 %v106_v21, %v84_v22 }
 0x151   :  { %v926_v23 = vpop.eup %925 }
 0x152   :  { %v100_v24 = vadd.f32 1.0, %v926_v23 }
 0x154   :  { %927 = vrcp.f32 %v100_v24 }
 0x155   :  { %929 = vtanh.f32 %v107_v25 }
 0x161   :  { %v928_v26 = vpop.eup %927 }
 0x162   :  { %v109_v27 = vsub.f32 1.0, %v928_v26  ;;  %v930_v28 = vpop.eup %929  ;;  %v111_v30 = vmul.f32 0.0, %v928_v26 }
 0x164   :  { %v110_v29 = vmul.f32 %v930_v28, %v109_v27 }
 0x166   :  { %v1075_v31 = vadd.f32 %v111_v30, %v110_v29 }
 0x168   :  { %114 = vst.msk [vmem:[#allocation2] sm:$0xff] %vm113_vm1, %v1075_v31  ;;  %v121_v32 = vpack.c.bf16 %v1075_v31, %v1075_v31 }
 0x16a   :  { %861 = vmatmul.mubr.msk.bf16.vlgmr.msra.gmra.mxu1 %vm38_vm2, %v121_v32 }
 0x16b   :  { %873 = vmatpush3.bf16.msra.mxu1 %v1032_v1  ;;  %876 = vmatprep.mubr.msk.bf16.mxu1 %vm1002_vm0, %v1001_v0 }
 0x16c   :  { %874 = vmatprep.subr.bf16.mxu1 %v1001_v0 }
 0x16f   :  { %875 = vmatpush3.bf16.msra.mxu1 %v1043_v2  ;;  %v708_v33 = vld [vmem:[#allocation2] sm:$0xff] }
 0x170   :  { %888 = vmatprep.subr.bf16.mxu1 %v1001_v0  ;;  %716 = vst.msk [vmem:[%s1335_s3] sm:$0xff] %vm113_vm1, %v708_v33 }
 0x22a   :  { %v159_v34 = vpop.f32.mrf.mxu1 }
 0x22b   :  { %v160_v35 = vadd.f32 %v1061_v4, %v159_v34 }
 0x22c   :  { %v862_v36 = vpop.f32.mrf.mxu1 }
 0x22d   :  { %177 = vrot.lane.b32.xlu1 %v160_v35, %s1004_s17  ;;  %v169_v40 = vadd.f32 %v783_v39, %v160_v35 }
 0x22e   :  { %v162_v37 = vpop.f32.mrf.mxu1 }
 0x22f   :  { %v786_v41 = vmul.f32 -1.442695, %v169_v40 }
 0x230   :  { %v863_v38 = vpop.f32.mrf.mxu1 }
 0x231   :  { %187 = vrot.lane.b32.xlu1 %v160_v35, %s1005_s18  ;;  %931 = vpow2.f32 %v786_v41  ;;  %v795_v38 = vld [vmem:[%s1334_s0 + $0x48] sm:$0xff] }
 0x23e   :  { %v932_v42 = vpop.eup %931 }
 0x23f   :  { %v173_v43 = vadd.f32 1.0, %v932_v42 }
 0x241   :  { %933 = vrcp.f32 %v173_v43  ;;  %v796_v43 = vld [vmem:[%s1334_s0 + $0x50] sm:$0xff] }
 0x24e   :  { %v934_v49 = vpop.eup %933 }
 0x29f   :  { %v178_v45 = vpop.permute.xlu1 %177 }
 0x2a0   :  { %v180_v46 = vadd.f32 %v784_v44, %v178_v45 }
 0x2a2   :  { %v787_v47 = vmul.f32 -1.442695, %v180_v46 }
 0x2a3   :  { %v188_v48 = vpop.permute.xlu1 %187 }
 0x2a4   :  { %935 = vpow2.f32 %v787_v47  ;;  %v190_v50 = vmul.f32 %v934_v49, %v188_v48 }
 0x2a6   :  { %v191_v54 = vadd.f32 %v785_v51, %v190_v50  ;;  %v797_v50 = vld [vmem:[%s1334_s0 + $0x58] sm:$0xff] }
 0x2b1   :  { %v936_v52 = vpop.eup %935 }
 0x2b2   :  { %v184_v53 = vadd.f32 1.0, %v936_v52 }
 0x2b4   :  { %937 = vrcp.f32 %v184_v53 }
 0x2b5   :  { %939 = vtanh.f32 %v191_v54 }
 0x2c1   :  { %v938_v55 = vpop.eup %937 }
 0x2c2   :  { %v193_v56 = vsub.f32 1.0, %v938_v55  ;;  %v940_v57 = vpop.eup %939  ;;  %v195_v58 = vmul.f32 %v938_v55, %v1075_v31 }
 0x2c4   :  { %v194_v59 = vmul.f32 %v940_v57, %v193_v56 }
 0x2c6   :  { %v1105_v60 = vadd.f32 %v195_v58, %v194_v59 }
 0x2c8   :  { %198 = vst.msk [vmem:[#allocation2 + $0x8] sm:$0xff] %vm113_vm1, %v1105_v60  ;;  %v205_v61 = vpack.c.bf16 %v1105_v60, %v1105_v60 }
 0x2ca   :  { %869 = vmatmul.mubr.msk.bf16.vlgmr.msra.gmra.mxu0 %vm38_vm2, %v205_v61 }
 0x2cb   :  { %881 = vmatpush3.bf16.msra.mxu0 %v1032_v1  ;;  %884 = vmatprep.mubr.msk.bf16.mxu0 %vm1002_vm0, %v1001_v0 }
 0x2cc   :  { %882 = vmatprep.subr.bf16.mxu0 %v1001_v0 }
 0x2cf   :  { %883 = vmatpush3.bf16.msra.mxu0 %v1043_v2  ;;  %v709_v62 = vld [vmem:[#allocation2 + $0x8] sm:$0xff] }
 0x2d0   :  { %896 = vmatprep.subr.bf16.mxu0 %v1001_v0  ;;  %717 = vst.msk [vmem:[%s1335_s3 + $0x8] sm:$0xff] %vm113_vm1, %v709_v62 }
 0x38a   :  { %v243_v63 = vpop.f32.mrf.mxu0 }
 0x38b   :  { %v244_v3 = vadd.f32 %v1061_v4, %v243_v63 }
 0x38c   :  { %v870_v5 = vpop.f32.mrf.mxu0 }
 0x38d   :  { %271 = vrot.lane.b32.xlu1 %v244_v3, %s1005_s18  ;;  %261 = vrot.lane.b32.xlu0 %v244_v3, %s1004_s17  ;;  %v253_v9 = vadd.f32 %v789_v8, %v244_v3  ;;  %v801_v8 = vld [vmem:[%s1334_s0 + $0x60] sm:$0xff] }
 0x38e   :  { %v246_v6 = vpop.f32.mrf.mxu0 }
 0x38f   :  { %v792_v10 = vmul.f32 -1.442695, %v253_v9 }
 0x390   :  { %v871_v7 = vpop.f32.mrf.mxu0 }
 0x391   :  { %941 = vpow2.f32 %v792_v10 }
 0x39e   :  { %v942_v11 = vpop.eup %941 }
 0x39f   :  { %v257_v12 = vadd.f32 1.0, %v942_v11 }
 0x3a1   :  { %943 = vrcp.f32 %v257_v12 }
 0x3ae   :  { %v944_v18 = vpop.eup %943 }
 0x3ff   :  { %v262_v14 = vpop.permute.xlu0 %261  ;;  %v272_v17 = vpop.permute.xlu1 %271 }
 0x400   :  { %v264_v15 = vadd.f32 %v790_v13, %v262_v14  ;;  %v274_v19 = vmul.f32 %v944_v18, %v272_v17  ;;  %v802_v13 = vld [vmem:[%s1334_s0 + $0x68] sm:$0xff] }
 0x402   :  { %v793_v16 = vmul.f32 -1.442695, %v264_v15  ;;  %v275_v22 = vadd.f32 %v791_v20, %v274_v19  ;;  %v803_v20 = vld [vmem:[%s1334_s0 + $0x70] sm:$0xff] }
 0x404   :  { %945 = vpow2.f32 %v793_v16 }
 0x411   :  { %v946_v21 = vpop.eup %945 }
 0x412   :  { %v268_v23 = vadd.f32 1.0, %v946_v21 }
 0x414   :  { %947 = vrcp.f32 %v268_v23 }
 0x415   :  { %949 = vtanh.f32 %v275_v22 }
 0x421   :  { %v948_v24 = vpop.eup %947 }
 0x422   :  { %v277_v25 = vsub.f32 1.0, %v948_v24  ;;  %v950_v26 = vpop.eup %949  ;;  %v279_v28 = vmul.f32 %v948_v24, %v1105_v60 }
 0x424   :  { %v278_v27 = vmul.f32 %v950_v26, %v277_v25 }
 0x426   :  { %v1135_v29 = vadd.f32 %v279_v28, %v278_v27 }
 0x428   :  { %282 = vst.msk [vmem:[#allocation2 + $0x10] sm:$0xff] %vm113_vm1, %v1135_v29  ;;  %v289_v30 = vpack.c.bf16 %v1135_v29, %v1135_v29 }
 0x42a   :  { %877 = vmatmul.mubr.msk.bf16.vlgmr.msra.gmra.mxu1 %vm38_vm2, %v289_v30 }
 0x42b   :  { %889 = vmatpush3.bf16.msra.mxu1 %v1032_v1  ;;  %892 = vmatprep.mubr.msk.bf16.mxu1 %vm1002_vm0, %v1001_v0 }
 0x42c   :  { %890 = vmatprep.subr.bf16.mxu1 %v1001_v0 }
 0x42f   :  { %891 = vmatpush3.bf16.msra.mxu1 %v1043_v2  ;;  %v710_v32 = vld [vmem:[#allocation2 + $0x10] sm:$0xff] }
 0x430   :  { %904 = vmatprep.subr.bf16.mxu1 %v1001_v0  ;;  %718 = vst.msk [vmem:[%s1335_s3 + $0x10] sm:$0xff] %vm113_vm1, %v710_v32 }
 0x4ea   :  { %v327_v33 = vpop.f32.mrf.mxu1 }
 0x4eb   :  { %v328_v34 = vadd.f32 %v1061_v4, %v327_v33 }
 0x4ec   :  { %v878_v35 = vpop.f32.mrf.mxu1 }
 0x4ed   :  { %355 = vrot.lane.b32.xlu1 %v328_v34, %s1005_s18  ;;  %345 = vrot.lane.b32.xlu0 %v328_v34, %s1004_s17  ;;  %v337_v39 = vadd.f32 %v795_v38, %v328_v34 }
 0x4ee   :  { %v330_v36 = vpop.f32.mrf.mxu1 }
 0x4ef   :  { %v798_v40 = vmul.f32 -1.442695, %v337_v39 }
 0x4f0   :  { %v879_v37 = vpop.f32.mrf.mxu1 }
 0x4f1   :  { %951 = vpow2.f32 %v798_v40 }
 0x4fe   :  { %v952_v41 = vpop.eup %951 }
 0x4ff   :  { %v341_v42 = vadd.f32 1.0, %v952_v41  ;;  %v808_v41 = vld [vmem:[%s1334_s0 + $0x80] sm:$0xff] }
 0x501   :  { %953 = vrcp.f32 %v341_v42 }
 0x50e   :  { %v954_v48 = vpop.eup %953 }
 0x55f   :  { %v346_v44 = vpop.permute.xlu0 %345  ;;  %v356_v47 = vpop.permute.xlu1 %355 }
 0x560   :  { %v348_v45 = vadd.f32 %v796_v43, %v346_v44  ;;  %v358_v49 = vmul.f32 %v954_v48, %v356_v47  ;;  %v809_v48 = vld [vmem:[%s1334_s0 + $0x88] sm:$0xff] }
 0x562   :  { %v799_v46 = vmul.f32 -1.442695, %v348_v45  ;;  %v359_v52 = vadd.f32 %v797_v50, %v358_v49 }
 0x564   :  { %955 = vpow2.f32 %v799_v46 }
 0x571   :  { %v956_v51 = vpop.eup %955 }
 0x572   :  { %v352_v53 = vadd.f32 1.0, %v956_v51 }
 0x574   :  { %957 = vrcp.f32 %v352_v53 }
 0x575   :  { %959 = vtanh.f32 %v359_v52 }
 0x581   :  { %v958_v54 = vpop.eup %957 }
 0x582   :  { %v361_v55 = vsub.f32 1.0, %v958_v54  ;;  %v960_v56 = vpop.eup %959  ;;  %v363_v58 = vmul.f32 %v958_v54, %v1135_v29 }
 0x584   :  { %v362_v57 = vmul.f32 %v960_v56, %v361_v55 }
 0x586   :  { %v1165_v59 = vadd.f32 %v363_v58, %v362_v57 }
 0x588   :  { %366 = vst.msk [vmem:[#allocation2 + $0x18] sm:$0xff] %vm113_vm1, %v1165_v59  ;;  %v373_v61 = vpack.c.bf16 %v1165_v59, %v1165_v59 }
 0x58a   :  { %885 = vmatmul.mubr.msk.bf16.vlgmr.msra.gmra.mxu0 %vm38_vm2, %v373_v61 }
 0x58b   :  { %897 = vmatpush3.bf16.msra.mxu0 %v1032_v1  ;;  %900 = vmatprep.mubr.msk.bf16.mxu0 %vm1002_vm0, %v1001_v0 }
 0x58c   :  { %898 = vmatprep.subr.bf16.mxu0 %v1001_v0 }
 0x58f   :  { %899 = vmatpush3.bf16.msra.mxu0 %v1043_v2  ;;  %v711_v62 = vld [vmem:[#allocation2 + $0x18] sm:$0xff] }
 0x590   :  { %719 = vst.msk [vmem:[%s1335_s3 + $0x18] sm:$0xff] %vm113_vm1, %v711_v62 }
 0x64a   :  { %v411_v63 = vpop.f32.mrf.mxu0 }
 0x64b   :  { %v412_v3 = vadd.f32 %v1061_v4, %v411_v63 }
 0x64c   :  { %v886_v5 = vpop.f32.mrf.mxu0 }
 0x64d   :  { %439 = vrot.lane.b32.xlu1 %v412_v3, %s1005_s18  ;;  %429 = vrot.lane.b32.xlu0 %v412_v3, %s1004_s17  ;;  %v421_v9 = vadd.f32 %v801_v8, %v412_v3 }
 0x64e   :  { %v414_v6 = vpop.f32.mrf.mxu0 }
 0x64f   :  { %v804_v10 = vmul.f32 -1.442695, %v421_v9 }
 0x650   :  { %v887_v7 = vpop.f32.mrf.mxu0 }
 0x651   :  { %961 = vpow2.f32 %v804_v10  ;;  %v813_v7 = vld [vmem:[%s1334_s0 + $0x90] sm:$0xff] }
 0x65e   :  { %v962_v11 = vpop.eup %961 }
 0x65f   :  { %v425_v12 = vadd.f32 1.0, %v962_v11 }
 0x661   :  { %963 = vrcp.f32 %v425_v12  ;;  %v814_v12 = vld [vmem:[%s1334_s0 + $0x98] sm:$0xff] }
 0x66e   :  { %v964_v18 = vpop.eup %963 }
 0x6bf   :  { %v430_v14 = vpop.permute.xlu0 %429  ;;  %v440_v17 = vpop.permute.xlu1 %439 }
 0x6c0   :  { %v432_v15 = vadd.f32 %v802_v13, %v430_v14  ;;  %v442_v19 = vmul.f32 %v964_v18, %v440_v17 }
 0x6c2   :  { %v805_v16 = vmul.f32 -1.442695, %v432_v15  ;;  %v443_v22 = vadd.f32 %v803_v20, %v442_v19  ;;  %v815_v19 = vld [vmem:[%s1334_s0 + $0xa0] sm:$0xff] }
 0x6c4   :  { %965 = vpow2.f32 %v805_v16 }
 0x6d1   :  { %v966_v21 = vpop.eup %965 }
 0x6d2   :  { %v436_v23 = vadd.f32 1.0, %v966_v21 }
 0x6d4   :  { %967 = vrcp.f32 %v436_v23 }
 0x6d5   :  { %969 = vtanh.f32 %v443_v22 }
 0x6e1   :  { %v968_v24 = vpop.eup %967 }
 0x6e2   :  { %v445_v25 = vsub.f32 1.0, %v968_v24  ;;  %v970_v26 = vpop.eup %969  ;;  %v447_v28 = vmul.f32 %v968_v24, %v1165_v59 }
 0x6e4   :  { %v446_v27 = vmul.f32 %v970_v26, %v445_v25 }
 0x6e6   :  { %v1194_v30 = vadd.f32 %v447_v28, %v446_v27 }
 0x6e8   :  { %450 = vst.msk [vmem:[#allocation2 + $0x20] sm:$0xff] %vm113_vm1, %v1194_v30  ;;  %v457_v32 = vpack.c.bf16 %v1194_v30, %v1194_v30 }
 0x6ea   :  { %893 = vmatmul.mubr.msk.bf16.vlgmr.msra.gmra.mxu1 %vm38_vm2, %v457_v32 }
 0x6eb   :  { %905 = vmatpush3.bf16.msra.mxu1 %v1032_v1  ;;  %908 = vmatprep.mubr.msk.bf16.mxu1 %vm1002_vm0, %v1001_v0 }
 0x6ec   :  { %906 = vmatprep.subr.bf16.mxu1 %v1001_v0  ;;  %v807_v0 = vld [vmem:[%s1334_s0 + $0x78] sm:$0xff] }
 0x6ef   :  { %907 = vmatpush3.bf16.msra.mxu1 %v1043_v2  ;;  %v712_v33 = vld [vmem:[#allocation2 + $0x20] sm:$0xff] }
 0x6f0   :  { %720 = vst.msk [vmem:[%s1335_s3 + $0x20] sm:$0xff] %vm113_vm1, %v712_v33 }
 0x7aa   :  { %v495_v34 = vpop.f32.mrf.mxu1 }
 0x7ab   :  { %v496_v35 = vadd.f32 %v1061_v4, %v495_v34 }
 0x7ac   :  { %v894_v36 = vpop.f32.mrf.mxu1 }
 0x7ad   :  { %523 = vrot.lane.b32.xlu1 %v496_v35, %s1005_s18  ;;  %513 = vrot.lane.b32.xlu0 %v496_v35, %s1004_s17  ;;  %v505_v2 = vadd.f32 %v807_v0, %v496_v35 }
 0x7ae   :  { %v498_v1 = vpop.f32.mrf.mxu1 }
 0x7af   :  { %v810_v38 = vmul.f32 -1.442695, %v505_v2 }
 0x7b0   :  { %v895_v37 = vpop.f32.mrf.mxu1 }
 0x7b1   :  { %971 = vpow2.f32 %v810_v38 }
 0x7be   :  { %v972_v39 = vpop.eup %971 }
 0x7bf   :  { %v509_v40 = vadd.f32 1.0, %v972_v39 }
 0x7c1   :  { %973 = vrcp.f32 %v509_v40 }
 0x7ce   :  { %v974_v46 = vpop.eup %973 }
 0x81f   :  { %v514_v42 = vpop.permute.xlu0 %513  ;;  %v524_v45 = vpop.permute.xlu1 %523 }
 0x820   :  { %v516_v43 = vadd.f32 %v808_v41, %v514_v42  ;;  %v526_v47 = vmul.f32 %v974_v46, %v524_v45 }
 0x822   :  { %v811_v44 = vmul.f32 -1.442695, %v516_v43  ;;  %v527_v50 = vadd.f32 %v809_v48, %v526_v47 }
 0x824   :  { %975 = vpow2.f32 %v811_v44 }
 0x831   :  { %v976_v49 = vpop.eup %975 }
 0x832   :  { %v520_v51 = vadd.f32 1.0, %v976_v49  ;;  %v821_v49 = vld [vmem:[%s1334_s0 + $0xb8] sm:$0xff] }
 0x834   :  { %977 = vrcp.f32 %v520_v51 }
 0x835   :  { %979 = vtanh.f32 %v527_v50 }
 0x841   :  { %v978_v52 = vpop.eup %977 }
 0x842   :  { %v529_v53 = vsub.f32 1.0, %v978_v52  ;;  %v980_v54 = vpop.eup %979  ;;  %v531_v56 = vmul.f32 %v978_v52, %v1194_v30 }
 0x844   :  { %v530_v55 = vmul.f32 %v980_v54, %v529_v53 }
 0x846   :  { %v532_v57 = vadd.f32 %v531_v56, %v530_v55 }
 0x848   :  { %534 = vst.msk [vmem:[#allocation2 + $0x28] sm:$0xff] %vm113_vm1, %v532_v57  ;;  %v541_v58 = vpack.c.bf16 %v532_v57, %v532_v57 }
 0x84a   :  { %901 = vmatmul.mubr.msk.bf16.vlgmr.msra.gmra.mxu0 %vm38_vm2, %v541_v58 }
 0x84f   :  { %v713_v61 = vld [vmem:[#allocation2 + $0x28] sm:$0xff] }
 0x850   :  { %721 = vst.msk [vmem:[%s1335_s3 + $0x28] sm:$0xff] %vm113_vm1, %v713_v61 }
 0x90a   :  { %v579_v62 = vpop.f32.mrf.mxu0 }
 0x90b   :  { %v580_v63 = vadd.f32 %v1061_v4, %v579_v62 }
 0x90c   :  { %v902_v3 = vpop.f32.mrf.mxu0 }
 0x90d   :  { %607 = vrot.lane.b32.xlu1 %v580_v63, %s1005_s18  ;;  %597 = vrot.lane.b32.xlu0 %v580_v63, %s1004_s17  ;;  %v589_v8 = vadd.f32 %v813_v7, %v580_v63 }
 0x90e   :  { %v582_v5 = vpop.f32.mrf.mxu0 }
 0x90f   :  { %v816_v9 = vmul.f32 -1.442695, %v589_v8 }
 0x910   :  { %v903_v6 = vpop.f32.mrf.mxu0 }
 0x911   :  { %981 = vpow2.f32 %v816_v9 }
 0x91e   :  { %v982_v10 = vpop.eup %981 }
 0x91f   :  { %v593_v11 = vadd.f32 1.0, %v982_v10 }
 0x921   :  { %983 = vrcp.f32 %v593_v11 }
 0x92e   :  { %v984_v17 = vpop.eup %983 }
 0x97f   :  { %v598_v13 = vpop.permute.xlu0 %597  ;;  %v608_v16 = vpop.permute.xlu1 %607 }
 0x980   :  { %v600_v14 = vadd.f32 %v814_v12, %v598_v13  ;;  %v610_v18 = vmul.f32 %v984_v17, %v608_v16 }
 0x982   :  { %v817_v15 = vmul.f32 -1.442695, %v600_v14  ;;  %v611_v21 = vadd.f32 %v815_v19, %v610_v18 }
 0x984   :  { %985 = vpow2.f32 %v817_v15 }
 0x991   :  { %v986_v20 = vpop.eup %985 }
 0x992   :  { %v604_v22 = vadd.f32 1.0, %v986_v20 }
 0x994   :  { %987 = vrcp.f32 %v604_v22 }
 0x995   :  { %989 = vtanh.f32 %v611_v21 }
 0x9a1   :  { %v988_v23 = vpop.eup %987 }
 0x9a2   :  { %v613_v24 = vsub.f32 1.0, %v988_v23  ;;  %v990_v25 = vpop.eup %989  ;;  %v615_v27 = vmul.f32 %v988_v23, %v532_v57 }
 0x9a4   :  { %v614_v26 = vmul.f32 %v990_v25, %v613_v24 }
 0x9a6   :  { %v1241_v28 = vadd.f32 %v615_v27, %v614_v26 }
 0x9a8   :  { %618 = vst.msk [vmem:[#allocation2 + $0x30] sm:$0xff] %vm113_vm1, %v1241_v28  ;;  %v625_v32 = vpack.c.bf16 %v1241_v28, %v1241_v28 }
 0x9aa   :  { %909 = vmatmul.mubr.msk.bf16.vlgmr.msra.gmra.mxu1 %vm38_vm2, %v625_v32 }
 0x9af   :  { %v714_v33 = vld [vmem:[#allocation2 + $0x30] sm:$0xff] }
 0x9b0   :  { %722 = vst.msk [vmem:[%s1335_s3 + $0x30] sm:$0xff] %vm113_vm1, %v714_v33 }
 0xa6a   :  { %v663_v34 = vpop.f32.mrf.mxu1 }
 0xa6b   :  { %v664_v35 = vadd.f32 %v1061_v4, %v663_v34  ;;  %v819_v4 = vld [vmem:[%s1334_s0 + $0xa8] sm:$0xff] }
 0xa6c   :  { %v910_v36 = vpop.f32.mrf.mxu1 }
 0xa6d   :  { %691 = vrot.lane.b32.xlu1 %v664_v35, %s1005_s18  ;;  %681 = vrot.lane.b32.xlu0 %v664_v35, %s1004_s17 }
 0xa6e   :  { %v666_v1 = vpop.f32.mrf.mxu1 }
 0xa70   :  { %v911_v37 = vpop.f32.mrf.mxu1 }
 0xa71   :  { %200 = vrot.lane.b32.xlu1 %v1105_v60, %s1006_s2  ;;  %116 = vrot.lane.b32.xlu0 %v1075_v31, %s1006_s2  ;;  %v673_v60 = vadd.f32 %v819_v4, %v664_v35 }
 0xa73   :  { %v822_v31 = vmul.f32 -1.442695, %v673_v60 }
 0xa75   :  { %368 = vrot.lane.b32.xlu1 %v1165_v59, %s1006_s2  ;;  %284 = vrot.lane.b32.xlu0 %v1135_v29, %s1006_s2  ;;  %991 = vpow2.f32 %v822_v31  ;;  %v820_v29 = vld [vmem:[%s1334_s0 + $0xb0] sm:$0xff] }
 0xa79   :  { %536 = vrot.lane.b32.xlu1 %v532_v57, %s1006_s2  ;;  %452 = vrot.lane.b32.xlu0 %v1194_v30, %s1006_s2 }
 0xa7d   :  { %620 = vrot.lane.b32.xlu0 %v1241_v28, %s1006_s2 }
 0xa82   :  { %v992_v0 = vpop.eup %991 }
 0xa83   :  { %v677_v59 = vadd.f32 1.0, %v992_v0 }
 0xa85   :  { %993 = vrcp.f32 %v677_v59 }
 0xa92   :  { %v994_v46 = vpop.eup %993 }
 0xadf   :  { %v692_v2 = vpop.permute.xlu1 %691  ;;  %v682_v38 = vpop.permute.xlu0 %681 }
 0xae0   :  { %v684_v39 = vadd.f32 %v820_v29, %v682_v38  ;;  %v694_v47 = vmul.f32 %v994_v46, %v692_v2 }
 0xae2   :  { %v823_v30 = vmul.f32 -1.442695, %v684_v39  ;;  %v695_v51 = vadd.f32 %v821_v49, %v694_v47 }
 0xae3   :  { %v201_v40 = vpop.permute.xlu1 %200  ;;  %v117_v41 = vpop.permute.xlu0 %116 }
 0xae4   :  { %204 = vst.msk [vmem:[#allocation3 + $0x30] sm:$0xff] %vm113_vm1, %v201_v40  ;;  %120 = vst.msk [vmem:[#allocation3 + $0x38] sm:$0xff] %vm113_vm1, %v117_v41  ;;  %995 = vpow2.f32 %v823_v30 }
 0xae7   :  { %v369_v42 = vpop.permute.xlu1 %368  ;;  %v285_v43 = vpop.permute.xlu0 %284 }
 0xae8   :  { %372 = vst.msk [vmem:[#allocation3 + $0x20] sm:$0xff] %vm113_vm1, %v369_v42  ;;  %288 = vst.msk [vmem:[#allocation3 + $0x28] sm:$0xff] %vm113_vm1, %v285_v43 }
 0xaeb   :  { %v537_v44 = vpop.permute.xlu1 %536  ;;  %v453_v45 = vpop.permute.xlu0 %452  ;;  %v731_v7 = vld [vmem:[#allocation3 + $0x38] sm:$0xff]  ;;  %v730_v15 = vld [vmem:[#allocation3 + $0x30] sm:$0xff] }
 0xaec   :  { %540 = vst.msk [vmem:[#allocation3 + $0x10] sm:$0xff] %vm113_vm1, %v537_v44  ;;  %456 = vst.msk [vmem:[#allocation3 + $0x18] sm:$0xff] %vm113_vm1, %v453_v45 }
 0xaef   :  { %v621_v48 = vpop.permute.xlu0 %620  ;;  %v728_v54 = vld [vmem:[#allocation3 + $0x20] sm:$0xff]  ;;  %v729_v6 = vld [vmem:[#allocation3 + $0x28] sm:$0xff] }
 0xaf0   :  { %624 = vst.msk [vmem:[#allocation3 + $0x8] sm:$0xff] %vm113_vm1, %v621_v48 }
 0xaf1   :  { %v996_v50 = vpop.eup %995 }
 0xaf2   :  { %v688_v52 = vadd.f32 1.0, %v996_v50 }
 0xaf3   :  { %v726_v53 = vld [vmem:[#allocation3 + $0x10] sm:$0xff]  ;;  %v727_v3 = vld [vmem:[#allocation3 + $0x18] sm:$0xff] }
 0xaf4   :  { %744 = vrot.lane.b32.xlu0 %v726_v53, %s1007_s25  ;;  %997 = vrcp.f32 %v688_v52 }
 0xaf5   :  { %999 = vtanh.f32 %v695_v51 }
 0xaf7   :  { %v725_v63 = vld [vmem:[#allocation3 + $0x8] sm:$0xff] }
 0xaf8   :  { %748 = vrot.lane.b32.xlu0 %v728_v54, %s1007_s25 }
 0xb01   :  { %v998_v55 = vpop.eup %997 }
 0xb02   :  { %v697_v56 = vsub.f32 1.0, %v998_v55  ;;  %v1000_v57 = vpop.eup %999  ;;  %v699_v61 = vmul.f32 %v998_v55, %v1241_v28 }
 0xb04   :  { %v698_v58 = vmul.f32 %v1000_v57, %v697_v56 }
 0xb06   :  { %v700_v62 = vadd.f32 %v699_v61, %v698_v58 }
 0xb08   :  { %704 = vrot.lane.b32.xlu1 %v700_v62, %s1006_s2  ;;  %702 = vst.msk [vmem:[#allocation2 + $0x38] sm:$0xff] %vm113_vm1, %v700_v62 }
 0xb0c   :  { %742 = vrot.lane.b32.xlu1 %v725_v63, %s1007_s25 }
 0xb0f   :  { %v715_v5 = vld [vmem:[#allocation2 + $0x38] sm:$0xff] }
 0xb10   :  { %746 = vrot.lane.b32.xlu1 %v727_v3, %s1007_s25  ;;  %723 = vst.msk [vmem:[%s1335_s3 + $0x38] sm:$0xff] %vm113_vm1, %v715_v5 }
 0xb14   :  { %750 = vrot.lane.b32.xlu1 %v729_v6, %s1007_s25 }
 0xb18   :  { %754 = vrot.lane.b32.xlu1 %v731_v7, %s1007_s25 }
 0xb66   :  { %v745_v8 = vpop.permute.xlu0 %744 }
 0xb67   :  { %767 = vst.msk [vmem:[%s1335_s3 + $0x10] sm:$0xff] %vm764_vm3, %v745_v8 }
 0xb6a   :  { %v749_v9 = vpop.permute.xlu0 %748 }
 0xb6b   :  { %769 = vst.msk [vmem:[%s1335_s3 + $0x20] sm:$0xff] %vm764_vm3, %v749_v9 }
 0xb7a   :  { %v705_v10 = vpop.permute.xlu1 %704 }
 0xb7b   :  { %707 = vst.msk [vmem:[#allocation3] sm:$0xff] %vm113_vm1, %v705_v10 }
 0xb7e   :  { %v743_v11 = vpop.permute.xlu1 %742 }
 0xb7f   :  { %766 = vst.msk [vmem:[%s1335_s3 + $0x8] sm:$0xff] %vm764_vm3, %v743_v11 }
 0xb82   :  { %v747_v12 = vpop.permute.xlu1 %746  ;;  %v724_v13 = vld [vmem:[#allocation3] sm:$0xff] }
 0xb83   :  { %768 = vst.msk [vmem:[%s1335_s3 + $0x18] sm:$0xff] %vm764_vm3, %v747_v12  ;;  %740 = vrot.lane.b32.xlu0 %v724_v13, %s1007_s25 }
 0xb86   :  { %v751_v14 = vpop.permute.xlu1 %750 }
 0xb87   :  { %770 = vst.msk [vmem:[%s1335_s3 + $0x28] sm:$0xff] %vm764_vm3, %v751_v14  ;;  %752 = vrot.lane.b32.xlu0 %v730_v15, %s1007_s25 }
 0xb8a   :  { %v755_v16 = vpop.permute.xlu1 %754 }
 0xb8b   :  { %772 = vst.msk [vmem:[%s1335_s3 + $0x38] sm:$0xff] %vm764_vm3, %v755_v16 }
 0xbf5   :  { %v741_v17 = vpop.permute.xlu0 %740 }
 0xbf6   :  { %765 = vst.msk [vmem:[%s1335_s3] sm:$0xff] %vm764_vm3, %v741_v17 }
 0xbf9   :  { %v753_v18 = vpop.permute.xlu0 %752 }
 0xbfa   :  { %771 = vst.msk [vmem:[%s1335_s3 + $0x30] sm:$0xff] %vm764_vm3, %v753_v18 }

// kernel: han_forward.13
= control target key start
LH: loop header
LB: loop body
LE: loop exit
PB: predicated region body
PF: predicated region fallthrough
CT: control target
= control target key end

     0   :  { %v143_v1 = vmov 0.0   ;;  %vm144_vm0 = vmmov 0   ;;  %s181_s0 = inlined_call_operand.vmem [shape: f32[2,32], index: 0, kind: input, shape index: {}]   ;;  %s182_s1 = inlined_call_operand.vmem [shape: bf16[32,5], index: 1, kind: input, shape index: {}]   ;;  %s183_s2 = inlined_call_operand.vmem [shape: f32[1,5], index: 2, kind: input, shape index: {}]   ;;  %s184_s3 = inlined_call_operand.hbm [shape: f32[2,5], index: 3, kind: output, shape index: {}]  }
   0x1   :  { %v119_v0 = vld [vmem:[%s182_s1 + $0x8] sm:$0xff]   ;;  %108 = vmatprep.subr.bf16.mxu0 %v143_v1  ;;  %v120_v2 = vld [vmem:[%s182_s1] sm:$0xff]   ;;  %112 = vmatprep.mubr.msk.bf16.mxu0 %vm144_vm0, %v143_v1 }
   0x2   :  { %109 = vmatpush3.bf16.msra.mxu0 %v119_v0  ;;  %v16_v3 = vld [vmem:[%s181_s0] sm:$0x3] }
   0x3   :  { %110 = vmatprep.subr.bf16.mxu0 %v143_v1 }
   0x4   :  { %8 = vsyncpa [#allocation3], 0  ;;  %v17_v4 = vpack.c.bf16 %v16_v3, %v16_v3  ;;  %vm41_vm1 = vcmask 261120   ;;  %v101_v5 = vld [vmem:[%s183_s2] ss:$0 sm:$0xff]  ;;  %s145_s20 = smov [#allocation2]  }
   0x5   :  { %s93_s21 = sshll.u32 %s145_s20, 4  ;;  %vm85_vm2 = vcmask 33792   ;;  %s94_s21 = int_to_ptr.vmem [resolvable:$true] %s93_s21 }
   0x6   :  { %111 = vmatpush3.bf16.msra.mxu0 %v120_v2  ;;  %s121_s0 = scalar_lea.vmem %s94_s21, 32  ;;  %p126_p1 = scmp.lt.s32.totalorder %s94_s21, %s94_s21 }
   0x7   :  { %p122_p0 = scmp.ne.s32.totalorder %s94_s21, %s121_s0  ;;  %p127_p2 = scmp.lt.s32.totalorder %s121_s0, %s121_s0 }
   0x9   :  { %113 = vmatmul.mubr.msk.bf16.vlgmr.msra.gmra.mxu0 %vm41_vm1, %v17_v4  ;;  %p128_p3 = por %p127_p2, %p126_p1 }
   0xb   :  { %p129_p4 = pnand %p128_p3, %p122_p0 }
  0xc9   :  { %v79_v6 = vpop.f32.mrf.mxu0 }
  0xca   :  { %v80_v7 = vadd.f32 %v101_v5, %v79_v6 }
  0xcb   :  { %v114_v8 = vpop.f32.mrf.mxu0 }
  0xcc   :  { %86 = vst.msk [vmem:[#allocation2] sm:$0x3] %vm85_vm2, %v80_v7 }
  0xcd   :  { %v82_v9 = vpop.f32.mrf.mxu0 }
  0xce   :  { %132 = shalt.err (!%p129_p4)
}
  0xcf   :  { %96 = dma.vmem_to_hbm [thread:$0]  %s94_s21, 32, %s184_s3, [#allocation3]   ;;  %v115_v10 = vpop.f32.mrf.mxu0 }
  0xd0   :  { %141 = dma.done.wait [#allocation3], 32  }
  0xd1   :  { %142 = vsyncadd [#allocation3], 4294967264 }
  0xd2   :  { %100 = vsyncpa [#allocation3], 1 }

// kernel: han_forward.12
= control target key start
LH: loop header
LB: loop body
LE: loop exit
PB: predicated region body
PF: predicated region fallthrough
CT: control target
= control target key end

     0   :  { %v31_v0 = vlaneseq  ;;  %v236_v1 = vmov 0.0   ;;  %vm237_vm0 = vmmov 0   ;;  %v238_v3 = vmov 1983009808   ;;  %s311_s1 = inlined_call_operand.vmem [shape: bf16[32,32], index: 1, kind: input, shape index: {}]   ;;  %s312_s0 = inlined_call_operand.vmem [shape: f32[4,2,32], index: 0, kind: input, shape index: {}]   ;;  %s313_s2 = inlined_call_operand.vmem [shape: f32[1,32], index: 2, kind: input, shape index: {}]   ;;  %s314_s3 = inlined_call_operand.vmem [shape: f32[1,32], index: 3, kind: input, shape index: {}]   ;;  %s315_s4 = inlined_call_operand.vmem [shape: f32[2,32], index: 4, kind: output, shape index: {}]  }
   0x1   :  { %207 = vmatprep.subr.bf16.mxu0 %v236_v1  ;;  %v222_v2 = vld [vmem:[%s311_s1 + $0x8] sm:$0xff]   ;;  %211 = vmatprep.mubr.msk.bf16.mxu0 %vm237_vm0, %v236_v1  ;;  %v29_v4 = vunpack.c.l.s4 %v238_v3  ;;  %v223_v5 = vld [vmem:[%s311_s1] sm:$0xff]   ;;  %vm68_vm1 = vcmask 261120   ;;  %v239_v29 = vmov 269488144   ;;  %vm172_vm2 = vcmask 1041408  }
   0x2   :  { %v32_v6 = vshrl.u32 %v31_v0, 7  ;;  %208 = vmatpush3.bf16.msra.mxu0 %v222_v2  ;;  %v277_v7 = vld [vmem:[%s312_s0] sm:$0x3]  ;;  %v282_v8 = vld [vmem:[%s312_s0 + $0x2] sm:$0x3]  ;;  %v126_v30 = vunpack.c.l.s4 %v239_v29  ;;  %vm184_vm3 = vcmask 254976  }
   0x3   :  { %v287_v9 = vld [vmem:[%s312_s0 + $0x4] sm:$0x3]  ;;  %v30_v10 = vunpack.c.0.s8 %v29_v4  ;;  %209 = vmatprep.subr.bf16.mxu0 %v236_v1  ;;  %v292_v11 = vld [vmem:[%s312_s0 + $0x6] sm:$0x3]  ;;  %v26_v12 = vcombine.low %v277_v7, %v282_v8  ;;  %v199_v19 = vld [vmem:[%s313_s2] ss:$0 sm:$0xff] }
   0x4   :  { %v27_v13 = vcombine.low %v287_v9, %v292_v11  ;;  %v203_v25 = vld [vmem:[%s314_s3] ss:$0 sm:$0xff]  ;;  %v240_v31 = vmov 842150450   ;;  %v241_v33 = vmov 1414812756   ;;  %v127_v37 = vunpack.c.0.s8 %v126_v30 }
   0x5   :  { %v33_v14 = vsub.s32 %v30_v10, %v32_v6  ;;  %v133_v32 = vunpack.c.l.s4 %v240_v31  ;;  %v140_v34 = vunpack.c.l.s4 %v241_v33  ;;  %v242_v35 = vmov 1987475062  }
   0x6   :  { %210 = vmatpush3.bf16.msra.mxu0 %v223_v5  ;;  %v147_v36 = vunpack.c.l.s4 %v242_v35  ;;  %v130_v41 = vsub.s32 %v127_v37, %v32_v6 }
   0x7   :  { %v34_v15 = vrot.slane %v26_v12, %v33_v14  ;;  %v41_v16 = vrot.slane %v27_v13, %v33_v14  ;;  %v134_v38 = vunpack.c.0.s8 %v133_v32  ;;  %v141_v39 = vunpack.c.0.s8 %v140_v34 }
   0x8   :  { %v148_v40 = vunpack.c.0.s8 %v147_v36 }
   0x9   :  { %v42_v17 = vcombine.low %v34_v15, %v41_v16  ;;  %v137_v42 = vsub.s32 %v134_v38, %v32_v6  ;;  %v144_v43 = vsub.s32 %v141_v39, %v32_v6 }
   0xa   :  { %v151_v44 = vsub.s32 %v148_v40, %v32_v6 }
   0xb   :  { %v44_v18 = vpack.c.bf16 %v42_v17, %v42_v17 }
   0xd   :  { %212 = vmatmul.mubr.msk.bf16.vlgmr.msra.gmra.mxu0 %vm68_vm1, %v44_v18 }
  0xcd   :  { %v106_v20 = vpop.f32.mrf.mxu0 }
  0xce   :  { %v107_v21 = vadd.f32 %v199_v19, %v106_v20 }
  0xcf   :  { %v213_v22 = vpop.f32.mrf.mxu0 }
  0xd0   :  { %224 = vtanh.f32 %v107_v21 }
  0xd1   :  { %v109_v23 = vpop.f32.mrf.mxu0 }
  0xd3   :  { %v214_v24 = vpop.f32.mrf.mxu0 }
  0xdd   :  { %v225_v26 = vpop.eup %224 }
  0xde   :  { %v120_v27 = vmul.f32 %v225_v26, %v203_v25 }
  0xe0   :  { %v121_v28 = vsel %vm68_vm1, %v120_v27, 0.0 }
  0xe1   :  { %122 = vadd.xlane.f32.xlu0 %v121_v28 }
 0x16a   :  { %v123_v45 = vpop.xlane.xlu0 %122 }
 0x16b   :  { %v131_v46 = vrot.slane %v123_v45, %v130_v41  ;;  %v138_v47 = vrot.slane %v123_v45, %v137_v42  ;;  %v145_v48 = vrot.slane %v123_v45, %v144_v43  ;;  %v152_v49 = vrot.slane %v123_v45, %v151_v44 }
 0x16d   :  { %v157_v50 = vmax.f32 %v131_v46, %v138_v47  ;;  %v158_v51 = vmax.f32 %v145_v48, %v152_v49 }
 0x16f   :  { %v159_v52 = vmax.f32 %v157_v50, %v158_v51 }
 0x171   :  { %v160_v53 = vsub.f32 %v131_v46, %v159_v52  ;;  %v161_v54 = vsub.f32 %v138_v47, %v159_v52  ;;  %v162_v55 = vsub.f32 %v145_v48, %v159_v52  ;;  %v163_v56 = vsub.f32 %v152_v49, %v159_v52 }
 0x173   :  { %v164_v57 = vmul.f32 1.442695, %v160_v53  ;;  %v166_v58 = vmul.f32 1.442695, %v161_v54  ;;  %v168_v59 = vmul.f32 1.442695, %v162_v55 }
 0x174   :  { %v170_v60 = vmul.f32 1.442695, %v163_v56 }
 0x175   :  { %226 = vpow2.f32 %v164_v57 }
 0x176   :  { %228 = vpow2.f32 %v166_v58 }
 0x177   :  { %230 = vpow2.f32 %v168_v59 }
 0x178   :  { %232 = vpow2.f32 %v170_v60 }
 0x182   :  { %v227_v61 = vpop.eup %226 }
 0x183   :  { %v229_v62 = vpop.eup %228  ;;  %v173_v63 = vsel %vm172_vm2, %v227_v61, 0.0  ;;  %v180_v10 = vmul.f32 %v227_v61, %v277_v7 }
 0x184   :  { %v231_v0 = vpop.eup %230  ;;  %v174_v1 = vsel %vm172_vm2, %v229_v62, 0.0  ;;  %v181_v12 = vmul.f32 %v229_v62, %v282_v8 }
 0x185   :  { %v233_v2 = vpop.eup %232  ;;  %v175_v3 = vadd.f32 %v174_v1, %v173_v63  ;;  %v176_v4 = vsel %vm172_vm2, %v231_v0, 0.0  ;;  %v185_v14 = vsel %vm184_vm3, %v180_v10, 0.0  ;;  %v182_v16 = vmul.f32 %v231_v0, %v287_v9 }
 0x186   :  { %v178_v6 = vsel %vm172_vm2, %v233_v2, 0.0  ;;  %v186_v15 = vsel %vm184_vm3, %v181_v12, 0.0  ;;  %v183_v18 = vmul.f32 %v233_v2, %v292_v11 }
 0x187   :  { %v177_v5 = vadd.f32 %v176_v4, %v175_v3  ;;  %v187_v17 = vadd.f32 %v186_v15, %v185_v14  ;;  %v188_v19 = vsel %vm184_vm3, %v182_v16, 0.0 }
 0x188   :  { %v190_v21 = vsel %vm184_vm3, %v183_v18, 0.0 }
 0x189   :  { %v179_v13 = vadd.f32 %v178_v6, %v177_v5  ;;  %v189_v20 = vadd.f32 %v188_v19, %v187_v17 }
 0x18b   :  { %234 = vrcp.f32 %v179_v13  ;;  %v191_v22 = vadd.f32 %v190_v21, %v189_v20 }
 0x198   :  { %v235_v23 = vpop.eup %234 }
 0x199   :  { %v193_v24 = vmul.f32 %v235_v23, %v191_v22 }
 0x19b   :  { %194 = vst.msk [vmem:[%s315_s4] sm:$0x3] %vm184_vm3, %v193_v24 }

// kernel: han_forward.11
= control target key start
LH: loop header
LB: loop body
LE: loop exit
PB: predicated region body
PF: predicated region fallthrough
CT: control target
= control target key end

     0   :  { %v525_v0 = vmov 0.0   ;;  %vm526_vm0 = vmmov 0   ;;  %v527_v3 = vmov 0   ;;  %s528_s17 = smov 96   ;;  %s529_s18 = smov 64   ;;  %vm113_vm1 = vcmask 123904   ;;  %s683_s1 = inlined_call_operand.vmem [shape: bf16[32,96], index: 1, kind: input, shape index: {}]   ;;  %s684_s2 = inlined_call_operand.vmem [shape: f32[1,96], index: 2, kind: input, shape index: {}]   ;;  %s685_s0 = inlined_call_operand.vmem [shape: f32[4,3,2,32], index: 0, kind: input, shape index: {}]   ;;  %s686_s3 = inlined_call_operand.vmem [shape: f32[4,2,32], index: 3, kind: output, shape index: {}]  }
   0x1   :  { %444 = vmatprep.subr.bf16.mxu0 %v525_v0  ;;  %v556_v1 = vld [vmem:[%s683_s1 + $0x8] sm:$0xff]   ;;  %448 = vmatprep.mubr.msk.bf16.mxu0 %vm526_vm0, %v525_v0  ;;  %v484_v2 = vld [vmem:[%s683_s1] sm:$0xff]   ;;  %vm38_vm2 = vcmask 261120   ;;  %s530_s15 = smov 112   ;;  %vm400_vm3 = vcmask 255104  }
   0x2   :  { %452 = vmatprep.subr.bf16.mxu1 %v525_v0  ;;  %456 = vmatprep.mubr.msk.bf16.mxu1 %vm526_vm0, %v525_v0  ;;  %v579_v4 = vld [vmem:[%s684_s2] ss:$0 sm:$0xff]  ;;  %v83_v15 = vld [vmem:[%s685_s0 + $0x2] sm:$0x3]  ;;  %v84_v22 = vld [vmem:[%s685_s0 + $0x4] sm:$0x3] }
   0x3   :  { %445 = vmatpush3.bf16.msra.mxu0 %v556_v1  ;;  %453 = vmatpush3.bf16.msra.mxu1 %v556_v1  ;;  %v82_v10 = vld [vmem:[%s685_s0] sm:$0x3]  ;;  %v415_v39 = vld [vmem:[%s685_s0 + $0x6] sm:$0x3]  ;;  %v416_v44 = vld [vmem:[%s685_s0 + $0x8] sm:$0x3] }
   0x4   :  { %446 = vmatprep.subr.bf16.mxu0 %v525_v0  ;;  %454 = vmatprep.subr.bf16.mxu1 %v525_v0  ;;  %v417_v51 = vld [vmem:[%s685_s0 + $0xa] sm:$0x3]  ;;  %s531_s2 = smov 16  }
   0x7   :  { %447 = vmatpush3.bf16.msra.mxu0 %v484_v2  ;;  %455 = vmatpush3.bf16.msra.mxu1 %v484_v2 }
   0x8   :  { %460 = vmatprep.subr.bf16.mxu0 %v525_v0  ;;  %468 = vmatprep.subr.bf16.mxu1 %v525_v0 }
   0xa   :  { %449 = vmatmul.mubr.bf16.vlgmr.msra.gmra.mxu0 %v527_v3 }
   0xb   :  { %461 = vmatpush3.bf16.msra.mxu0 %v556_v1  ;;  %464 = vmatprep.mubr.msk.bf16.mxu0 %vm526_vm0, %v525_v0 }
   0xc   :  { %462 = vmatprep.subr.bf16.mxu0 %v525_v0 }
   0xf   :  { %463 = vmatpush3.bf16.msra.mxu0 %v484_v2 }
  0xca   :  { %v76_v5 = vpop.f32.mrf.mxu0 }
  0xcb   :  { %v77_v6 = vadd.f32 %v579_v4, %v76_v5  ;;  %v421_v5 = vld [vmem:[%s685_s0 + $0xc] sm:$0x3] }
  0xcc   :  { %v450_v7 = vpop.f32.mrf.mxu0 }
  0xcd   :  { %93 = vrot.lane.b32.xlu0 %v77_v6, %s528_s17  ;;  %v85_v11 = vadd.f32 %v82_v10, %v77_v6  ;;  %v422_v10 = vld [vmem:[%s685_s0 + $0xe] sm:$0x3] }
  0xce   :  { %v79_v8 = vpop.f32.mrf.mxu0 }
  0xcf   :  { %v412_v12 = vmul.f32 -1.442695, %v85_v11 }
  0xd0   :  { %v451_v9 = vpop.f32.mrf.mxu0 }
  0xd1   :  { %103 = vrot.lane.b32.xlu0 %v77_v6, %s529_s18  ;;  %485 = vpow2.f32 %v412_v12 }
  0xde   :  { %v486_v13 = vpop.eup %485 }
  0xdf   :  { %v89_v14 = vadd.f32 1.0, %v486_v13 }
  0xe1   :  { %487 = vrcp.f32 %v89_v14 }
  0xee   :  { %v488_v20 = vpop.eup %487 }
 0x13f   :  { %v94_v16 = vpop.permute.xlu0 %93 }
 0x140   :  { %v96_v17 = vadd.f32 %v94_v16, %v83_v15 }
 0x142   :  { %v413_v18 = vmul.f32 -1.442695, %v96_v17  ;;  %v423_v17 = vld [vmem:[%s685_s0 + $0x10] sm:$0x3] }
 0x143   :  { %v104_v19 = vpop.permute.xlu0 %103 }
 0x144   :  { %489 = vpow2.f32 %v413_v18  ;;  %v106_v21 = vmul.f32 %v488_v20, %v104_v19 }
 0x146   :  { %v107_v25 = vadd.f32 %v106_v21, %v84_v22 }
 0x151   :  { %v490_v23 = vpop.eup %489 }
 0x152   :  { %v100_v24 = vadd.f32 1.0, %v490_v23 }
 0x154   :  { %491 = vrcp.f32 %v100_v24 }
 0x155   :  { %493 = vtanh.f32 %v107_v25 }
 0x161   :  { %v492_v26 = vpop.eup %491 }
 0x162   :  { %v109_v27 = vsub.f32 1.0, %v492_v26  ;;  %v494_v28 = vpop.eup %493  ;;  %v111_v30 = vmul.f32 0.0, %v492_v26 }
 0x164   :  { %v110_v29 = vmul.f32 %v494_v28, %v109_v27 }
 0x166   :  { %v593_v31 = vadd.f32 %v111_v30, %v110_v29 }
 0x168   :  { %114 = vst.msk [vmem:[#allocation2] sm:$0x3] %vm113_vm1, %v593_v31  ;;  %v121_v32 = vpack.c.bf16 %v593_v31, %v593_v31 }
 0x16a   :  { %457 = vmatmul.mubr.msk.bf16.vlgmr.msra.gmra.mxu1 %vm38_vm2, %v121_v32 }
 0x16b   :  { %469 = vmatpush3.bf16.msra.mxu1 %v556_v1  ;;  %472 = vmatprep.mubr.msk.bf16.mxu1 %vm526_vm0, %v525_v0 }
 0x16c   :  { %470 = vmatprep.subr.bf16.mxu1 %v525_v0 }
 0x16f   :  { %471 = vmatpush3.bf16.msra.mxu1 %v484_v2  ;;  %v372_v33 = vld [vmem:[#allocation2] sm:$0x3] }
 0x170   :  { %376 = vst.msk [vmem:[%s686_s3] sm:$0x3] %vm113_vm1, %v372_v33 }
 0x22a   :  { %v159_v34 = vpop.f32.mrf.mxu1 }
 0x22b   :  { %v160_v35 = vadd.f32 %v579_v4, %v159_v34 }
 0x22c   :  { %v458_v36 = vpop.f32.mrf.mxu1 }
 0x22d   :  { %177 = vrot.lane.b32.xlu1 %v160_v35, %s528_s17  ;;  %v169_v40 = vadd.f32 %v415_v39, %v160_v35  ;;  %v428_v39 = vld [vmem:[%s685_s0 + $0x14] sm:$0x3] }
 0x22e   :  { %v162_v37 = vpop.f32.mrf.mxu1 }
 0x22f   :  { %v418_v41 = vmul.f32 -1.442695, %v169_v40 }
 0x230   :  { %v459_v38 = vpop.f32.mrf.mxu1 }
 0x231   :  { %187 = vrot.lane.b32.xlu1 %v160_v35, %s529_s18  ;;  %495 = vpow2.f32 %v418_v41  ;;  %v427_v35 = vld [vmem:[%s685_s0 + $0x12] sm:$0x3] }
 0x23e   :  { %v496_v42 = vpop.eup %495 }
 0x23f   :  { %v173_v43 = vadd.f32 1.0, %v496_v42 }
 0x241   :  { %497 = vrcp.f32 %v173_v43 }
 0x24e   :  { %v498_v49 = vpop.eup %497 }
 0x29f   :  { %v178_v45 = vpop.permute.xlu1 %177 }
 0x2a0   :  { %v180_v46 = vadd.f32 %v416_v44, %v178_v45 }
 0x2a2   :  { %v419_v47 = vmul.f32 -1.442695, %v180_v46 }
 0x2a3   :  { %v188_v48 = vpop.permute.xlu1 %187 }
 0x2a4   :  { %499 = vpow2.f32 %v419_v47  ;;  %v190_v50 = vmul.f32 %v498_v49, %v188_v48  ;;  %v429_v48 = vld [vmem:[%s685_s0 + $0x16] sm:$0x3] }
 0x2a6   :  { %v191_v54 = vadd.f32 %v417_v51, %v190_v50 }
 0x2b1   :  { %v500_v52 = vpop.eup %499 }
 0x2b2   :  { %v184_v53 = vadd.f32 1.0, %v500_v52 }
 0x2b4   :  { %501 = vrcp.f32 %v184_v53 }
 0x2b5   :  { %503 = vtanh.f32 %v191_v54 }
 0x2c1   :  { %v502_v55 = vpop.eup %501 }
 0x2c2   :  { %v193_v56 = vsub.f32 1.0, %v502_v55  ;;  %v504_v57 = vpop.eup %503  ;;  %v195_v58 = vmul.f32 %v502_v55, %v593_v31 }
 0x2c4   :  { %v194_v59 = vmul.f32 %v504_v57, %v193_v56 }
 0x2c6   :  { %v196_v60 = vadd.f32 %v195_v58, %v194_v59 }
 0x2c8   :  { %198 = vst.msk [vmem:[#allocation2 + $0x2] sm:$0x3] %vm113_vm1, %v196_v60  ;;  %v205_v61 = vpack.c.bf16 %v196_v60, %v196_v60 }
 0x2ca   :  { %465 = vmatmul.mubr.msk.bf16.vlgmr.msra.gmra.mxu0 %vm38_vm2, %v205_v61 }
 0x2cf   :  { %v373_v62 = vld [vmem:[#allocation2 + $0x2] sm:$0x3] }
 0x2d0   :  { %377 = vst.msk [vmem:[%s686_s3 + $0x2] sm:$0x3] %vm113_vm1, %v373_v62 }
 0x38a   :  { %v243_v63 = vpop.f32.mrf.mxu0 }
 0x38b   :  { %v244_v0 = vadd.f32 %v579_v4, %v243_v63 }
 0x38c   :  { %v466_v1 = vpop.f32.mrf.mxu0 }
 0x38d   :  { %271 = vrot.lane.b32.xlu1 %v244_v0, %s529_s18  ;;  %261 = vrot.lane.b32.xlu0 %v244_v0, %s528_s17  ;;  %v253_v6 = vadd.f32 %v421_v5, %v244_v0 }
 0x38e   :  { %v246_v2 = vpop.f32.mrf.mxu0 }
 0x38f   :  { %v424_v7 = vmul.f32 -1.442695, %v253_v6 }
 0x390   :  { %v467_v3 = vpop.f32.mrf.mxu0 }
 0x391   :  { %505 = vpow2.f32 %v424_v7 }
 0x39e   :  { %v506_v8 = vpop.eup %505 }
 0x39f   :  { %v257_v9 = vadd.f32 1.0, %v506_v8 }
 0x3a1   :  { %507 = vrcp.f32 %v257_v9 }
 0x3ae   :  { %v508_v15 = vpop.eup %507 }
 0x3ff   :  { %v262_v11 = vpop.permute.xlu0 %261  ;;  %v272_v14 = vpop.permute.xlu1 %271 }
 0x400   :  { %v264_v12 = vadd.f32 %v422_v10, %v262_v11  ;;  %v274_v16 = vmul.f32 %v508_v15, %v272_v14 }
 0x402   :  { %v425_v13 = vmul.f32 -1.442695, %v264_v12  ;;  %v275_v19 = vadd.f32 %v423_v17, %v274_v16 }
 0x404   :  { %509 = vpow2.f32 %v425_v13 }
 0x411   :  { %v510_v18 = vpop.eup %509 }
 0x412   :  { %v268_v20 = vadd.f32 1.0, %v510_v18 }
 0x414   :  { %511 = vrcp.f32 %v268_v20 }
 0x415   :  { %513 = vtanh.f32 %v275_v19 }
 0x421   :  { %v512_v21 = vpop.eup %511 }
 0x422   :  { %v277_v22 = vsub.f32 1.0, %v512_v21  ;;  %v514_v23 = vpop.eup %513  ;;  %v279_v25 = vmul.f32 %v512_v21, %v196_v60 }
 0x424   :  { %v278_v24 = vmul.f32 %v514_v23, %v277_v22 }
 0x426   :  { %v280_v26 = vadd.f32 %v279_v25, %v278_v24 }
 0x428   :  { %282 = vst.msk [vmem:[#allocation2 + $0x4] sm:$0x3] %vm113_vm1, %v280_v26  ;;  %v289_v27 = vpack.c.bf16 %v280_v26, %v280_v26 }
 0x42a   :  { %473 = vmatmul.mubr.msk.bf16.vlgmr.msra.gmra.mxu1 %vm38_vm2, %v289_v27 }
 0x42f   :  { %v374_v28 = vld [vmem:[#allocation2 + $0x4] sm:$0x3] }
 0x430   :  { %378 = vst.msk [vmem:[%s686_s3 + $0x4] sm:$0x3] %vm113_vm1, %v374_v28 }
 0x4ea   :  { %v327_v29 = vpop.f32.mrf.mxu1 }
 0x4eb   :  { %v328_v30 = vadd.f32 %v579_v4, %v327_v29 }
 0x4ec   :  { %v474_v32 = vpop.f32.mrf.mxu1 }
 0x4ed   :  { %355 = vrot.lane.b32.xlu1 %v328_v30, %s529_s18  ;;  %345 = vrot.lane.b32.xlu0 %v328_v30, %s528_s17  ;;  %v337_v4 = vadd.f32 %v427_v35, %v328_v30 }
 0x4ee   :  { %v330_v33 = vpop.f32.mrf.mxu1 }
 0x4ef   :  { %v430_v36 = vmul.f32 -1.442695, %v337_v4 }
 0x4f0   :  { %v475_v34 = vpop.f32.mrf.mxu1 }
 0x4f1   :  { %200 = vrot.lane.b32.xlu1 %v196_v60, %s530_s15  ;;  %116 = vrot.lane.b32.xlu0 %v593_v31, %s530_s15  ;;  %515 = vpow2.f32 %v430_v36 }
 0x4f5   :  { %284 = vrot.lane.b32.xlu0 %v280_v26, %s530_s15 }
 0x4fe   :  { %v516_v37 = vpop.eup %515 }
 0x4ff   :  { %v341_v38 = vadd.f32 1.0, %v516_v37 }
 0x501   :  { %517 = vrcp.f32 %v341_v38 }
 0x50e   :  { %v518_v46 = vpop.eup %517 }
 0x55f   :  { %v356_v40 = vpop.permute.xlu1 %355  ;;  %v346_v41 = vpop.permute.xlu0 %345 }
 0x560   :  { %v348_v42 = vadd.f32 %v428_v39, %v346_v41  ;;  %v358_v47 = vmul.f32 %v518_v46, %v356_v40 }
 0x562   :  { %v431_v31 = vmul.f32 -1.442695, %v348_v42  ;;  %v359_v50 = vadd.f32 %v429_v48, %v358_v47 }
 0x563   :  { %v201_v43 = vpop.permute.xlu1 %200  ;;  %v117_v44 = vpop.permute.xlu0 %116 }
 0x564   :  { %204 = vst.msk [vmem:[#allocation3 + $0x4] sm:$0x3] %vm113_vm1, %v201_v43  ;;  %120 = vst.msk [vmem:[#allocation3 + $0x6] sm:$0x3] %vm113_vm1, %v117_v44  ;;  %519 = vpow2.f32 %v431_v31 }
 0x567   :  { %v285_v45 = vpop.permute.xlu0 %284 }
 0x568   :  { %288 = vst.msk [vmem:[#allocation3 + $0x2] sm:$0x3] %vm113_vm1, %v285_v45 }
 0x56b   :  { %v383_v59 = vld [vmem:[#allocation3 + $0x6] sm:$0x3]  ;;  %v382_v1 = vld [vmem:[#allocation3 + $0x4] sm:$0x3] }
 0x56f   :  { %v381_v58 = vld [vmem:[#allocation3 + $0x2] sm:$0x3] }
 0x571   :  { %v520_v49 = vpop.eup %519 }
 0x572   :  { %v352_v51 = vadd.f32 1.0, %v520_v49 }
 0x574   :  { %521 = vrcp.f32 %v352_v51 }
 0x575   :  { %523 = vtanh.f32 %v359_v50 }
 0x581   :  { %v522_v52 = vpop.eup %521 }
 0x582   :  { %v361_v53 = vsub.f32 1.0, %v522_v52  ;;  %v524_v54 = vpop.eup %523  ;;  %v363_v56 = vmul.f32 %v522_v52, %v280_v26 }
 0x584   :  { %v362_v55 = vmul.f32 %v524_v54, %v361_v53 }
 0x586   :  { %v364_v57 = vadd.f32 %v363_v56, %v362_v55 }
 0x588   :  { %368 = vrot.lane.b32.xlu1 %v364_v57, %s530_s15  ;;  %366 = vst.msk [vmem:[#allocation2 + $0x6] sm:$0x3] %vm113_vm1, %v364_v57 }
 0x58c   :  { %390 = vrot.lane.b32.xlu1 %v381_v58, %s531_s2 }
 0x58f   :  { %v375_v60 = vld [vmem:[#allocation2 + $0x6] sm:$0x3] }
 0x590   :  { %394 = vrot.lane.b32.xlu1 %v383_v59, %s531_s2  ;;  %379 = vst.msk [vmem:[%s686_s3 + $0x6] sm:$0x3] %vm113_vm1, %v375_v60 }
 0x5fa   :  { %v369_v61 = vpop.permute.xlu1 %368 }
 0x5fb   :  { %371 = vst.msk [vmem:[#allocation3] sm:$0x3] %vm113_vm1, %v369_v61 }
 0x5fe   :  { %v391_v62 = vpop.permute.xlu1 %390 }
 0x5ff   :  { %402 = vst.msk [vmem:[%s686_s3 + $0x2] sm:$0x3] %vm400_vm3, %v391_v62 }
 0x602   :  { %v395_v63 = vpop.permute.xlu1 %394  ;;  %v380_v0 = vld [vmem:[#allocation3] sm:$0x3] }
 0x603   :  { %404 = vst.msk [vmem:[%s686_s3 + $0x6] sm:$0x3] %vm400_vm3, %v395_v63  ;;  %388 = vrot.lane.b32.xlu0 %v380_v0, %s531_s2 }
 0x607   :  { %392 = vrot.lane.b32.xlu0 %v382_v1, %s531_s2 }
 0x675   :  { %v389_v2 = vpop.permute.xlu0 %388 }
 0x676   :  { %401 = vst.msk [vmem:[%s686_s3] sm:$0x3] %vm400_vm3, %v389_v2 }
 0x679   :  { %v393_v3 = vpop.permute.xlu0 %392 }
 0x67a   :  { %403 = vst.msk [vmem:[%s686_s3 + $0x4] sm:$0x3] %vm400_vm3, %v393_v3 }

</bundles_post_ra>
